<compile_context>
chip_gen: v7x
topology: tpu7x:2x2x1
jax: 0.10.0
libtpu: 0.0.40
codegen_flags: <defaults>
</compile_context>

<pallas_src>
import functools

import numpy as np
import jax
import jax.numpy as jnp
from jax import lax
from jax.experimental import pallas as pl
from jax.experimental.pallas import tpu as pltpu

EPS = 1e-5


# ----------------- geometry helpers (host-side numpy constants) ------------ #
def _conv_row_select(n, h_in, h_out, kh, stride=2, pad=1):
    # L[n*Ho+ho, n*H+h] = 1  iff  h == stride*ho + kh - pad  (in range)
    L = np.zeros((n * h_out, n * h_in), np.float32)
    for b in range(n):
        for ho in range(h_out):
            h = stride * ho + kh - pad
            if 0 <= h < h_in:
                L[b * h_out + ho, b * h_in + h] = 1.0
    return L


def _deconv_row_select(n, h_in, h_out, kh, stride=2, pad=1):
    # L[n*Ho+ho, n*H+h] = 1  iff  stride*h == ho + pad - kh  (in range)
    L = np.zeros((n * h_out, n * h_in), np.float32)
    for b in range(n):
        for ho in range(h_out):
            t = ho + pad - kh
            if t % stride == 0:
                h = t // stride
                if 0 <= h < h_in:
                    L[b * h_out + ho, b * h_in + h] = 1.0
    return L


def _conv_col_gather(w_in, w_out, stride=2, pad=1, k=3):
    G = np.zeros((k, w_in, w_out), np.float32)
    for kw in range(k):
        for wo in range(w_out):
            w = stride * wo + kw - pad
            if 0 <= w < w_in:
                G[kw, w, wo] = 1.0
    return G


def _deconv_col_gather(w_in, w_out, stride=2, pad=1, k=3):
    G = np.zeros((k, w_in, w_out), np.float32)
    for kw in range(k):
        for wo in range(w_out):
            t = wo + pad - kw
            if t % stride == 0:
                w = t // stride
                if 0 <= w < w_in:
                    G[kw, w, wo] = 1.0
    return G


def _channel_mean_proj(c, w):
    # (C*W, C*W): averages the W lanes of each channel block (replicated back).
    return np.kron(np.eye(c, dtype=np.float32),
                   np.full((w, w), 1.0 / w, np.float32))


# ------------------------------ constant packer ----------------------------- #
class _Packer:
    """Packs many small 2-D constants into one lane-padded (rows, width) slab.

    Each constant gets a sublane-aligned row offset; the kernel slices it back
    with a static `ref[off:off+r, 0:c]` window.  One slab == one DMA.
    """

    def __init__(self, width, row_align):
        self.width = width
        self.align = row_align
        self.rows = 0
        self.chunks = []

    def add(self, arr):
        arr = np.asarray(arr, np.float32)
        assert arr.ndim == 2 and arr.shape[1] <= self.width, arr.shape
        off = self.rows
        self.chunks.append((off, arr))
        padded = ((arr.shape[0] + self.align - 1) // self.align) * self.align
        self.rows += max(padded, self.align)
        return (off, int(arr.shape[0]), int(arr.shape[1]))

    def buffer(self, dtype):
        total = max(self.rows, self.align)
        buf = np.zeros((total, self.width), np.float32)
        for off, arr in self.chunks:
            buf[off:off + arr.shape[0], :arr.shape[1]] = arr
        return jnp.asarray(buf, dtype=dtype)


# -------------------- host-side constant folding + packing ------------------ #
def _build_constants(p, n):
    """Returns (cfg, bf16_slab, f32_slab).

    cfg holds only static (row_offset, rows, cols) tuples into the two slabs.
    Conv/Linear biases that feed a train-mode BatchNorm are exact no-ops and
    are dropped; only fc2 keeps its bias.
    """
    pn = {k: np.asarray(v, np.float32) for k, v in p.items()}
    wb = _Packer(width=256, row_align=16)   # bf16 matmul operands
    wf = _Packer(width=256, row_align=8)    # f32 BN stats / scale-shift

    def bn2d_consts(gname, bname, cout, w_out):
        return {"P": wf.add(_channel_mean_proj(cout, w_out)),
                "g": wf.add(np.repeat(pn[gname], w_out).reshape(1, -1)),
                "b": wf.add(np.repeat(pn[bname], w_out).reshape(1, -1))}

    def bn1d_consts(gname, bname):
        return {"g": wf.add(pn[gname].reshape(1, -1)),
                "b": wf.add(pn[bname].reshape(1, -1))}

    def enc_layer(wname, gname, bname, h_in, h_out):
        w = pn[wname]                                   # (Cout, Cin, 3, 3)
        cout, cin, k, _ = w.shape
        G = _conv_col_gather(h_in, h_out, 2, 1, k)
        # R[kh, ci*W+w, co*Wo+wo] = sum_kw W[co,ci,kh,kw] * G[kw,w,wo]
        R = np.einsum("ochk,kvw->hcvow", w, G).reshape(k, cin * h_in, cout * h_out)
        layer = {"L": [wb.add(_conv_row_select(n, h_in, h_out, kh)) for kh in range(k)],
                 "R": [wb.add(R[kh]) for kh in range(k)]}
        layer.update(bn2d_consts(gname, bname, cout, h_out))
        return layer

    def dec_layer(wname, gname, bname, h_in, h_out):
        w = pn[wname]                                   # (Cin, Cout, 3, 3)
        cin, cout, k, _ = w.shape
        G = _deconv_col_gather(h_in, h_out, 2, 1, k)
        R = np.einsum("cohk,kvw->hcvow", w, G).reshape(k, cin * h_in, cout * h_out)
        layer = {"L": [wb.add(_deconv_row_select(n, h_in, h_out, kh)) for kh in range(k)],
                 "R": [wb.add(R[kh]) for kh in range(k)]}
        layer.update(bn2d_consts(gname, bname, cout, h_out))
        return layer

    # Flatten (C,H,W order) + Linear(192,256):  z = sum_h (Lf_h @ X) @ Rf_h
    flat_L, flat_R = [], []
    Rf = pn["fc1_w"].reshape(256, 12, 4, 4).transpose(2, 1, 3, 0)   # (h,c,w,o)
    for h in range(4):
        Lf = np.zeros((n, n * 4), np.float32)
        for b in range(n):
            Lf[b, b * 4 + h] = 1.0
        flat_L.append(wb.add(Lf))
        flat_R.append(wb.add(Rf[h].reshape(48, 256)))

    # Unflatten (N,192) -> (N*4, 12*4):  X = sum_h Lu_h @ (z @ Ru_h)
    unflat_L, unflat_R = [], []
    for h in range(4):
        Ru = np.zeros((192, 48), np.float32)
        for c in range(12):
            for w in range(4):
                Ru[c * 16 + h * 4 + w, c * 4 + w] = 1.0
        Lu = np.zeros((n * 4, n), np.float32)
        for b in range(n):
            Lu[b * 4 + h, b] = 1.0
        unflat_L.append(wb.add(Lu))
        unflat_R.append(wb.add(Ru))

    cfg = {
        "enc": [enc_layer("c1_w", "bn1_g", "bn1_b", 28, 14),
                enc_layer("c2_w", "bn2_g", "bn2_b", 14, 7),
                enc_layer("c3_w", "bn3_g", "bn3_b", 7, 4)],
        "flat_L": flat_L, "flat_R": flat_R,
        "bn4": bn1d_consts("bn4_g", "bn4_b"),
        "fc2_w": wb.add(pn["fc2_w"].T),
        "fc2_b": wf.add(pn["fc2_b"].reshape(1, -1)),
        "fc3_w": wb.add(pn["fc3_w"].T),
        "bn5": bn1d_consts("bn5_g", "bn5_b"),
        "fc4_w": wb.add(pn["fc4_w"].T),
        "bn6": bn1d_consts("bn6_g", "bn6_b"),
        "unflat_L": unflat_L, "unflat_R": unflat_R,
        "dec": [dec_layer("ct1_w", "bn7_g", "bn7_b", 4, 7),
                dec_layer("ct2_w", "bn8_g", "bn8_b", 7, 14),
                dec_layer("ct3_w", "bn9_g", "bn9_b", 14, 28)],
    }
    return cfg, wb.buffer(jnp.bfloat16), wf.buffer(jnp.float32)


# -------------------------------- Pallas kernel ------------------------------ #
def _ae_kernel(cfg, x_ref, wb_ref, wf_ref, o_ref):
    def wconst(spec):                      # bf16 matmul constant (aligned slice)
        off, r, c = spec
        return wb_ref[off:off + r, 0:c]

    def fconst(spec):                      # f32 BN constant (aligned slice)
        off, r, c = spec
        return wf_ref[off:off + r, 0:c]

    def dotf(a, b):
        return jnp.dot(a, b, preferred_element_type=jnp.float32)

    def b16(a):
        return a.astype(jnp.bfloat16)

    def row_mean(y):
        # mean over rows via a (1, rows) MXU matmul instead of an XLU reduce.
        rows = y.shape[0]
        ones = jnp.full((1, rows), 1.0 / rows, jnp.float32)
        return dotf(ones, y)

    def bn_apply(y, m, var, g_spec, b_spec):
        scale = fconst(g_spec) * lax.rsqrt(var + EPS)
        return y * scale + (fconst(b_spec) - m * scale)

    def bn2d(y, layer):
        # Train-mode BatchNorm2d in the (N*H, C*W) layout; stats stay f32.
        P = fconst(layer["P"])
        m = dotf(row_mean(y), P)           # per-channel mean over (n, h, w)
        m2 = dotf(row_mean(y * y), P)      # per-channel E[y^2]
        var = jnp.maximum(m2 - m * m, 0.0)
        return bn_apply(y, m, var, layer["g"], layer["b"])

    def bn1d(z, layer):
        m = row_mean(z)
        m2 = row_mean(z * z)
        var = jnp.maximum(m2 - m * m, 0.0)
        return bn_apply(z, m, var, layer["g"], layer["b"])

    def lrelu(y, slope=0.01):
        return jnp.where(y >= 0, y, slope * y)

    def sum3(t):
        return (t[0] + t[1]) + t[2]

    def enc_conv(x_bf, layer):
        # downsampling: contract rows first: y = sum_kh (L_kh @ x) @ R_kh
        taps = [dotf(b16(dotf(wconst(L), x_bf)), wconst(R))
                for L, R in zip(layer["L"], layer["R"])]
        return bn2d(sum3(taps), layer)

    def dec_conv(x_bf, layer):
        # upsampling: contract the small H_in side first: y = sum_kh L_kh @ (x @ R_kh)
        taps = [dotf(wconst(L), b16(dotf(x_bf, wconst(R))))
                for L, R in zip(layer["L"], layer["R"])]
        return bn2d(sum3(taps), layer)

    x = b16(x_ref[...])                                   # (N*28, 1*28)

    # ---- encoder: nn.LeakyReLU(True) -> negative_slope 1.0 -> identity ----
    x = b16(enc_conv(x, cfg["enc"][0]))                   # (N*14, 3*14)
    x = b16(enc_conv(x, cfg["enc"][1]))                   # (N*7 , 6*7)
    x = b16(enc_conv(x, cfg["enc"][2]))                   # (N*4 , 12*4)

    # ---- Flatten (C,H,W) + Linear(192,256); bias absorbed by BN4 ----
    taps = [dotf(b16(dotf(wconst(L), x)), wconst(R))
            for L, R in zip(cfg["flat_L"], cfg["flat_R"])]
    z = (taps[0] + taps[1]) + (taps[2] + taps[3])         # (N, 256)
    z = lrelu(bn1d(z, cfg["bn4"]))

    # ---- Linear(256,128): bias kept, no activation ----
    z = dotf(b16(z), wconst(cfg["fc2_w"])) + fconst(cfg["fc2_b"])   # (N, 128)

    # ---- decoder MLP ----
    z = lrelu(bn1d(dotf(b16(z), wconst(cfg["fc3_w"])), cfg["bn5"])) # (N, 256)
    z = bn1d(dotf(b16(z), wconst(cfg["fc4_w"])), cfg["bn6"])        # (N, 192)

    # ---- Unflatten (N,192) -> (N*4, 12*4) conv layout ----
    zb = b16(z)
    taps = [dotf(wconst(L), b16(dotf(zb, wconst(R))))
            for L, R in zip(cfg["unflat_L"], cfg["unflat_R"])]
    x = (taps[0] + taps[1]) + (taps[2] + taps[3])         # (N*4, 48)

    # ---- decoder transposed convs ----
    x = b16(lrelu(dec_conv(b16(x), cfg["dec"][0])))       # (N*7 , 6*7)
    x = b16(lrelu(dec_conv(x, cfg["dec"][1])))            # (N*14, 3*14)
    x = jnp.tanh(dec_conv(x, cfg["dec"][2]))              # (N*28, 1*28)

    o_ref[...] = x.astype(o_ref.dtype)


# --------------------------------- forward ----------------------------------- #
def make_forward(params, n):
    cfg, wbuf, fbuf = _build_constants(params, n)

    kernel = pl.pallas_call(
        functools.partial(_ae_kernel, cfg),
        out_shape=jax.ShapeDtypeStruct((n * 28, 28), jnp.float32),
        in_specs=[pl.BlockSpec(memory_space=pltpu.MemorySpace.VMEM)] * 3,
        out_specs=pl.BlockSpec(memory_space=pltpu.MemorySpace.VMEM),
        compiler_params=pltpu.CompilerParams(vmem_limit_bytes=8 * 1024 * 1024),
        cost_estimate=pl.CostEstimate(flops=3_500_000, transcendentals=4096,
                                      bytes_accessed=2_000_000),
    )

    @jax.jit
    def forward(x):
        xm = x.astype(jnp.float32).reshape(n * 28, 28)    # NCHW, C=1 -> (N*H, W)
        return kernel(xm, wbuf, fbuf).reshape(n, 1, 28, 28)

    return forward


# ----------------------------- parameter creation ---------------------------- #
def init_params(key):
    p = {}

    def nxt():
        nonlocal key
        key, sub = jax.random.split(key)
        return sub

    def w(shape, scale=0.1):
        return jax.random.normal(nxt(), shape, jnp.float32) * scale

    # encoder convs (biases created for module parity; exact no-ops under
    # train-mode BN so they are not fed to the kernel)
    p["c1_w"], p["c1_b"] = w((3, 1, 3, 3)), w((3,))
    p["bn1_g"], p["bn1_b"] = 1.0 + w((3,)), w((3,))
    p["c2_w"], p["c2_b"] = w((6, 3, 3, 3)), w((6,))
    p["bn2_g"], p["bn2_b"] = 1.0 + w((6,)), w((6,))
    p["c3_w"], p["c3_b"] = w((12, 6, 3, 3)), w((12,))
    p["bn3_g"], p["bn3_b"] = 1.0 + w((12,)), w((12,))
    # encoder linears
    p["fc1_w"], p["fc1_b"] = w((256, 192)), w((256,))
    p["bn4_g"], p["bn4_b"] = 1.0 + w((256,)), w((256,))
    p["fc2_w"], p["fc2_b"] = w((128, 256)), w((128,))
    # decoder linears
    p["fc3_w"], p["fc3_b"] = w((256, 128)), w((256,))
    p["bn5_g"], p["bn5_b"] = 1.0 + w((256,)), w((256,))
    p["fc4_w"], p["fc4_b"] = w((192, 256)), w((192,))
    p["bn6_g"], p["bn6_b"] = 1.0 + w((192,)), w((192,))
    # decoder transposed convs (PyTorch layout: (Cin, Cout, k, k))
    p["ct1_w"], p["ct1_b"] = w((12, 6, 3, 3)), w((6,))
    p["bn7_g"], p["bn7_b"] = 1.0 + w((6,)), w((6,))
    p["ct2_w"], p["ct2_b"] = w((6, 3, 3, 3)), w((3,))
    p["bn8_g"], p["bn8_b"] = 1.0 + w((3,)), w((3,))
    p["ct3_w"], p["ct3_b"] = w((3, 1, 3, 3)), w((1,))
    p["bn9_g"], p["bn9_b"] = 1.0 + w((1,)), w((1,))
    return p


# ------------------------------------ main ----------------------------------- #
if __name__ == "__main__":
    key = jax.random.PRNGKey(0)
    pkey, xkey = jax.random.split(key)
    params = init_params(pkey)

    # MNIST-shaped input implied by Linear(192, ...): N=2, C=1, H=W=28
    x = jax.random.normal(xkey, (2, 1, 28, 28), jnp.float32)

    fwd = make_forward(params, n=2)
    out = jax.block_until_ready(fwd(x))

    assert out.shape == (2, 1, 28, 28), out.shape
    assert bool(jnp.all(jnp.isfinite(out)))
    print("KERNEL_OK")
</pallas_src>

<mosaic_0001>
module attributes {stable_mosaic.version = 11 : i64} {
  func.func @_ae_kernel(%arg0: memref<56x28xf32, #tpu.memory_space<vmem>>, %arg1: memref<3072x256xbf16, #tpu.memory_space<vmem>>, %arg2: memref<424x256xf32, #tpu.memory_space<vmem>>, %arg3: memref<56x28xf32, #tpu.memory_space<vmem>>) attributes {dimension_semantics = [], scalar_prefetch = 0 : i64, scratch_operands = 0 : i64, tpu.core_type = #tpu.core_type<tc>} {
    %c0 = arith.constant 0 : index
    %c0_0 = arith.constant 0 : index
    %0 = vector.load %arg0[%c0, %c0_0] : memref<56x28xf32, #tpu.memory_space<vmem>>, vector<56x28xf32>
    %1 = arith.truncf %0 : vector<56x28xf32> to vector<56x28xbf16>
    %c1088 = arith.constant 1088 : index
    %c0_1 = arith.constant 0 : index
    %2 = vector.load %arg1[%c1088, %c0_1] : memref<3072x256xbf16, #tpu.memory_space<vmem>>, vector<28x56xbf16>
    %cst = arith.constant dense<0.000000e+00> : vector<28x28xf32>
    %3 = tpu.matmul %2, %1, %cst {dimension_numbers = #tpu.dot_dimension_numbers<[1], [0], [0], [1], [0, 0, 1, 1], [], []>} : vector<28x56xbf16>, vector<56x28xbf16>, vector<28x28xf32> -> vector<28x28xf32>
    %4 = arith.truncf %3 : vector<28x28xf32> to vector<28x28xbf16>
    %c1184 = arith.constant 1184 : index
    %c0_2 = arith.constant 0 : index
    %5 = vector.load %arg1[%c1184, %c0_2] : memref<3072x256xbf16, #tpu.memory_space<vmem>>, vector<28x42xbf16>
    %cst_3 = arith.constant dense<0.000000e+00> : vector<28x42xf32>
    %6 = tpu.matmul %4, %5, %cst_3 {dimension_numbers = #tpu.dot_dimension_numbers<[1], [0], [0], [1], [0, 0, 1, 1], [], []>} : vector<28x28xbf16>, vector<28x42xbf16>, vector<28x42xf32> -> vector<28x42xf32>
    %c1120 = arith.constant 1120 : index
    %c0_4 = arith.constant 0 : index
    %7 = vector.load %arg1[%c1120, %c0_4] : memref<3072x256xbf16, #tpu.memory_space<vmem>>, vector<28x56xbf16>
    %cst_5 = arith.constant dense<0.000000e+00> : vector<28x28xf32>
    %8 = tpu.matmul %7, %1, %cst_5 {dimension_numbers = #tpu.dot_dimension_numbers<[1], [0], [0], [1], [0, 0, 1, 1], [], []>} : vector<28x56xbf16>, vector<56x28xbf16>, vector<28x28xf32> -> vector<28x28xf32>
    %9 = arith.truncf %8 : vector<28x28xf32> to vector<28x28xbf16>
    %c1216 = arith.constant 1216 : index
    %c0_6 = arith.constant 0 : index
    %10 = vector.load %arg1[%c1216, %c0_6] : memref<3072x256xbf16, #tpu.memory_space<vmem>>, vector<28x42xbf16>
    %cst_7 = arith.constant dense<0.000000e+00> : vector<28x42xf32>
    %11 = tpu.matmul %9, %10, %cst_7 {dimension_numbers = #tpu.dot_dimension_numbers<[1], [0], [0], [1], [0, 0, 1, 1], [], []>} : vector<28x28xbf16>, vector<28x42xbf16>, vector<28x42xf32> -> vector<28x42xf32>
    %c1152 = arith.constant 1152 : index
    %c0_8 = arith.constant 0 : index
    %12 = vector.load %arg1[%c1152, %c0_8] : memref<3072x256xbf16, #tpu.memory_space<vmem>>, vector<28x56xbf16>
    %cst_9 = arith.constant dense<0.000000e+00> : vector<28x28xf32>
    %13 = tpu.matmul %12, %1, %cst_9 {dimension_numbers = #tpu.dot_dimension_numbers<[1], [0], [0], [1], [0, 0, 1, 1], [], []>} : vector<28x56xbf16>, vector<56x28xbf16>, vector<28x28xf32> -> vector<28x28xf32>
    %14 = arith.truncf %13 : vector<28x28xf32> to vector<28x28xbf16>
    %c1248 = arith.constant 1248 : index
    %c0_10 = arith.constant 0 : index
    %15 = vector.load %arg1[%c1248, %c0_10] : memref<3072x256xbf16, #tpu.memory_space<vmem>>, vector<28x42xbf16>
    %cst_11 = arith.constant dense<0.000000e+00> : vector<28x42xf32>
    %16 = tpu.matmul %14, %15, %cst_11 {dimension_numbers = #tpu.dot_dimension_numbers<[1], [0], [0], [1], [0, 0, 1, 1], [], []>} : vector<28x28xbf16>, vector<28x42xbf16>, vector<28x42xf32> -> vector<28x42xf32>
    %17 = arith.addf %6, %11 : vector<28x42xf32>
    %18 = arith.addf %17, %16 : vector<28x42xf32>
    %c0_12 = arith.constant 0 : index
    %c0_13 = arith.constant 0 : index
    %19 = vector.load %arg2[%c0_12, %c0_13] : memref<424x256xf32, #tpu.memory_space<vmem>>, vector<42x42xf32>
    %cst_14 = arith.constant 0.0357142873 : f32
    %20 = vector.broadcast %cst_14 : f32 to vector<1x28xf32>
    %cst_15 = arith.constant dense<0.000000e+00> : vector<1x42xf32>
    %21 = tpu.matmul %20, %18, %cst_15 {dimension_numbers = #tpu.dot_dimension_numbers<[1], [0], [0], [1], [0, 0, 1, 1], [], []>} : vector<1x28xf32>, vector<28x42xf32>, vector<1x42xf32> -> vector<1x42xf32>
    %cst_16 = arith.constant dense<0.000000e+00> : vector<1x42xf32>
    %22 = tpu.matmul %21, %19, %cst_16 {dimension_numbers = #tpu.dot_dimension_numbers<[1], [0], [0], [1], [0, 0, 1, 1], [], []>} : vector<1x42xf32>, vector<42x42xf32>, vector<1x42xf32> -> vector<1x42xf32>
    %23 = arith.mulf %18, %18 : vector<28x42xf32>
    %cst_17 = arith.constant 0.0357142873 : f32
    %24 = vector.broadcast %cst_17 : f32 to vector<1x28xf32>
    %cst_18 = arith.constant dense<0.000000e+00> : vector<1x42xf32>
    %25 = tpu.matmul %24, %23, %cst_18 {dimension_numbers = #tpu.dot_dimension_numbers<[1], [0], [0], [1], [0, 0, 1, 1], [], []>} : vector<1x28xf32>, vector<28x42xf32>, vector<1x42xf32> -> vector<1x42xf32>
    %cst_19 = arith.constant dense<0.000000e+00> : vector<1x42xf32>
    %26 = tpu.matmul %25, %19, %cst_19 {dimension_numbers = #tpu.dot_dimension_numbers<[1], [0], [0], [1], [0, 0, 1, 1], [], []>} : vector<1x42xf32>, vector<42x42xf32>, vector<1x42xf32> -> vector<1x42xf32>
    %27 = arith.mulf %22, %22 : vector<1x42xf32>
    %28 = arith.subf %26, %27 : vector<1x42xf32>
    %cst_20 = arith.constant 0.000000e+00 : f32
    %29 = vector.broadcast %cst_20 : f32 to vector<1x42xf32>
    %30 = arith.maximumf %28, %29 : vector<1x42xf32>
    %c48 = arith.constant 48 : index
    %c0_21 = arith.constant 0 : index
    %31 = vector.load %arg2[%c48, %c0_21] : memref<424x256xf32, #tpu.memory_space<vmem>>, vector<1x42xf32>
    %cst_22 = arith.constant 9.99999974E-6 : f32
    %32 = vector.broadcast %cst_22 : f32 to vector<1x42xf32>
    %33 = arith.addf %30, %32 : vector<1x42xf32>
    %34 = math.rsqrt %33 : vector<1x42xf32>
    %35 = arith.mulf %31, %34 : vector<1x42xf32>
    %36 = vector.broadcast %35 : vector<1x42xf32> to vector<28x42xf32>
    %37 = arith.mulf %18, %36 : vector<28x42xf32>
    %c56 = arith.constant 56 : index
    %c0_23 = arith.constant 0 : index
    %38 = vector.load %arg2[%c56, %c0_23] : memref<424x256xf32, #tpu.memory_space<vmem>>, vector<1x42xf32>
    %39 = arith.mulf %22, %35 : vector<1x42xf32>
    %40 = arith.subf %38, %39 : vector<1x42xf32>
    %41 = vector.broadcast %40 : vector<1x42xf32> to vector<28x42xf32>
    %42 = arith.addf %37, %41 : vector<28x42xf32>
    %43 = arith.truncf %42 : vector<28x42xf32> to vector<28x42xbf16>
    %c1280 = arith.constant 1280 : index
    %c0_24 = arith.constant 0 : index
    %44 = vector.load %arg1[%c1280, %c0_24] : memref<3072x256xbf16, #tpu.memory_space<vmem>>, vector<14x28xbf16>
    %cst_25 = arith.constant dense<0.000000e+00> : vector<14x42xf32>
    %45 = tpu.matmul %44, %43, %cst_25 {dimension_numbers = #tpu.dot_dimension_numbers<[1], [0], [0], [1], [0, 0, 1, 1], [], []>} : vector<14x28xbf16>, vector<28x42xbf16>, vector<14x42xf32> -> vector<14x42xf32>
    %46 = arith.truncf %45 : vector<14x42xf32> to vector<14x42xbf16>
    %c1328 = arith.constant 1328 : index
    %c0_26 = arith.constant 0 : index
    %47 = vector.load %arg1[%c1328, %c0_26] : memref<3072x256xbf16, #tpu.memory_space<vmem>>, vector<42x42xbf16>
    %cst_27 = arith.constant dense<0.000000e+00> : vector<14x42xf32>
    %48 = tpu.matmul %46, %47, %cst_27 {dimension_numbers = #tpu.dot_dimension_numbers<[1], [0], [0], [1], [0, 0, 1, 1], [], []>} : vector<14x42xbf16>, vector<42x42xbf16>, vector<14x42xf32> -> vector<14x42xf32>
    %c1296 = arith.constant 1296 : index
    %c0_28 = arith.constant 0 : index
    %49 = vector.load %arg1[%c1296, %c0_28] : memref<3072x256xbf16, #tpu.memory_space<vmem>>, vector<14x28xbf16>
    %cst_29 = arith.constant dense<0.000000e+00> : vector<14x42xf32>
    %50 = tpu.matmul %49, %43, %cst_29 {dimension_numbers = #tpu.dot_dimension_numbers<[1], [0], [0], [1], [0, 0, 1, 1], [], []>} : vector<14x28xbf16>, vector<28x42xbf16>, vector<14x42xf32> -> vector<14x42xf32>
    %51 = arith.truncf %50 : vector<14x42xf32> to vector<14x42xbf16>
    %c1376 = arith.constant 1376 : index
    %c0_30 = arith.constant 0 : index
    %52 = vector.load %arg1[%c1376, %c0_30] : memref<3072x256xbf16, #tpu.memory_space<vmem>>, vector<42x42xbf16>
    %cst_31 = arith.constant dense<0.000000e+00> : vector<14x42xf32>
    %53 = tpu.matmul %51, %52, %cst_31 {dimension_numbers = #tpu.dot_dimension_numbers<[1], [0], [0], [1], [0, 0, 1, 1], [], []>} : vector<14x42xbf16>, vector<42x42xbf16>, vector<14x42xf32> -> vector<14x42xf32>
    %c1312 = arith.constant 1312 : index
    %c0_32 = arith.constant 0 : index
    %54 = vector.load %arg1[%c1312, %c0_32] : memref<3072x256xbf16, #tpu.memory_space<vmem>>, vector<14x28xbf16>
    %cst_33 = arith.constant dense<0.000000e+00> : vector<14x42xf32>
    %55 = tpu.matmul %54, %43, %cst_33 {dimension_numbers = #tpu.dot_dimension_numbers<[1], [0], [0], [1], [0, 0, 1, 1], [], []>} : vector<14x28xbf16>, vector<28x42xbf16>, vector<14x42xf32> -> vector<14x42xf32>
    %56 = arith.truncf %55 : vector<14x42xf32> to vector<14x42xbf16>
    %c1424 = arith.constant 1424 : index
    %c0_34 = arith.constant 0 : index
    %57 = vector.load %arg1[%c1424, %c0_34] : memref<3072x256xbf16, #tpu.memory_space<vmem>>, vector<42x42xbf16>
    %cst_35 = arith.constant dense<0.000000e+00> : vector<14x42xf32>
    %58 = tpu.matmul %56, %57, %cst_35 {dimension_numbers = #tpu.dot_dimension_numbers<[1], [0], [0], [1], [0, 0, 1, 1], [], []>} : vector<14x42xbf16>, vector<42x42xbf16>, vector<14x42xf32> -> vector<14x42xf32>
    %59 = arith.addf %48, %53 : vector<14x42xf32>
    %60 = arith.addf %59, %58 : vector<14x42xf32>
    %c64 = arith.constant 64 : index
    %c0_36 = arith.constant 0 : index
    %61 = vector.load %arg2[%c64, %c0_36] : memref<424x256xf32, #tpu.memory_space<vmem>>, vector<42x42xf32>
    %cst_37 = arith.constant 0.0714285746 : f32
    %62 = vector.broadcast %cst_37 : f32 to vector<1x14xf32>
    %cst_38 = arith.constant dense<0.000000e+00> : vector<1x42xf32>
    %63 = tpu.matmul %62, %60, %cst_38 {dimension_numbers = #tpu.dot_dimension_numbers<[1], [0], [0], [1], [0, 0, 1, 1], [], []>} : vector<1x14xf32>, vector<14x42xf32>, vector<1x42xf32> -> vector<1x42xf32>
    %cst_39 = arith.constant dense<0.000000e+00> : vector<1x42xf32>
    %64 = tpu.matmul %63, %61, %cst_39 {dimension_numbers = #tpu.dot_dimension_numbers<[1], [0], [0], [1], [0, 0, 1, 1], [], []>} : vector<1x42xf32>, vector<42x42xf32>, vector<1x42xf32> -> vector<1x42xf32>
    %65 = arith.mulf %60, %60 : vector<14x42xf32>
    %cst_40 = arith.constant 0.0714285746 : f32
    %66 = vector.broadcast %cst_40 : f32 to vector<1x14xf32>
    %cst_41 = arith.constant dense<0.000000e+00> : vector<1x42xf32>
    %67 = tpu.matmul %66, %65, %cst_41 {dimension_numbers = #tpu.dot_dimension_numbers<[1], [0], [0], [1], [0, 0, 1, 1], [], []>} : vector<1x14xf32>, vector<14x42xf32>, vector<1x42xf32> -> vector<1x42xf32>
    %cst_42 = arith.constant dense<0.000000e+00> : vector<1x42xf32>
    %68 = tpu.matmul %67, %61, %cst_42 {dimension_numbers = #tpu.dot_dimension_numbers<[1], [0], [0], [1], [0, 0, 1, 1], [], []>} : vector<1x42xf32>, vector<42x42xf32>, vector<1x42xf32> -> vector<1x42xf32>
    %69 = arith.mulf %64, %64 : vector<1x42xf32>
    %70 = arith.subf %68, %69 : vector<1x42xf32>
    %cst_43 = arith.constant 0.000000e+00 : f32
    %71 = vector.broadcast %cst_43 : f32 to vector<1x42xf32>
    %72 = arith.maximumf %70, %71 : vector<1x42xf32>
    %c112 = arith.constant 112 : index
    %c0_44 = arith.constant 0 : index
    %73 = vector.load %arg2[%c112, %c0_44] : memref<424x256xf32, #tpu.memory_space<vmem>>, vector<1x42xf32>
    %cst_45 = arith.constant 9.99999974E-6 : f32
    %74 = vector.broadcast %cst_45 : f32 to vector<1x42xf32>
    %75 = arith.addf %72, %74 : vector<1x42xf32>
    %76 = math.rsqrt %75 : vector<1x42xf32>
    %77 = arith.mulf %73, %76 : vector<1x42xf32>
    %78 = vector.broadcast %77 : vector<1x42xf32> to vector<14x42xf32>
    %79 = arith.mulf %60, %78 : vector<14x42xf32>
    %c120 = arith.constant 120 : index
    %c0_46 = arith.constant 0 : index
    %80 = vector.load %arg2[%c120, %c0_46] : memref<424x256xf32, #tpu.memory_space<vmem>>, vector<1x42xf32>
    %81 = arith.mulf %64, %77 : vector<1x42xf32>
    %82 = arith.subf %80, %81 : vector<1x42xf32>
    %83 = vector.broadcast %82 : vector<1x42xf32> to vector<14x42xf32>
    %84 = arith.addf %79, %83 : vector<14x42xf32>
    %85 = arith.truncf %84 : vector<14x42xf32> to vector<14x42xbf16>
    %c1472 = arith.constant 1472 : index
    %c0_47 = arith.constant 0 : index
    %86 = vector.load %arg1[%c1472, %c0_47] : memref<3072x256xbf16, #tpu.memory_space<vmem>>, vector<8x14xbf16>
    %cst_48 = arith.constant dense<0.000000e+00> : vector<8x42xf32>
    %87 = tpu.matmul %86, %85, %cst_48 {dimension_numbers = #tpu.dot_dimension_numbers<[1], [0], [0], [1], [0, 0, 1, 1], [], []>} : vector<8x14xbf16>, vector<14x42xbf16>, vector<8x42xf32> -> vector<8x42xf32>
    %88 = arith.truncf %87 : vector<8x42xf32> to vector<8x42xbf16>
    %c1520 = arith.constant 1520 : index
    %c0_49 = arith.constant 0 : index
    %89 = vector.load %arg1[%c1520, %c0_49] : memref<3072x256xbf16, #tpu.memory_space<vmem>>, vector<42x48xbf16>
    %cst_50 = arith.constant dense<0.000000e+00> : vector<8x48xf32>
    %90 = tpu.matmul %88, %89, %cst_50 {dimension_numbers = #tpu.dot_dimension_numbers<[1], [0], [0], [1], [0, 0, 1, 1], [], []>} : vector<8x42xbf16>, vector<42x48xbf16>, vector<8x48xf32> -> vector<8x48xf32>
    %c1488 = arith.constant 1488 : index
    %c0_51 = arith.constant 0 : index
    %91 = vector.load %arg1[%c1488, %c0_51] : memref<3072x256xbf16, #tpu.memory_space<vmem>>, vector<8x14xbf16>
    %cst_52 = arith.constant dense<0.000000e+00> : vector<8x42xf32>
    %92 = tpu.matmul %91, %85, %cst_52 {dimension_numbers = #tpu.dot_dimension_numbers<[1], [0], [0], [1], [0, 0, 1, 1], [], []>} : vector<8x14xbf16>, vector<14x42xbf16>, vector<8x42xf32> -> vector<8x42xf32>
    %93 = arith.truncf %92 : vector<8x42xf32> to vector<8x42xbf16>
    %c1568 = arith.constant 1568 : index
    %c0_53 = arith.constant 0 : index
    %94 = vector.load %arg1[%c1568, %c0_53] : memref<3072x256xbf16, #tpu.memory_space<vmem>>, vector<42x48xbf16>
    %cst_54 = arith.constant dense<0.000000e+00> : vector<8x48xf32>
    %95 = tpu.matmul %93, %94, %cst_54 {dimension_numbers = #tpu.dot_dimension_numbers<[1], [0], [0], [1], [0, 0, 1, 1], [], []>} : vector<8x42xbf16>, vector<42x48xbf16>, vector<8x48xf32> -> vector<8x48xf32>
    %c1504 = arith.constant 1504 : index
    %c0_55 = arith.constant 0 : index
    %96 = vector.load %arg1[%c1504, %c0_55] : memref<3072x256xbf16, #tpu.memory_space<vmem>>, vector<8x14xbf16>
    %cst_56 = arith.constant dense<0.000000e+00> : vector<8x42xf32>
    %97 = tpu.matmul %96, %85, %cst_56 {dimension_numbers = #tpu.dot_dimension_numbers<[1], [0], [0], [1], [0, 0, 1, 1], [], []>} : vector<8x14xbf16>, vector<14x42xbf16>, vector<8x42xf32> -> vector<8x42xf32>
    %98 = arith.truncf %97 : vector<8x42xf32> to vector<8x42xbf16>
    %c1616 = arith.constant 1616 : index
    %c0_57 = arith.constant 0 : index
    %99 = vector.load %arg1[%c1616, %c0_57] : memref<3072x256xbf16, #tpu.memory_space<vmem>>, vector<42x48xbf16>
    %cst_58 = arith.constant dense<0.000000e+00> : vector<8x48xf32>
    %100 = tpu.matmul %98, %99, %cst_58 {dimension_numbers = #tpu.dot_dimension_numbers<[1], [0], [0], [1], [0, 0, 1, 1], [], []>} : vector<8x42xbf16>, vector<42x48xbf16>, vector<8x48xf32> -> vector<8x48xf32>
    %101 = arith.addf %90, %95 : vector<8x48xf32>
    %102 = arith.addf %101, %100 : vector<8x48xf32>
    %c128 = arith.constant 128 : index
    %c0_59 = arith.constant 0 : index
    %103 = vector.load %arg2[%c128, %c0_59] : memref<424x256xf32, #tpu.memory_space<vmem>>, vector<48x48xf32>
    %cst_60 = arith.constant 1.250000e-01 : f32
    %104 = vector.broadcast %cst_60 : f32 to vector<1x8xf32>
    %cst_61 = arith.constant dense<0.000000e+00> : vector<1x48xf32>
    %105 = tpu.matmul %104, %102, %cst_61 {dimension_numbers = #tpu.dot_dimension_numbers<[1], [0], [0], [1], [0, 0, 1, 1], [], []>} : vector<1x8xf32>, vector<8x48xf32>, vector<1x48xf32> -> vector<1x48xf32>
    %cst_62 = arith.constant dense<0.000000e+00> : vector<1x48xf32>
    %106 = tpu.matmul %105, %103, %cst_62 {dimension_numbers = #tpu.dot_dimension_numbers<[1], [0], [0], [1], [0, 0, 1, 1], [], []>} : vector<1x48xf32>, vector<48x48xf32>, vector<1x48xf32> -> vector<1x48xf32>
    %107 = arith.mulf %102, %102 : vector<8x48xf32>
    %cst_63 = arith.constant 1.250000e-01 : f32
    %108 = vector.broadcast %cst_63 : f32 to vector<1x8xf32>
    %cst_64 = arith.constant dense<0.000000e+00> : vector<1x48xf32>
    %109 = tpu.matmul %108, %107, %cst_64 {dimension_numbers = #tpu.dot_dimension_numbers<[1], [0], [0], [1], [0, 0, 1, 1], [], []>} : vector<1x8xf32>, vector<8x48xf32>, vector<1x48xf32> -> vector<1x48xf32>
    %cst_65 = arith.constant dense<0.000000e+00> : vector<1x48xf32>
    %110 = tpu.matmul %109, %103, %cst_65 {dimension_numbers = #tpu.dot_dimension_numbers<[1], [0], [0], [1], [0, 0, 1, 1], [], []>} : vector<1x48xf32>, vector<48x48xf32>, vector<1x48xf32> -> vector<1x48xf32>
    %111 = arith.mulf %106, %106 : vector<1x48xf32>
    %112 = arith.subf %110, %111 : vector<1x48xf32>
    %cst_66 = arith.constant 0.000000e+00 : f32
    %113 = vector.broadcast %cst_66 : f32 to vector<1x48xf32>
    %114 = arith.maximumf %112, %113 : vector<1x48xf32>
    %c176 = arith.constant 176 : index
    %c0_67 = arith.constant 0 : index
    %115 = vector.load %arg2[%c176, %c0_67] : memref<424x256xf32, #tpu.memory_space<vmem>>, vector<1x48xf32>
    %cst_68 = arith.constant 9.99999974E-6 : f32
    %116 = vector.broadcast %cst_68 : f32 to vector<1x48xf32>
    %117 = arith.addf %114, %116 : vector<1x48xf32>
    %118 = math.rsqrt %117 : vector<1x48xf32>
    %119 = arith.mulf %115, %118 : vector<1x48xf32>
    %120 = vector.broadcast %119 : vector<1x48xf32> to vector<8x48xf32>
    %121 = arith.mulf %102, %120 : vector<8x48xf32>
    %c184 = arith.constant 184 : index
    %c0_69 = arith.constant 0 : index
    %122 = vector.load %arg2[%c184, %c0_69] : memref<424x256xf32, #tpu.memory_space<vmem>>, vector<1x48xf32>
    %123 = arith.mulf %106, %119 : vector<1x48xf32>
    %124 = arith.subf %122, %123 : vector<1x48xf32>
    %125 = vector.broadcast %124 : vector<1x48xf32> to vector<8x48xf32>
    %126 = arith.addf %121, %125 : vector<8x48xf32>
    %127 = arith.truncf %126 : vector<8x48xf32> to vector<8x48xbf16>
    %c0_70 = arith.constant 0 : index
    %c0_71 = arith.constant 0 : index
    %128 = vector.load %arg1[%c0_70, %c0_71] : memref<3072x256xbf16, #tpu.memory_space<vmem>>, vector<2x8xbf16>
    %cst_72 = arith.constant dense<0.000000e+00> : vector<2x48xf32>
    %129 = tpu.matmul %128, %127, %cst_72 {dimension_numbers = #tpu.dot_dimension_numbers<[1], [0], [0], [1], [0, 0, 1, 1], [], []>} : vector<2x8xbf16>, vector<8x48xbf16>, vector<2x48xf32> -> vector<2x48xf32>
    %130 = arith.truncf %129 : vector<2x48xf32> to vector<2x48xbf16>
    %c16 = arith.constant 16 : index
    %c0_73 = arith.constant 0 : index
    %131 = vector.load %arg1[%c16, %c0_73] : memref<3072x256xbf16, #tpu.memory_space<vmem>>, vector<48x256xbf16>
    %cst_74 = arith.constant dense<0.000000e+00> : vector<2x256xf32>
    %132 = tpu.matmul %130, %131, %cst_74 {dimension_numbers = #tpu.dot_dimension_numbers<[1], [0], [0], [1], [0, 0, 1, 1], [], []>} : vector<2x48xbf16>, vector<48x256xbf16>, vector<2x256xf32> -> vector<2x256xf32>
    %c64_75 = arith.constant 64 : index
    %c0_76 = arith.constant 0 : index
    %133 = vector.load %arg1[%c64_75, %c0_76] : memref<3072x256xbf16, #tpu.memory_space<vmem>>, vector<2x8xbf16>
    %cst_77 = arith.constant dense<0.000000e+00> : vector<2x48xf32>
    %134 = tpu.matmul %133, %127, %cst_77 {dimension_numbers = #tpu.dot_dimension_numbers<[1], [0], [0], [1], [0, 0, 1, 1], [], []>} : vector<2x8xbf16>, vector<8x48xbf16>, vector<2x48xf32> -> vector<2x48xf32>
    %135 = arith.truncf %134 : vector<2x48xf32> to vector<2x48xbf16>
    %c80 = arith.constant 80 : index
    %c0_78 = arith.constant 0 : index
    %136 = vector.load %arg1[%c80, %c0_78] : memref<3072x256xbf16, #tpu.memory_space<vmem>>, vector<48x256xbf16>
    %cst_79 = arith.constant dense<0.000000e+00> : vector<2x256xf32>
    %137 = tpu.matmul %135, %136, %cst_79 {dimension_numbers = #tpu.dot_dimension_numbers<[1], [0], [0], [1], [0, 0, 1, 1], [], []>} : vector<2x48xbf16>, vector<48x256xbf16>, vector<2x256xf32> -> vector<2x256xf32>
    %c128_80 = arith.constant 128 : index
    %c0_81 = arith.constant 0 : index
    %138 = vector.load %arg1[%c128_80, %c0_81] : memref<3072x256xbf16, #tpu.memory_space<vmem>>, vector<2x8xbf16>
    %cst_82 = arith.constant dense<0.000000e+00> : vector<2x48xf32>
    %139 = tpu.matmul %138, %127, %cst_82 {dimension_numbers = #tpu.dot_dimension_numbers<[1], [0], [0], [1], [0, 0, 1, 1], [], []>} : vector<2x8xbf16>, vector<8x48xbf16>, vector<2x48xf32> -> vector<2x48xf32>
    %140 = arith.truncf %139 : vector<2x48xf32> to vector<2x48xbf16>
    %c144 = arith.constant 144 : index
    %c0_83 = arith.constant 0 : index
    %141 = vector.load %arg1[%c144, %c0_83] : memref<3072x256xbf16, #tpu.memory_space<vmem>>, vector<48x256xbf16>
    %cst_84 = arith.constant dense<0.000000e+00> : vector<2x256xf32>
    %142 = tpu.matmul %140, %141, %cst_84 {dimension_numbers = #tpu.dot_dimension_numbers<[1], [0], [0], [1], [0, 0, 1, 1], [], []>} : vector<2x48xbf16>, vector<48x256xbf16>, vector<2x256xf32> -> vector<2x256xf32>
    %c192 = arith.constant 192 : index
    %c0_85 = arith.constant 0 : index
    %143 = vector.load %arg1[%c192, %c0_85] : memref<3072x256xbf16, #tpu.memory_space<vmem>>, vector<2x8xbf16>
    %cst_86 = arith.constant dense<0.000000e+00> : vector<2x48xf32>
    %144 = tpu.matmul %143, %127, %cst_86 {dimension_numbers = #tpu.dot_dimension_numbers<[1], [0], [0], [1], [0, 0, 1, 1], [], []>} : vector<2x8xbf16>, vector<8x48xbf16>, vector<2x48xf32> -> vector<2x48xf32>
    %145 = arith.truncf %144 : vector<2x48xf32> to vector<2x48xbf16>
    %c208 = arith.constant 208 : index
    %c0_87 = arith.constant 0 : index
    %146 = vector.load %arg1[%c208, %c0_87] : memref<3072x256xbf16, #tpu.memory_space<vmem>>, vector<48x256xbf16>
    %cst_88 = arith.constant dense<0.000000e+00> : vector<2x256xf32>
    %147 = tpu.matmul %145, %146, %cst_88 {dimension_numbers = #tpu.dot_dimension_numbers<[1], [0], [0], [1], [0, 0, 1, 1], [], []>} : vector<2x48xbf16>, vector<48x256xbf16>, vector<2x256xf32> -> vector<2x256xf32>
    %148 = arith.addf %132, %137 : vector<2x256xf32>
    %149 = arith.addf %142, %147 : vector<2x256xf32>
    %150 = arith.addf %148, %149 : vector<2x256xf32>
    %cst_89 = arith.constant 5.000000e-01 : f32
    %151 = vector.broadcast %cst_89 : f32 to vector<1x2xf32>
    %cst_90 = arith.constant dense<0.000000e+00> : vector<1x256xf32>
    %152 = tpu.matmul %151, %150, %cst_90 {dimension_numbers = #tpu.dot_dimension_numbers<[1], [0], [0], [1], [0, 0, 1, 1], [], []>} : vector<1x2xf32>, vector<2x256xf32>, vector<1x256xf32> -> vector<1x256xf32>
    %153 = arith.mulf %150, %150 : vector<2x256xf32>
    %cst_91 = arith.constant 5.000000e-01 : f32
    %154 = vector.broadcast %cst_91 : f32 to vector<1x2xf32>
    %cst_92 = arith.constant dense<0.000000e+00> : vector<1x256xf32>
    %155 = tpu.matmul %154, %153, %cst_92 {dimension_numbers = #tpu.dot_dimension_numbers<[1], [0], [0], [1], [0, 0, 1, 1], [], []>} : vector<1x2xf32>, vector<2x256xf32>, vector<1x256xf32> -> vector<1x256xf32>
    %156 = arith.mulf %152, %152 : vector<1x256xf32>
    %157 = arith.subf %155, %156 : vector<1x256xf32>
    %cst_93 = arith.constant 0.000000e+00 : f32
    %158 = vector.broadcast %cst_93 : f32 to vector<1x256xf32>
    %159 = arith.maximumf %157, %158 : vector<1x256xf32>
    %c192_94 = arith.constant 192 : index
    %c0_95 = arith.constant 0 : index
    %160 = vector.load %arg2[%c192_94, %c0_95] : memref<424x256xf32, #tpu.memory_space<vmem>>, vector<1x256xf32>
    %cst_96 = arith.constant 9.99999974E-6 : f32
    %161 = vector.broadcast %cst_96 : f32 to vector<1x256xf32>
    %162 = arith.addf %159, %161 : vector<1x256xf32>
    %163 = math.rsqrt %162 : vector<1x256xf32>
    %164 = arith.mulf %160, %163 : vector<1x256xf32>
    %165 = vector.broadcast %164 : vector<1x256xf32> to vector<2x256xf32>
    %166 = arith.mulf %150, %165 : vector<2x256xf32>
    %c200 = arith.constant 200 : index
    %c0_97 = arith.constant 0 : index
    %167 = vector.load %arg2[%c200, %c0_97] : memref<424x256xf32, #tpu.memory_space<vmem>>, vector<1x256xf32>
    %168 = arith.mulf %152, %164 : vector<1x256xf32>
    %169 = arith.subf %167, %168 : vector<1x256xf32>
    %170 = vector.broadcast %169 : vector<1x256xf32> to vector<2x256xf32>
    %171 = arith.addf %166, %170 : vector<2x256xf32>
    %cst_98 = arith.constant 0.000000e+00 : f32
    %172 = vector.broadcast %cst_98 : f32 to vector<2x256xf32>
    %173 = arith.cmpf oge, %171, %172 : vector<2x256xf32>
    %cst_99 = arith.constant 0.00999999977 : f32
    %174 = vector.broadcast %cst_99 : f32 to vector<2x256xf32>
    %175 = arith.mulf %174, %171 : vector<2x256xf32>
    %176 = arith.select %173, %171, %175 : vector<2x256xi1>, vector<2x256xf32>
    %177 = arith.truncf %176 : vector<2x256xf32> to vector<2x256xbf16>
    %c1664 = arith.constant 1664 : index
    %c0_100 = arith.constant 0 : index
    %178 = vector.load %arg1[%c1664, %c0_100] : memref<3072x256xbf16, #tpu.memory_space<vmem>>, vector<256x128xbf16>
    %cst_101 = arith.constant dense<0.000000e+00> : vector<2x128xf32>
    %179 = tpu.matmul %177, %178, %cst_101 {dimension_numbers = #tpu.dot_dimension_numbers<[1], [0], [0], [1], [0, 0, 1, 1], [], []>} : vector<2x256xbf16>, vector<256x128xbf16>, vector<2x128xf32> -> vector<2x128xf32>
    %c208_102 = arith.constant 208 : index
    %c0_103 = arith.constant 0 : index
    %180 = vector.load %arg2[%c208_102, %c0_103] : memref<424x256xf32, #tpu.memory_space<vmem>>, vector<1x128xf32>
    %181 = vector.broadcast %180 : vector<1x128xf32> to vector<2x128xf32>
    %182 = arith.addf %179, %181 : vector<2x128xf32>
    %183 = arith.truncf %182 : vector<2x128xf32> to vector<2x128xbf16>
    %c1920 = arith.constant 1920 : index
    %c0_104 = arith.constant 0 : index
    %184 = vector.load %arg1[%c1920, %c0_104] : memref<3072x256xbf16, #tpu.memory_space<vmem>>, vector<128x256xbf16>
    %cst_105 = arith.constant dense<0.000000e+00> : vector<2x256xf32>
    %185 = tpu.matmul %183, %184, %cst_105 {dimension_numbers = #tpu.dot_dimension_numbers<[1], [0], [0], [1], [0, 0, 1, 1], [], []>} : vector<2x128xbf16>, vector<128x256xbf16>, vector<2x256xf32> -> vector<2x256xf32>
    %cst_106 = arith.constant 5.000000e-01 : f32
    %186 = vector.broadcast %cst_106 : f32 to vector<1x2xf32>
    %cst_107 = arith.constant dense<0.000000e+00> : vector<1x256xf32>
    %187 = tpu.matmul %186, %185, %cst_107 {dimension_numbers = #tpu.dot_dimension_numbers<[1], [0], [0], [1], [0, 0, 1, 1], [], []>} : vector<1x2xf32>, vector<2x256xf32>, vector<1x256xf32> -> vector<1x256xf32>
    %188 = arith.mulf %185, %185 : vector<2x256xf32>
    %cst_108 = arith.constant 5.000000e-01 : f32
    %189 = vector.broadcast %cst_108 : f32 to vector<1x2xf32>
    %cst_109 = arith.constant dense<0.000000e+00> : vector<1x256xf32>
    %190 = tpu.matmul %189, %188, %cst_109 {dimension_numbers = #tpu.dot_dimension_numbers<[1], [0], [0], [1], [0, 0, 1, 1], [], []>} : vector<1x2xf32>, vector<2x256xf32>, vector<1x256xf32> -> vector<1x256xf32>
    %191 = arith.mulf %187, %187 : vector<1x256xf32>
    %192 = arith.subf %190, %191 : vector<1x256xf32>
    %cst_110 = arith.constant 0.000000e+00 : f32
    %193 = vector.broadcast %cst_110 : f32 to vector<1x256xf32>
    %194 = arith.maximumf %192, %193 : vector<1x256xf32>
    %c216 = arith.constant 216 : index
    %c0_111 = arith.constant 0 : index
    %195 = vector.load %arg2[%c216, %c0_111] : memref<424x256xf32, #tpu.memory_space<vmem>>, vector<1x256xf32>
    %cst_112 = arith.constant 9.99999974E-6 : f32
    %196 = vector.broadcast %cst_112 : f32 to vector<1x256xf32>
    %197 = arith.addf %194, %196 : vector<1x256xf32>
    %198 = math.rsqrt %197 : vector<1x256xf32>
    %199 = arith.mulf %195, %198 : vector<1x256xf32>
    %200 = vector.broadcast %199 : vector<1x256xf32> to vector<2x256xf32>
    %201 = arith.mulf %185, %200 : vector<2x256xf32>
    %c224 = arith.constant 224 : index
    %c0_113 = arith.constant 0 : index
    %202 = vector.load %arg2[%c224, %c0_113] : memref<424x256xf32, #tpu.memory_space<vmem>>, vector<1x256xf32>
    %203 = arith.mulf %187, %199 : vector<1x256xf32>
    %204 = arith.subf %202, %203 : vector<1x256xf32>
    %205 = vector.broadcast %204 : vector<1x256xf32> to vector<2x256xf32>
    %206 = arith.addf %201, %205 : vector<2x256xf32>
    %cst_114 = arith.constant 0.000000e+00 : f32
    %207 = vector.broadcast %cst_114 : f32 to vector<2x256xf32>
    %208 = arith.cmpf oge, %206, %207 : vector<2x256xf32>
    %cst_115 = arith.constant 0.00999999977 : f32
    %209 = vector.broadcast %cst_115 : f32 to vector<2x256xf32>
    %210 = arith.mulf %209, %206 : vector<2x256xf32>
    %211 = arith.select %208, %206, %210 : vector<2x256xi1>, vector<2x256xf32>
    %212 = arith.truncf %211 : vector<2x256xf32> to vector<2x256xbf16>
    %c2048 = arith.constant 2048 : index
    %c0_116 = arith.constant 0 : index
    %213 = vector.load %arg1[%c2048, %c0_116] : memref<3072x256xbf16, #tpu.memory_space<vmem>>, vector<256x192xbf16>
    %cst_117 = arith.constant dense<0.000000e+00> : vector<2x192xf32>
    %214 = tpu.matmul %212, %213, %cst_117 {dimension_numbers = #tpu.dot_dimension_numbers<[1], [0], [0], [1], [0, 0, 1, 1], [], []>} : vector<2x256xbf16>, vector<256x192xbf16>, vector<2x192xf32> -> vector<2x192xf32>
    %cst_118 = arith.constant 5.000000e-01 : f32
    %215 = vector.broadcast %cst_118 : f32 to vector<1x2xf32>
    %cst_119 = arith.constant dense<0.000000e+00> : vector<1x192xf32>
    %216 = tpu.matmul %215, %214, %cst_119 {dimension_numbers = #tpu.dot_dimension_numbers<[1], [0], [0], [1], [0, 0, 1, 1], [], []>} : vector<1x2xf32>, vector<2x192xf32>, vector<1x192xf32> -> vector<1x192xf32>
    %217 = arith.mulf %214, %214 : vector<2x192xf32>
    %cst_120 = arith.constant 5.000000e-01 : f32
    %218 = vector.broadcast %cst_120 : f32 to vector<1x2xf32>
    %cst_121 = arith.constant dense<0.000000e+00> : vector<1x192xf32>
    %219 = tpu.matmul %218, %217, %cst_121 {dimension_numbers = #tpu.dot_dimension_numbers<[1], [0], [0], [1], [0, 0, 1, 1], [], []>} : vector<1x2xf32>, vector<2x192xf32>, vector<1x192xf32> -> vector<1x192xf32>
    %220 = arith.mulf %216, %216 : vector<1x192xf32>
    %221 = arith.subf %219, %220 : vector<1x192xf32>
    %cst_122 = arith.constant 0.000000e+00 : f32
    %222 = vector.broadcast %cst_122 : f32 to vector<1x192xf32>
    %223 = arith.maximumf %221, %222 : vector<1x192xf32>
    %c232 = arith.constant 232 : index
    %c0_123 = arith.constant 0 : index
    %224 = vector.load %arg2[%c232, %c0_123] : memref<424x256xf32, #tpu.memory_space<vmem>>, vector<1x192xf32>
    %cst_124 = arith.constant 9.99999974E-6 : f32
    %225 = vector.broadcast %cst_124 : f32 to vector<1x192xf32>
    %226 = arith.addf %223, %225 : vector<1x192xf32>
    %227 = math.rsqrt %226 : vector<1x192xf32>
    %228 = arith.mulf %224, %227 : vector<1x192xf32>
    %229 = vector.broadcast %228 : vector<1x192xf32> to vector<2x192xf32>
    %230 = arith.mulf %214, %229 : vector<2x192xf32>
    %c240 = arith.constant 240 : index
    %c0_125 = arith.constant 0 : index
    %231 = vector.load %arg2[%c240, %c0_125] : memref<424x256xf32, #tpu.memory_space<vmem>>, vector<1x192xf32>
    %232 = arith.mulf %216, %228 : vector<1x192xf32>
    %233 = arith.subf %231, %232 : vector<1x192xf32>
    %234 = vector.broadcast %233 : vector<1x192xf32> to vector<2x192xf32>
    %235 = arith.addf %230, %234 : vector<2x192xf32>
    %236 = arith.truncf %235 : vector<2x192xf32> to vector<2x192xbf16>
    %c256 = arith.constant 256 : index
    %c0_126 = arith.constant 0 : index
    %237 = vector.load %arg1[%c256, %c0_126] : memref<3072x256xbf16, #tpu.memory_space<vmem>>, vector<8x2xbf16>
    %c272 = arith.constant 272 : index
    %c0_127 = arith.constant 0 : index
    %238 = vector.load %arg1[%c272, %c0_127] : memref<3072x256xbf16, #tpu.memory_space<vmem>>, vector<192x48xbf16>
    %cst_128 = arith.constant dense<0.000000e+00> : vector<2x48xf32>
    %239 = tpu.matmul %236, %238, %cst_128 {dimension_numbers = #tpu.dot_dimension_numbers<[1], [0], [0], [1], [0, 0, 1, 1], [], []>} : vector<2x192xbf16>, vector<192x48xbf16>, vector<2x48xf32> -> vector<2x48xf32>
    %240 = arith.truncf %239 : vector<2x48xf32> to vector<2x48xbf16>
    %cst_129 = arith.constant dense<0.000000e+00> : vector<8x48xf32>
    %241 = tpu.matmul %237, %240, %cst_129 {dimension_numbers = #tpu.dot_dimension_numbers<[1], [0], [0], [1], [0, 0, 1, 1], [], []>} : vector<8x2xbf16>, vector<2x48xbf16>, vector<8x48xf32> -> vector<8x48xf32>
    %c464 = arith.constant 464 : index
    %c0_130 = arith.constant 0 : index
    %242 = vector.load %arg1[%c464, %c0_130] : memref<3072x256xbf16, #tpu.memory_space<vmem>>, vector<8x2xbf16>
    %c480 = arith.constant 480 : index
    %c0_131 = arith.constant 0 : index
    %243 = vector.load %arg1[%c480, %c0_131] : memref<3072x256xbf16, #tpu.memory_space<vmem>>, vector<192x48xbf16>
    %cst_132 = arith.constant dense<0.000000e+00> : vector<2x48xf32>
    %244 = tpu.matmul %236, %243, %cst_132 {dimension_numbers = #tpu.dot_dimension_numbers<[1], [0], [0], [1], [0, 0, 1, 1], [], []>} : vector<2x192xbf16>, vector<192x48xbf16>, vector<2x48xf32> -> vector<2x48xf32>
    %245 = arith.truncf %244 : vector<2x48xf32> to vector<2x48xbf16>
    %cst_133 = arith.constant dense<0.000000e+00> : vector<8x48xf32>
    %246 = tpu.matmul %242, %245, %cst_133 {dimension_numbers = #tpu.dot_dimension_numbers<[1], [0], [0], [1], [0, 0, 1, 1], [], []>} : vector<8x2xbf16>, vector<2x48xbf16>, vector<8x48xf32> -> vector<8x48xf32>
    %c672 = arith.constant 672 : index
    %c0_134 = arith.constant 0 : index
    %247 = vector.load %arg1[%c672, %c0_134] : memref<3072x256xbf16, #tpu.memory_space<vmem>>, vector<8x2xbf16>
    %c688 = arith.constant 688 : index
    %c0_135 = arith.constant 0 : index
    %248 = vector.load %arg1[%c688, %c0_135] : memref<3072x256xbf16, #tpu.memory_space<vmem>>, vector<192x48xbf16>
    %cst_136 = arith.constant dense<0.000000e+00> : vector<2x48xf32>
    %249 = tpu.matmul %236, %248, %cst_136 {dimension_numbers = #tpu.dot_dimension_numbers<[1], [0], [0], [1], [0, 0, 1, 1], [], []>} : vector<2x192xbf16>, vector<192x48xbf16>, vector<2x48xf32> -> vector<2x48xf32>
    %250 = arith.truncf %249 : vector<2x48xf32> to vector<2x48xbf16>
    %cst_137 = arith.constant dense<0.000000e+00> : vector<8x48xf32>
    %251 = tpu.matmul %247, %250, %cst_137 {dimension_numbers = #tpu.dot_dimension_numbers<[1], [0], [0], [1], [0, 0, 1, 1], [], []>} : vector<8x2xbf16>, vector<2x48xbf16>, vector<8x48xf32> -> vector<8x48xf32>
    %c880 = arith.constant 880 : index
    %c0_138 = arith.constant 0 : index
    %252 = vector.load %arg1[%c880, %c0_138] : memref<3072x256xbf16, #tpu.memory_space<vmem>>, vector<8x2xbf16>
    %c896 = arith.constant 896 : index
    %c0_139 = arith.constant 0 : index
    %253 = vector.load %arg1[%c896, %c0_139] : memref<3072x256xbf16, #tpu.memory_space<vmem>>, vector<192x48xbf16>
    %cst_140 = arith.constant dense<0.000000e+00> : vector<2x48xf32>
    %254 = tpu.matmul %236, %253, %cst_140 {dimension_numbers = #tpu.dot_dimension_numbers<[1], [0], [0], [1], [0, 0, 1, 1], [], []>} : vector<2x192xbf16>, vector<192x48xbf16>, vector<2x48xf32> -> vector<2x48xf32>
    %255 = arith.truncf %254 : vector<2x48xf32> to vector<2x48xbf16>
    %cst_141 = arith.constant dense<0.000000e+00> : vector<8x48xf32>
    %256 = tpu.matmul %252, %255, %cst_141 {dimension_numbers = #tpu.dot_dimension_numbers<[1], [0], [0], [1], [0, 0, 1, 1], [], []>} : vector<8x2xbf16>, vector<2x48xbf16>, vector<8x48xf32> -> vector<8x48xf32>
    %257 = arith.addf %241, %246 : vector<8x48xf32>
    %258 = arith.addf %251, %256 : vector<8x48xf32>
    %259 = arith.addf %257, %258 : vector<8x48xf32>
    %260 = arith.truncf %259 : vector<8x48xf32> to vector<8x48xbf16>
    %c2304 = arith.constant 2304 : index
    %c0_142 = arith.constant 0 : index
    %261 = vector.load %arg1[%c2304, %c0_142] : memref<3072x256xbf16, #tpu.memory_space<vmem>>, vector<14x8xbf16>
    %c2352 = arith.constant 2352 : index
    %c0_143 = arith.constant 0 : index
    %262 = vector.load %arg1[%c2352, %c0_143] : memref<3072x256xbf16, #tpu.memory_space<vmem>>, vector<48x42xbf16>
    %cst_144 = arith.constant dense<0.000000e+00> : vector<8x42xf32>
    %263 = tpu.matmul %260, %262, %cst_144 {dimension_numbers = #tpu.dot_dimension_numbers<[1], [0], [0], [1], [0, 0, 1, 1], [], []>} : vector<8x48xbf16>, vector<48x42xbf16>, vector<8x42xf32> -> vector<8x42xf32>
    %264 = arith.truncf %263 : vector<8x42xf32> to vector<8x42xbf16>
    %cst_145 = arith.constant dense<0.000000e+00> : vector<14x42xf32>
    %265 = tpu.matmul %261, %264, %cst_145 {dimension_numbers = #tpu.dot_dimension_numbers<[1], [0], [0], [1], [0, 0, 1, 1], [], []>} : vector<14x8xbf16>, vector<8x42xbf16>, vector<14x42xf32> -> vector<14x42xf32>
    %c2320 = arith.constant 2320 : index
    %c0_146 = arith.constant 0 : index
    %266 = vector.load %arg1[%c2320, %c0_146] : memref<3072x256xbf16, #tpu.memory_space<vmem>>, vector<14x8xbf16>
    %c2400 = arith.constant 2400 : index
    %c0_147 = arith.constant 0 : index
    %267 = vector.load %arg1[%c2400, %c0_147] : memref<3072x256xbf16, #tpu.memory_space<vmem>>, vector<48x42xbf16>
    %cst_148 = arith.constant dense<0.000000e+00> : vector<8x42xf32>
    %268 = tpu.matmul %260, %267, %cst_148 {dimension_numbers = #tpu.dot_dimension_numbers<[1], [0], [0], [1], [0, 0, 1, 1], [], []>} : vector<8x48xbf16>, vector<48x42xbf16>, vector<8x42xf32> -> vector<8x42xf32>
    %269 = arith.truncf %268 : vector<8x42xf32> to vector<8x42xbf16>
    %cst_149 = arith.constant dense<0.000000e+00> : vector<14x42xf32>
    %270 = tpu.matmul %266, %269, %cst_149 {dimension_numbers = #tpu.dot_dimension_numbers<[1], [0], [0], [1], [0, 0, 1, 1], [], []>} : vector<14x8xbf16>, vector<8x42xbf16>, vector<14x42xf32> -> vector<14x42xf32>
    %c2336 = arith.constant 2336 : index
    %c0_150 = arith.constant 0 : index
    %271 = vector.load %arg1[%c2336, %c0_150] : memref<3072x256xbf16, #tpu.memory_space<vmem>>, vector<14x8xbf16>
    %c2448 = arith.constant 2448 : index
    %c0_151 = arith.constant 0 : index
    %272 = vector.load %arg1[%c2448, %c0_151] : memref<3072x256xbf16, #tpu.memory_space<vmem>>, vector<48x42xbf16>
    %cst_152 = arith.constant dense<0.000000e+00> : vector<8x42xf32>
    %273 = tpu.matmul %260, %272, %cst_152 {dimension_numbers = #tpu.dot_dimension_numbers<[1], [0], [0], [1], [0, 0, 1, 1], [], []>} : vector<8x48xbf16>, vector<48x42xbf16>, vector<8x42xf32> -> vector<8x42xf32>
    %274 = arith.truncf %273 : vector<8x42xf32> to vector<8x42xbf16>
    %cst_153 = arith.constant dense<0.000000e+00> : vector<14x42xf32>
    %275 = tpu.matmul %271, %274, %cst_153 {dimension_numbers = #tpu.dot_dimension_numbers<[1], [0], [0], [1], [0, 0, 1, 1], [], []>} : vector<14x8xbf16>, vector<8x42xbf16>, vector<14x42xf32> -> vector<14x42xf32>
    %276 = arith.addf %265, %270 : vector<14x42xf32>
    %277 = arith.addf %276, %275 : vector<14x42xf32>
    %c248 = arith.constant 248 : index
    %c0_154 = arith.constant 0 : index
    %278 = vector.load %arg2[%c248, %c0_154] : memref<424x256xf32, #tpu.memory_space<vmem>>, vector<42x42xf32>
    %cst_155 = arith.constant 0.0714285746 : f32
    %279 = vector.broadcast %cst_155 : f32 to vector<1x14xf32>
    %cst_156 = arith.constant dense<0.000000e+00> : vector<1x42xf32>
    %280 = tpu.matmul %279, %277, %cst_156 {dimension_numbers = #tpu.dot_dimension_numbers<[1], [0], [0], [1], [0, 0, 1, 1], [], []>} : vector<1x14xf32>, vector<14x42xf32>, vector<1x42xf32> -> vector<1x42xf32>
    %cst_157 = arith.constant dense<0.000000e+00> : vector<1x42xf32>
    %281 = tpu.matmul %280, %278, %cst_157 {dimension_numbers = #tpu.dot_dimension_numbers<[1], [0], [0], [1], [0, 0, 1, 1], [], []>} : vector<1x42xf32>, vector<42x42xf32>, vector<1x42xf32> -> vector<1x42xf32>
    %282 = arith.mulf %277, %277 : vector<14x42xf32>
    %cst_158 = arith.constant 0.0714285746 : f32
    %283 = vector.broadcast %cst_158 : f32 to vector<1x14xf32>
    %cst_159 = arith.constant dense<0.000000e+00> : vector<1x42xf32>
    %284 = tpu.matmul %283, %282, %cst_159 {dimension_numbers = #tpu.dot_dimension_numbers<[1], [0], [0], [1], [0, 0, 1, 1], [], []>} : vector<1x14xf32>, vector<14x42xf32>, vector<1x42xf32> -> vector<1x42xf32>
    %cst_160 = arith.constant dense<0.000000e+00> : vector<1x42xf32>
    %285 = tpu.matmul %284, %278, %cst_160 {dimension_numbers = #tpu.dot_dimension_numbers<[1], [0], [0], [1], [0, 0, 1, 1], [], []>} : vector<1x42xf32>, vector<42x42xf32>, vector<1x42xf32> -> vector<1x42xf32>
    %286 = arith.mulf %281, %281 : vector<1x42xf32>
    %287 = arith.subf %285, %286 : vector<1x42xf32>
    %cst_161 = arith.constant 0.000000e+00 : f32
    %288 = vector.broadcast %cst_161 : f32 to vector<1x42xf32>
    %289 = arith.maximumf %287, %288 : vector<1x42xf32>
    %c296 = arith.constant 296 : index
    %c0_162 = arith.constant 0 : index
    %290 = vector.load %arg2[%c296, %c0_162] : memref<424x256xf32, #tpu.memory_space<vmem>>, vector<1x42xf32>
    %cst_163 = arith.constant 9.99999974E-6 : f32
    %291 = vector.broadcast %cst_163 : f32 to vector<1x42xf32>
    %292 = arith.addf %289, %291 : vector<1x42xf32>
    %293 = math.rsqrt %292 : vector<1x42xf32>
    %294 = arith.mulf %290, %293 : vector<1x42xf32>
    %295 = vector.broadcast %294 : vector<1x42xf32> to vector<14x42xf32>
    %296 = arith.mulf %277, %295 : vector<14x42xf32>
    %c304 = arith.constant 304 : index
    %c0_164 = arith.constant 0 : index
    %297 = vector.load %arg2[%c304, %c0_164] : memref<424x256xf32, #tpu.memory_space<vmem>>, vector<1x42xf32>
    %298 = arith.mulf %281, %294 : vector<1x42xf32>
    %299 = arith.subf %297, %298 : vector<1x42xf32>
    %300 = vector.broadcast %299 : vector<1x42xf32> to vector<14x42xf32>
    %301 = arith.addf %296, %300 : vector<14x42xf32>
    %cst_165 = arith.constant 0.000000e+00 : f32
    %302 = vector.broadcast %cst_165 : f32 to vector<14x42xf32>
    %303 = arith.cmpf oge, %301, %302 : vector<14x42xf32>
    %cst_166 = arith.constant 0.00999999977 : f32
    %304 = vector.broadcast %cst_166 : f32 to vector<14x42xf32>
    %305 = arith.mulf %304, %301 : vector<14x42xf32>
    %306 = arith.select %303, %301, %305 : vector<14x42xi1>, vector<14x42xf32>
    %307 = arith.truncf %306 : vector<14x42xf32> to vector<14x42xbf16>
    %c2496 = arith.constant 2496 : index
    %c0_167 = arith.constant 0 : index
    %308 = vector.load %arg1[%c2496, %c0_167] : memref<3072x256xbf16, #tpu.memory_space<vmem>>, vector<28x14xbf16>
    %c2592 = arith.constant 2592 : index
    %c0_168 = arith.constant 0 : index
    %309 = vector.load %arg1[%c2592, %c0_168] : memref<3072x256xbf16, #tpu.memory_space<vmem>>, vector<42x42xbf16>
    %cst_169 = arith.constant dense<0.000000e+00> : vector<14x42xf32>
    %310 = tpu.matmul %307, %309, %cst_169 {dimension_numbers = #tpu.dot_dimension_numbers<[1], [0], [0], [1], [0, 0, 1, 1], [], []>} : vector<14x42xbf16>, vector<42x42xbf16>, vector<14x42xf32> -> vector<14x42xf32>
    %311 = arith.truncf %310 : vector<14x42xf32> to vector<14x42xbf16>
    %cst_170 = arith.constant dense<0.000000e+00> : vector<28x42xf32>
    %312 = tpu.matmul %308, %311, %cst_170 {dimension_numbers = #tpu.dot_dimension_numbers<[1], [0], [0], [1], [0, 0, 1, 1], [], []>} : vector<28x14xbf16>, vector<14x42xbf16>, vector<28x42xf32> -> vector<28x42xf32>
    %c2528 = arith.constant 2528 : index
    %c0_171 = arith.constant 0 : index
    %313 = vector.load %arg1[%c2528, %c0_171] : memref<3072x256xbf16, #tpu.memory_space<vmem>>, vector<28x14xbf16>
    %c2640 = arith.constant 2640 : index
    %c0_172 = arith.constant 0 : index
    %314 = vector.load %arg1[%c2640, %c0_172] : memref<3072x256xbf16, #tpu.memory_space<vmem>>, vector<42x42xbf16>
    %cst_173 = arith.constant dense<0.000000e+00> : vector<14x42xf32>
    %315 = tpu.matmul %307, %314, %cst_173 {dimension_numbers = #tpu.dot_dimension_numbers<[1], [0], [0], [1], [0, 0, 1, 1], [], []>} : vector<14x42xbf16>, vector<42x42xbf16>, vector<14x42xf32> -> vector<14x42xf32>
    %316 = arith.truncf %315 : vector<14x42xf32> to vector<14x42xbf16>
    %cst_174 = arith.constant dense<0.000000e+00> : vector<28x42xf32>
    %317 = tpu.matmul %313, %316, %cst_174 {dimension_numbers = #tpu.dot_dimension_numbers<[1], [0], [0], [1], [0, 0, 1, 1], [], []>} : vector<28x14xbf16>, vector<14x42xbf16>, vector<28x42xf32> -> vector<28x42xf32>
    %c2560 = arith.constant 2560 : index
    %c0_175 = arith.constant 0 : index
    %318 = vector.load %arg1[%c2560, %c0_175] : memref<3072x256xbf16, #tpu.memory_space<vmem>>, vector<28x14xbf16>
    %c2688 = arith.constant 2688 : index
    %c0_176 = arith.constant 0 : index
    %319 = vector.load %arg1[%c2688, %c0_176] : memref<3072x256xbf16, #tpu.memory_space<vmem>>, vector<42x42xbf16>
    %cst_177 = arith.constant dense<0.000000e+00> : vector<14x42xf32>
    %320 = tpu.matmul %307, %319, %cst_177 {dimension_numbers = #tpu.dot_dimension_numbers<[1], [0], [0], [1], [0, 0, 1, 1], [], []>} : vector<14x42xbf16>, vector<42x42xbf16>, vector<14x42xf32> -> vector<14x42xf32>
    %321 = arith.truncf %320 : vector<14x42xf32> to vector<14x42xbf16>
    %cst_178 = arith.constant dense<0.000000e+00> : vector<28x42xf32>
    %322 = tpu.matmul %318, %321, %cst_178 {dimension_numbers = #tpu.dot_dimension_numbers<[1], [0], [0], [1], [0, 0, 1, 1], [], []>} : vector<28x14xbf16>, vector<14x42xbf16>, vector<28x42xf32> -> vector<28x42xf32>
    %323 = arith.addf %312, %317 : vector<28x42xf32>
    %324 = arith.addf %323, %322 : vector<28x42xf32>
    %c312 = arith.constant 312 : index
    %c0_179 = arith.constant 0 : index
    %325 = vector.load %arg2[%c312, %c0_179] : memref<424x256xf32, #tpu.memory_space<vmem>>, vector<42x42xf32>
    %cst_180 = arith.constant 0.0357142873 : f32
    %326 = vector.broadcast %cst_180 : f32 to vector<1x28xf32>
    %cst_181 = arith.constant dense<0.000000e+00> : vector<1x42xf32>
    %327 = tpu.matmul %326, %324, %cst_181 {dimension_numbers = #tpu.dot_dimension_numbers<[1], [0], [0], [1], [0, 0, 1, 1], [], []>} : vector<1x28xf32>, vector<28x42xf32>, vector<1x42xf32> -> vector<1x42xf32>
    %cst_182 = arith.constant dense<0.000000e+00> : vector<1x42xf32>
    %328 = tpu.matmul %327, %325, %cst_182 {dimension_numbers = #tpu.dot_dimension_numbers<[1], [0], [0], [1], [0, 0, 1, 1], [], []>} : vector<1x42xf32>, vector<42x42xf32>, vector<1x42xf32> -> vector<1x42xf32>
    %329 = arith.mulf %324, %324 : vector<28x42xf32>
    %cst_183 = arith.constant 0.0357142873 : f32
    %330 = vector.broadcast %cst_183 : f32 to vector<1x28xf32>
    %cst_184 = arith.constant dense<0.000000e+00> : vector<1x42xf32>
    %331 = tpu.matmul %330, %329, %cst_184 {dimension_numbers = #tpu.dot_dimension_numbers<[1], [0], [0], [1], [0, 0, 1, 1], [], []>} : vector<1x28xf32>, vector<28x42xf32>, vector<1x42xf32> -> vector<1x42xf32>
    %cst_185 = arith.constant dense<0.000000e+00> : vector<1x42xf32>
    %332 = tpu.matmul %331, %325, %cst_185 {dimension_numbers = #tpu.dot_dimension_numbers<[1], [0], [0], [1], [0, 0, 1, 1], [], []>} : vector<1x42xf32>, vector<42x42xf32>, vector<1x42xf32> -> vector<1x42xf32>
    %333 = arith.mulf %328, %328 : vector<1x42xf32>
    %334 = arith.subf %332, %333 : vector<1x42xf32>
    %cst_186 = arith.constant 0.000000e+00 : f32
    %335 = vector.broadcast %cst_186 : f32 to vector<1x42xf32>
    %336 = arith.maximumf %334, %335 : vector<1x42xf32>
    %c360 = arith.constant 360 : index
    %c0_187 = arith.constant 0 : index
    %337 = vector.load %arg2[%c360, %c0_187] : memref<424x256xf32, #tpu.memory_space<vmem>>, vector<1x42xf32>
    %cst_188 = arith.constant 9.99999974E-6 : f32
    %338 = vector.broadcast %cst_188 : f32 to vector<1x42xf32>
    %339 = arith.addf %336, %338 : vector<1x42xf32>
    %340 = math.rsqrt %339 : vector<1x42xf32>
    %341 = arith.mulf %337, %340 : vector<1x42xf32>
    %342 = vector.broadcast %341 : vector<1x42xf32> to vector<28x42xf32>
    %343 = arith.mulf %324, %342 : vector<28x42xf32>
    %c368 = arith.constant 368 : index
    %c0_189 = arith.constant 0 : index
    %344 = vector.load %arg2[%c368, %c0_189] : memref<424x256xf32, #tpu.memory_space<vmem>>, vector<1x42xf32>
    %345 = arith.mulf %328, %341 : vector<1x42xf32>
    %346 = arith.subf %344, %345 : vector<1x42xf32>
    %347 = vector.broadcast %346 : vector<1x42xf32> to vector<28x42xf32>
    %348 = arith.addf %343, %347 : vector<28x42xf32>
    %cst_190 = arith.constant 0.000000e+00 : f32
    %349 = vector.broadcast %cst_190 : f32 to vector<28x42xf32>
    %350 = arith.cmpf oge, %348, %349 : vector<28x42xf32>
    %cst_191 = arith.constant 0.00999999977 : f32
    %351 = vector.broadcast %cst_191 : f32 to vector<28x42xf32>
    %352 = arith.mulf %351, %348 : vector<28x42xf32>
    %353 = arith.select %350, %348, %352 : vector<28x42xi1>, vector<28x42xf32>
    %354 = arith.truncf %353 : vector<28x42xf32> to vector<28x42xbf16>
    %c2736 = arith.constant 2736 : index
    %c0_192 = arith.constant 0 : index
    %355 = vector.load %arg1[%c2736, %c0_192] : memref<3072x256xbf16, #tpu.memory_space<vmem>>, vector<56x28xbf16>
    %c2928 = arith.constant 2928 : index
    %c0_193 = arith.constant 0 : index
    %356 = vector.load %arg1[%c2928, %c0_193] : memref<3072x256xbf16, #tpu.memory_space<vmem>>, vector<42x28xbf16>
    %cst_194 = arith.constant dense<0.000000e+00> : vector<28x28xf32>
    %357 = tpu.matmul %354, %356, %cst_194 {dimension_numbers = #tpu.dot_dimension_numbers<[1], [0], [0], [1], [0, 0, 1, 1], [], []>} : vector<28x42xbf16>, vector<42x28xbf16>, vector<28x28xf32> -> vector<28x28xf32>
    %358 = arith.truncf %357 : vector<28x28xf32> to vector<28x28xbf16>
    %cst_195 = arith.constant dense<0.000000e+00> : vector<56x28xf32>
    %359 = tpu.matmul %355, %358, %cst_195 {dimension_numbers = #tpu.dot_dimension_numbers<[1], [0], [0], [1], [0, 0, 1, 1], [], []>} : vector<56x28xbf16>, vector<28x28xbf16>, vector<56x28xf32> -> vector<56x28xf32>
    %c2800 = arith.constant 2800 : index
    %c0_196 = arith.constant 0 : index
    %360 = vector.load %arg1[%c2800, %c0_196] : memref<3072x256xbf16, #tpu.memory_space<vmem>>, vector<56x28xbf16>
    %c2976 = arith.constant 2976 : index
    %c0_197 = arith.constant 0 : index
    %361 = vector.load %arg1[%c2976, %c0_197] : memref<3072x256xbf16, #tpu.memory_space<vmem>>, vector<42x28xbf16>
    %cst_198 = arith.constant dense<0.000000e+00> : vector<28x28xf32>
    %362 = tpu.matmul %354, %361, %cst_198 {dimension_numbers = #tpu.dot_dimension_numbers<[1], [0], [0], [1], [0, 0, 1, 1], [], []>} : vector<28x42xbf16>, vector<42x28xbf16>, vector<28x28xf32> -> vector<28x28xf32>
    %363 = arith.truncf %362 : vector<28x28xf32> to vector<28x28xbf16>
    %cst_199 = arith.constant dense<0.000000e+00> : vector<56x28xf32>
    %364 = tpu.matmul %360, %363, %cst_199 {dimension_numbers = #tpu.dot_dimension_numbers<[1], [0], [0], [1], [0, 0, 1, 1], [], []>} : vector<56x28xbf16>, vector<28x28xbf16>, vector<56x28xf32> -> vector<56x28xf32>
    %c2864 = arith.constant 2864 : index
    %c0_200 = arith.constant 0 : index
    %365 = vector.load %arg1[%c2864, %c0_200] : memref<3072x256xbf16, #tpu.memory_space<vmem>>, vector<56x28xbf16>
    %c3024 = arith.constant 3024 : index
    %c0_201 = arith.constant 0 : index
    %366 = vector.load %arg1[%c3024, %c0_201] : memref<3072x256xbf16, #tpu.memory_space<vmem>>, vector<42x28xbf16>
    %cst_202 = arith.constant dense<0.000000e+00> : vector<28x28xf32>
    %367 = tpu.matmul %354, %366, %cst_202 {dimension_numbers = #tpu.dot_dimension_numbers<[1], [0], [0], [1], [0, 0, 1, 1], [], []>} : vector<28x42xbf16>, vector<42x28xbf16>, vector<28x28xf32> -> vector<28x28xf32>
    %368 = arith.truncf %367 : vector<28x28xf32> to vector<28x28xbf16>
    %cst_203 = arith.constant dense<0.000000e+00> : vector<56x28xf32>
    %369 = tpu.matmul %365, %368, %cst_203 {dimension_numbers = #tpu.dot_dimension_numbers<[1], [0], [0], [1], [0, 0, 1, 1], [], []>} : vector<56x28xbf16>, vector<28x28xbf16>, vector<56x28xf32> -> vector<56x28xf32>
    %370 = arith.addf %359, %364 : vector<56x28xf32>
    %371 = arith.addf %370, %369 : vector<56x28xf32>
    %c376 = arith.constant 376 : index
    %c0_204 = arith.constant 0 : index
    %372 = vector.load %arg2[%c376, %c0_204] : memref<424x256xf32, #tpu.memory_space<vmem>>, vector<28x28xf32>
    %cst_205 = arith.constant 0.0178571437 : f32
    %373 = vector.broadcast %cst_205 : f32 to vector<1x56xf32>
    %cst_206 = arith.constant dense<0.000000e+00> : vector<1x28xf32>
    %374 = tpu.matmul %373, %371, %cst_206 {dimension_numbers = #tpu.dot_dimension_numbers<[1], [0], [0], [1], [0, 0, 1, 1], [], []>} : vector<1x56xf32>, vector<56x28xf32>, vector<1x28xf32> -> vector<1x28xf32>
    %cst_207 = arith.constant dense<0.000000e+00> : vector<1x28xf32>
    %375 = tpu.matmul %374, %372, %cst_207 {dimension_numbers = #tpu.dot_dimension_numbers<[1], [0], [0], [1], [0, 0, 1, 1], [], []>} : vector<1x28xf32>, vector<28x28xf32>, vector<1x28xf32> -> vector<1x28xf32>
    %376 = arith.mulf %371, %371 : vector<56x28xf32>
    %cst_208 = arith.constant 0.0178571437 : f32
    %377 = vector.broadcast %cst_208 : f32 to vector<1x56xf32>
    %cst_209 = arith.constant dense<0.000000e+00> : vector<1x28xf32>
    %378 = tpu.matmul %377, %376, %cst_209 {dimension_numbers = #tpu.dot_dimension_numbers<[1], [0], [0], [1], [0, 0, 1, 1], [], []>} : vector<1x56xf32>, vector<56x28xf32>, vector<1x28xf32> -> vector<1x28xf32>
    %cst_210 = arith.constant dense<0.000000e+00> : vector<1x28xf32>
    %379 = tpu.matmul %378, %372, %cst_210 {dimension_numbers = #tpu.dot_dimension_numbers<[1], [0], [0], [1], [0, 0, 1, 1], [], []>} : vector<1x28xf32>, vector<28x28xf32>, vector<1x28xf32> -> vector<1x28xf32>
    %380 = arith.mulf %375, %375 : vector<1x28xf32>
    %381 = arith.subf %379, %380 : vector<1x28xf32>
    %cst_211 = arith.constant 0.000000e+00 : f32
    %382 = vector.broadcast %cst_211 : f32 to vector<1x28xf32>
    %383 = arith.maximumf %381, %382 : vector<1x28xf32>
    %c408 = arith.constant 408 : index
    %c0_212 = arith.constant 0 : index
    %384 = vector.load %arg2[%c408, %c0_212] : memref<424x256xf32, #tpu.memory_space<vmem>>, vector<1x28xf32>
    %cst_213 = arith.constant 9.99999974E-6 : f32
    %385 = vector.broadcast %cst_213 : f32 to vector<1x28xf32>
    %386 = arith.addf %383, %385 : vector<1x28xf32>
    %387 = math.rsqrt %386 : vector<1x28xf32>
    %388 = arith.mulf %384, %387 : vector<1x28xf32>
    %389 = vector.broadcast %388 : vector<1x28xf32> to vector<56x28xf32>
    %390 = arith.mulf %371, %389 : vector<56x28xf32>
    %c416 = arith.constant 416 : index
    %c0_214 = arith.constant 0 : index
    %391 = vector.load %arg2[%c416, %c0_214] : memref<424x256xf32, #tpu.memory_space<vmem>>, vector<1x28xf32>
    %392 = arith.mulf %375, %388 : vector<1x28xf32>
    %393 = arith.subf %391, %392 : vector<1x28xf32>
    %394 = vector.broadcast %393 : vector<1x28xf32> to vector<56x28xf32>
    %395 = arith.addf %390, %394 : vector<56x28xf32>
    %396 = math.tanh %395 : vector<56x28xf32>
    %c0_215 = arith.constant 0 : index
    %c0_216 = arith.constant 0 : index
    %397 = vector.load %arg3[%c0_215, %c0_216] : memref<56x28xf32, #tpu.memory_space<vmem>>, vector<56x28xf32>
    tpu.vector_store %arg3[%c0_215, %c0_216], %396 {strides = array<i32>} : memref<56x28xf32, #tpu.memory_space<vmem>>, vector<56x28xf32>,
    return
  }
}

</mosaic_0001>

<bundles_post_ra>
// kernel: forward.1
= control target key start
LH: loop header
LB: loop body
LE: loop exit
PB: predicated region body
PF: predicated region fallthrough
CT: control target
= control target key end

     0   :  { %vm10605_vm0 = vcmask 457728   ;;  %vm48_vm1 = vcmask 1043456   ;;  %vm10606_vm2 = vcmask 1045504   ;;  %s10601_s0 = inlined_call_operand.vmem [shape: f32[56,28], index: 0, kind: input, shape index: {}]   ;;  %s10602_s1 = inlined_call_operand.vmem [shape: bf16[3072,256], index: 1, kind: input, shape index: {}]   ;;  %s10603_s2 = inlined_call_operand.vmem [shape: f32[424,256], index: 2, kind: input, shape index: {}]   ;;  %s10604_s3 = inlined_call_operand.hbm [shape: f32[56,28], index: 3, kind: output, shape index: {}]  }
   0x1   :  { %v16_v0 = vld [vmem:[%s10601_s0] sm:$0xff]  ;;  %v17_v1 = vld [vmem:[%s10601_s0 + $0x8] sm:$0xff]  ;;  %v18_v2 = vld [vmem:[%s10601_s0 + $0x10] sm:$0xff] }
   0x2   :  { %v23_v3 = vpack.c.bf16 %v17_v1, %v16_v0  ;;  %v19_v4 = vld [vmem:[%s10601_s0 + $0x18] sm:$0xff]  ;;  %v20_v5 = vld [vmem:[%s10601_s0 + $0x20] sm:$0xff]  ;;  %v21_v6 = vld [vmem:[%s10601_s0 + $0x28] sm:$0xff] }
   0x3   :  { %v24_v7 = vpack.c.bf16 %v19_v4, %v18_v2  ;;  %v22_v8 = vld [vmem:[%s10601_s0 + $0x30] sm:$0xff]  ;;  %v8691_v9 = vld [vmem:[%s10602_s1 + $0x460] ss:$8 sps:$4 sm:$0xff]   ;;  %v25_v10 = vpack.c.bf16 %v21_v6, %v20_v5 }
   0x4   :  { %7760 = vmatprep.subr.bf16.mxu1 %v23_v3  ;;  %7748 = vmatprep.subr.bf16.mxu0 %v23_v3  ;;  %v26_v11 = vpack.c.bf16 %v22_v8, %v22_v8  ;;  %v8695_v12 = vld [vmem:[%s10602_s1 + $0x440] ss:$8 sps:$4 sm:$0xff]   ;;  %v8692_v15 = vld [vmem:[%s10602_s1 + $0x470] ss:$8 sps:$4 sm:$0x3f]  }
   0x5   :  { %7761 = vmatpush3.bf16.msra.mxu1 %v23_v3  ;;  %7749 = vmatpush3.bf16.msra.mxu0 %v23_v3  ;;  %v8697_v14 = vld [vmem:[%s10602_s1 + $0x4c0] ss:$8 sps:$4 sm:$0xff]   ;;  %v8696_v16 = vld [vmem:[%s10602_s1 + $0x450] ss:$8 sps:$4 sm:$0x3f]  }
   0x6   :  { %7762 = vmatprep.subr.bf16.mxu1 %v24_v7  ;;  %7768 = vmatprep.mubr.msk.bf16.mxu1 %vm10605_vm0, %v8691_v9  ;;  %v50_v13 = vsel %vm48_vm1, %v26_v11, 0  ;;  %v8693_v17 = vld [vmem:[%s10602_s1 + $0x480] ss:$8 sps:$4 sm:$0xff]   ;;  %v8694_v18 = vld [vmem:[%s10602_s1 + $0x490] ss:$8 sps:$4 sm:$0x3f]  }
   0x7   :  { %7750 = vmatprep.subr.bf16.mxu0 %v24_v7  ;;  %7756 = vmatprep.mubr.msk.bf16.mxu0 %vm10605_vm0, %v8695_v12  ;;  %v8698_v19 = vld [vmem:[%s10602_s1 + $0x4d0] ss:$8 sps:$4 sm:$0x3f]   ;;  %v8699_v21 = vld [vmem:[%s10602_s1 + $0x4e0] ss:$8 sps:$4 sm:$0xff]  }
   0x8   :  { %v202_v20 = vsel %vm10606_vm2, %v8698_v19, 0 }
   0x9   :  { %7763 = vmatpush3.bf16.msra.mxu1 %v24_v7  ;;  %7751 = vmatpush3.bf16.msra.mxu0 %v24_v7 }
   0xa   :  { %7764 = vmatprep.subr.bf16.mxu1 %v25_v10  ;;  %7752 = vmatprep.subr.bf16.mxu0 %v25_v10 }
   0xd   :  { %7765 = vmatpush3.bf16.msra.mxu1 %v25_v10  ;;  %7753 = vmatpush3.bf16.msra.mxu0 %v25_v10 }
   0xe   :  { %8663 = vmatprep.subr.msk.bf16.mxu1 %vm48_vm1, %v26_v11  ;;  %8662 = vmatprep.subr.msk.bf16.mxu0 %vm48_vm1, %v26_v11 }
  0x11   :  { %7767 = vmatpush3.bf16.msra.mxu1 %v50_v13  ;;  %7755 = vmatpush3.bf16.msra.mxu0 %v50_v13 }
  0x12   :  { %7780 = vmatprep.subr.bf16.mxu1 %v23_v3  ;;  %7772 = vmatprep.subr.bf16.mxu0 %v8697_v14 }
  0x14   :  { %7769 = vmatmul.mubr.msk.bf16.vlgmr.msra.gmra.mrb[0].mxu1 %vm10605_vm0, %v8692_v15  ;;  %7757 = vmatmul.mubr.msk.bf16.vlgmr.msra.gmra.mrb[0].mxu0 %vm10605_vm0, %v8696_v16 }
  0x15   :  { %7781 = vmatpush3.bf16.msra.mxu1 %v23_v3  ;;  %7788 = vmatprep.mubr.msk.bf16.mxu1 %vm10605_vm0, %v8693_v17 }
  0x16   :  { %7782 = vmatprep.subr.bf16.mxu1 %v24_v7  ;;  %7773 = vmatpush3.bf16.msra.mxu0 %v8697_v14 }
  0x17   :  { %8664 = vmatprep.subr.msk.bf16.mxu0 %vm10606_vm2, %v8698_v19 }
  0x19   :  { %7783 = vmatpush3.bf16.msra.mxu1 %v24_v7 }
  0x1a   :  { %7784 = vmatprep.subr.bf16.mxu1 %v25_v10  ;;  %7775 = vmatpush3.bf16.msra.mxu0 %v202_v20 }
  0x1b   :  { %7792 = vmatprep.subr.bf16.mxu0 %v8699_v21 }
  0x1d   :  { %7785 = vmatpush3.bf16.msra.mxu1 %v25_v10 }
  0x1e   :  { %8665 = vmatprep.subr.msk.bf16.mxu1 %vm48_vm1, %v26_v11 }
  0x21   :  { %7787 = vmatpush3.bf16.msra.mxu1 %v50_v13 }
  0x24   :  { %7789 = vmatmul.mubr.msk.bf16.vlgmr.msra.gmra.mrb[4].mxu1 %vm10605_vm0, %v8694_v18 }
  0x25   :  { %8 = vsyncpa [#allocation3], 0  ;;  %vm193_vm3 = vcmask 228352   ;;  %v8700_v34 = vld [vmem:[%s10602_s1 + $0x4f0] ss:$8 sps:$4 sm:$0x3f]   ;;  %v787_v19 = vlaneseq }
  0x26   :  { %v346_v35 = vsel %vm10606_vm2, %v8700_v34, 0  ;;  %v8701_v36 = vld [vmem:[%s10602_s1 + $0x4a0] ss:$8 sps:$4 sm:$0xff]   ;;  %v8702_v43 = vld [vmem:[%s10602_s1 + $0x4b0] ss:$8 sps:$4 sm:$0x3f]  }
  0x27   :  { %v415_v44 = vsel %vm10606_vm2, %v8702_v43, 0  ;;  %v9006_v45 = vmov 0.0|0.0   ;;  %vm9007_vm4 = vmmov 0   ;;  %v9008_v46 = vmov 0.0   ;;  %v470_v47 = vld [vmem:[%s10603_s2] sm:$0xff]  ;;  %v471_v48 = vld [vmem:[%s10603_s2 + $0x10] sm:$0xff] }
  0x28   :  { %8408 = vmatprep.subr.bf16.mxu1 %v9006_v45  ;;  %7816 = vmatprep.mubr.msk.f32.mxu1 %vm9007_vm4, %v9008_v46  ;;  %v472_v49 = vld [vmem:[%s10603_s2 + $0x20] sm:$0xff]  ;;  %v8416_v50 = vpack.c.bf16 %v471_v48, %v470_v47  ;;  %v473_v51 = vld [vmem:[%s10603_s2 + $0x30] sm:$0xff]  ;;  %vm556_vm5 = vcmask 1041408   ;;  %vm9009_vm6 = vmmov 1   ;;  %v9010_v6 = vmov 0.035714287  }
  0x29   :  { %v8419_v52 = vpack.c.bf16 %v473_v51, %v472_v49  ;;  %v474_v53 = vld [vmem:[%s10603_s2 + $0x40] sm:$0xff]  ;;  %v475_v54 = vld [vmem:[%s10603_s2 + $0x50] sm:$0x3]  ;;  %vm9146_vm7 = vmpackc.low %vm556_vm5, %vm9009_vm6  ;;  %vm552_vm9 = vcmask 343040   ;;  %v9187_v20 = vshrl.u32 %v787_v19, 7  ;;  %vm947_vm10 = vcmask 1044480  }
  0x2a   :  { %v8422_v55 = vpack.c.bf16 %v475_v54, %v474_v53  ;;  %vm9157_vm8 = vmpackc.low %vm48_vm1, %vm9009_vm6  ;;  %v8707_v47 = vld [vmem:[%s10602_s1 + $0x570] ss:$8 sps:$4 sm:$0xff]   ;;  %v8708_v48 = vld [vmem:[%s10602_s1 + $0x580] ss:$8 sps:$4 sm:$0x1f]   ;;  %vm1186_vm12 = vcmask 113664  }
  0x2b   :  { %v949_v49 = vsel %vm947_vm10, %v8708_v48, 0  ;;  %v1185_v19 = vld [vmem:[%s10603_s2 + $0xd0] sm:$0x3]  ;;  %vm9298_vm11 = vmpackc.low %vm10606_vm2, %vm9009_vm6  ;;  %vm1514_vm13 = vcmask 1046528   ;;  %vm1863_vm14 = vcmask 64512   ;;  %vm1937_vm15 = vcmask 392192  }
  0x2c   :  { %vm2681_vm6 = vcmask 15360  }
  0xe7   :  { %v7770_v22 = vpop.f32.mrb[0].mxu1  ;;  %v7758_v23 = vpop.f32.mrb[0].mxu0 }
  0xe8   :  { %v161_v24 = vpop.f32.mrb[1].mxu1  ;;  %v86_v25 = vpop.f32.mrb[1].mxu0 }
  0xe9   :  { %v7771_v26 = vpop.f32.mrb[2].mxu1  ;;  %v7759_v27 = vpop.f32.mrb[2].mxu0 }
  0xea   :  { %v177_v28 = vpack.c.bf16 %v7771_v26, %v7770_v22  ;;  %v164_v29 = vpop.f32.mrb[3].mxu1  ;;  %v102_v30 = vpack.c.bf16 %v7759_v27, %v7758_v23  ;;  %v89_v31 = vpop.f32.mrb[3].mxu0  ;;  %v9193_v22 = vsub.s32 0, %v9187_v20 }
  0xeb   :  { %v176_v32 = vpack.c.bf16 %v164_v29, %v161_v24  ;;  %v101_v33 = vpack.c.bf16 %v89_v31, %v86_v25  ;;  %v795_v25 = vld [vmem:[%s10603_s2 + $0x70] ss:$0 sm:$0xff] }
  0xed   :  { %7776 = vmatprep.mubr.msk.bf16.mxu0 %vm193_vm3, %v176_v32 }
  0xee   :  { %7777 = vmatmul.mubr.msk.bf16.vlgmr.msra.gmra.mrb[4].mxu0 %vm193_vm3, %v177_v28 }
  0xef   :  { %7793 = vmatpush3.bf16.msra.mxu0 %v8699_v21  ;;  %v783_v21 = vld [vmem:[%s10603_s2 + $0x60] ss:$0 sm:$0xff] }
  0xf0   :  { %8666 = vmatprep.subr.msk.bf16.mxu0 %vm10606_vm2, %v8700_v34 }
  0xf3   :  { %7795 = vmatpush3.bf16.msra.mxu0 %v346_v35 }
  0xf4   :  { %7800 = vmatprep.subr.bf16.mxu0 %v8701_v36 }
  0xf7   :  { %v7790_v37 = vpop.f32.mrb[4].mxu1 }
  0xf8   :  { %v307_v38 = vpop.f32.mrb[5].mxu1 }
  0xf9   :  { %v7791_v39 = vpop.f32.mrb[6].mxu1 }
  0xfa   :  { %v323_v40 = vpack.c.bf16 %v7791_v39, %v7790_v37  ;;  %v310_v41 = vpop.f32.mrb[7].mxu1 }
  0xfb   :  { %v322_v42 = vpack.c.bf16 %v310_v41, %v307_v38  ;;  %v8703_v41 = vld [vmem:[%s10602_s1 + $0x500] ss:$8 sps:$4 sm:$0x7f]  }
  0xfd   :  { %7796 = vmatprep.mubr.msk.bf16.mxu0 %vm193_vm3, %v322_v42  ;;  %v8704_v42 = vld [vmem:[%s10602_s1 + $0x510] ss:$8 sps:$4 sm:$0x7f]  }
  0xfe   :  { %7797 = vmatmul.mubr.msk.bf16.vlgmr.msra.gmra.mrb[4].mxu0 %vm193_vm3, %v323_v40 }
  0xff   :  { %7801 = vmatpush3.bf16.msra.mxu0 %v8701_v36  ;;  %7804 = vmatprep.mubr.msk.bf16.mxu0 %vm193_vm3, %v101_v33 }
 0x100   :  { %8667 = vmatprep.subr.msk.bf16.mxu0 %vm10606_vm2, %v8702_v43  ;;  %v8705_v43 = vld [vmem:[%s10602_s1 + $0x520] ss:$8 sps:$4 sm:$0x7f]  }
 0x103   :  { %7803 = vmatpush3.bf16.msra.mxu0 %v415_v44  ;;  %v8706_v44 = vld [vmem:[%s10602_s1 + $0x560] ss:$8 sps:$4 sm:$0xff]  }
 0x104   :  { %8415 = vmatprep.subr.bf16.mxu0 %v9006_v45 }
 0x10a   :  { %7805 = vmatmul.mubr.msk.bf16.vlgmr.msra.gmra.mrb[4].mxu0 %vm193_vm3, %v102_v30 }
 0x10b   :  { %7831 = vmatprep.mubr.msk.f32.mxu0 %vm9007_vm4, %v9008_v46  ;;  %8417 = vmatpush3.bf16.msra.mxu0 %v8416_v50 }
 0x10c   :  { %8418 = vmatprep.subr.bf16.mxu0 %v9006_v45 }
 0x10f   :  { %8420 = vmatpush3.bf16.msra.mxu0 %v8419_v52 }
 0x110   :  { %8421 = vmatprep.subr.bf16.mxu0 %v9006_v45 }
 0x113   :  { %8424 = vmatpush3.bf16.msk.msra.mxu0 %vm9146_vm7, %v8422_v55 }
 0x114   :  { %7860 = vmatprep.subr.bf16.mxu0 %v9008_v46 }
 0x1dd   :  { %v7806_v57 = vpop.f32.mrb[4].mxu0 }
 0x1de   :  { %v451_v58 = vpop.f32.mrb[5].mxu0  ;;  %v632_v60 = vmul.f32 %v7806_v57, %v7806_v57 }
 0x1df   :  { %v7807_v59 = vpop.f32.mrb[6].mxu0  ;;  %v630_v0 = vmul.f32 %v451_v58, %v451_v58 }
 0x1e0   :  { %v8412_v61 = vpack.c.bf16 %v7807_v59, %v7806_v57  ;;  %v633_v62 = vmul.f32 %v7807_v59, %v7807_v59  ;;  %v454_v63 = vpop.f32.mrb[7].mxu0 }
 0x1e1   :  { %v8409_v1 = vpack.c.bf16 %v454_v63, %v451_v58  ;;  %v631_v2 = vmul.f32 %v454_v63, %v454_v63 }
 0x1e2   :  { %v8429_v3 = vpack.c.bf16 %v633_v62, %v632_v60  ;;  %v8710_v62 = vld [vmem:[%s10602_s1 + $0x5a0] ss:$8 sps:$4 sm:$0xff]  }
 0x1e3   :  { %v8426_v4 = vpack.c.bf16 %v631_v2, %v630_v0  ;;  %8410 = vmatpush3.bf16.msra.mxu1 %v8409_v1 }
 0x1e4   :  { %8411 = vmatprep.subr.bf16.mxu1 %v9006_v45 }
 0x1e7   :  { %8414 = vmatpush3.bf16.msk.msra.mxu1 %vm9157_vm8, %v8412_v61 }
 0x1e8   :  { %8425 = vmatprep.subr.bf16.mxu1 %v9006_v45 }
 0x1ea   :  { %7817 = vmatmul.mubr.msk.f32.vlgmr.msra.gmra.mrb[8].mxu1 %vm193_vm3, %v9010_v6 }
 0x1eb   :  { %8427 = vmatpush3.bf16.msra.mxu1 %v8426_v4  ;;  %7842 = vmatprep.mubr.msk.f32.mxu1 %vm9007_vm4, %v9008_v46 }
 0x1ec   :  { %8428 = vmatprep.subr.bf16.mxu1 %v9006_v45 }
 0x1ef   :  { %8431 = vmatpush3.bf16.msk.msra.mxu1 %vm9157_vm8, %v8429_v3 }
 0x1f0   :  { %8432 = vmatprep.subr.bf16.mxu1 %v9006_v45 }
 0x1f2   :  { %7843 = vmatmul.mubr.msk.f32.vlgmr.msra.gmra.mrb[10].mxu1 %vm193_vm3, %v9010_v6 }
 0x1f3   :  { %8434 = vmatpush3.bf16.msra.mxu1 %v8416_v50  ;;  %7857 = vmatprep.mubr.msk.f32.mxu1 %vm9007_vm4, %v9008_v46 }
 0x1f4   :  { %8435 = vmatprep.subr.bf16.mxu1 %v9006_v45 }
 0x1f7   :  { %8437 = vmatpush3.bf16.msra.mxu1 %v8419_v52 }
 0x1f8   :  { %8438 = vmatprep.subr.bf16.mxu1 %v9006_v45 }
 0x1fb   :  { %8441 = vmatpush3.bf16.msk.msra.mxu1 %vm9146_vm7, %v8422_v55 }
 0x1fc   :  { %7876 = vmatprep.subr.bf16.mxu1 %v9008_v46 }
 0x2bd   :  { %v548_v7 = vpop.f32.mrb[8].mxu1 }
 0x2be   :  { %v7818_v8 = vpop.f32.mrb[9].mxu1  ;;  %7832 = vmatmul.mubr.msk.f32.vlgmr.msra.gmra.mrb[8].mxu0 %vm552_vm9, %v548_v7 }
 0x2bf   :  { %7864 = vmatprep.mubr.msk.bf16.mxu0 %vm9007_vm4, %v9008_v46  ;;  %v8712_v8 = vld [vmem:[%s10602_s1 + $0x530] ss:$8 sps:$4 sm:$0xff]  }
 0x2c5   :  { %v703_v9 = vpop.f32.mrb[10].mxu1 }
 0x2c6   :  { %v7844_v10 = vpop.f32.mrb[11].mxu1  ;;  %7858 = vmatmul.mubr.msk.f32.vlgmr.msra.gmra.mrb[12].mxu1 %vm552_vm9, %v703_v9  ;;  %v8713_v9 = vld [vmem:[%s10602_s1 + $0x540] ss:$8 sps:$4 sm:$0xff]  }
 0x2c7   :  { %7882 = vmatprep.mubr.msk.bf16.mxu1 %vm9007_vm4, %v9008_v46  ;;  %7877 = vmatpush3.bf16.msra.mxu1 %v8706_v44  ;;  %v8714_v10 = vld [vmem:[%s10602_s1 + $0x550] ss:$8 sps:$4 sm:$0x1f]  }
 0x2c8   :  { %7878 = vmatprep.subr.bf16.mxu1 %v9008_v46 }
 0x2cb   :  { %7879 = vmatpush3.bf16.msra.mxu1 %v8707_v47  ;;  %v1490_v47 = vld [vmem:[%s10603_s2 + $0xe0] ss:$0 sm:$0xff] }
 0x2cc   :  { %7880 = vmatprep.subr.bf16.mxu1 %v9008_v46 }
 0x2cf   :  { %7881 = vmatpush3.bf16.msra.mxu1 %v949_v49 }
 0x2d0   :  { %7894 = vmatprep.subr.bf16.mxu1 %v9008_v46 }
 0x391   :  { %v626_v11 = vpop.f32.mrb[8].mxu0 }
 0x392   :  { %v7833_v12 = vpop.f32.mrb[9].mxu0  ;;  %v780_v13 = vmul.f32 %v626_v11, %v626_v11 }
 0x393   :  { %v1180_v12 = vld [vmem:[%s10603_s2 + $0x80] sm:$0xff] }
 0x399   :  { %v776_v14 = vpop.f32.mrb[12].mxu1 }
 0x39a   :  { %v781_v15 = vsub.f32 %v776_v14, %v780_v13  ;;  %v7859_v16 = vpop.f32.mrb[13].mxu1  ;;  %v1181_v13 = vld [vmem:[%s10603_s2 + $0x90] sm:$0xff] }
 0x39b   :  { %v8447_v14 = vpack.c.bf16 %v1181_v13, %v1180_v12  ;;  %v1183_v16 = vld [vmem:[%s10603_s2 + $0xb0] sm:$0xff] }
 0x39c   :  { %v782_v17 = vmax.f32 %v781_v15, 0.0  ;;  %v1182_v15 = vld [vmem:[%s10603_s2 + $0xa0] sm:$0xff]  ;;  %v8718_v12 = vld [vmem:[%s10602_s1 + $0x650] ss:$8 sps:$4 sm:$0xff]  }
 0x39e   :  { %v784_v18 = vadd.f32 1e-05, %v782_v17  ;;  %v8450_v17 = vpack.c.bf16 %v1183_v16, %v1182_v15 }
 0x3a0   :  { %8944 = vrsqrt.f32 %v784_v18  ;;  %v1184_v18 = vld [vmem:[%s10603_s2 + $0xc0] sm:$0xff] }
 0x3aa   :  { %v8945_v23 = vpop.eup %8944 }
 0x3ab   :  { %v786_v24 = vmul.f32 %v8945_v23, %v783_v21  ;;  %v8453_v21 = vpack.c.bf16 %v1185_v19, %v1184_v18  ;;  %v8720_v18 = vld [vmem:[%s10602_s1 + $0x670] ss:$8 sps:$4 sm:$0x1f]  }
 0x3ad   :  { %v790_v26 = vrot.slane %v786_v24, %v9193_v22  ;;  %v796_v27 = vmul.f32 %v786_v24, %v626_v11  ;;  %v1135_v11 = vsel %vm947_vm10, %v8714_v10, 0 }
 0x3af   :  { %v797_v28 = vsub.f32 %v795_v25, %v796_v27  ;;  %v791_v29 = vmul.f32 %v790_v26, %v451_v58  ;;  %v792_v30 = vmul.f32 %v790_v26, %v454_v63  ;;  %v793_v31 = vmul.f32 %v7806_v57, %v790_v26  ;;  %v8711_v63 = vld [vmem:[%s10602_s1 + $0x5b0] ss:$8 sps:$4 sm:$0x1f]  }
 0x3b0   :  { %v794_v32 = vmul.f32 %v7807_v59, %v790_v26  ;;  %v8709_v59 = vld [vmem:[%s10602_s1 + $0x590] ss:$8 sps:$4 sm:$0xff]   ;;  %v1071_v7 = vsel %vm947_vm10, %v8711_v63, 0 }
 0x3b1   :  { %v801_v33 = vrot.slane %v797_v28, %v9193_v22  ;;  %v1565_v63 = vld [vmem:[%s10602_s1 + $0x5d0] sm:$0xf] }
 0x3b2   :  { %v5060_v26 = vld [vmem:[%s10603_s2 + $0x230] sm:$0xff] }
 0x3b3   :  { %v802_v34 = vadd.f32 %v801_v33, %v791_v29  ;;  %v803_v35 = vadd.f32 %v801_v33, %v792_v30  ;;  %v804_v36 = vadd.f32 %v801_v33, %v793_v31  ;;  %v805_v37 = vadd.f32 %v801_v33, %v794_v32 }
 0x3b4   :  { %v9011_v32 = vmov 0.071428575  }
 0x3b5   :  { %v806_v38 = vpack.c.bf16 %v803_v35, %v802_v34  ;;  %v807_v39 = vpack.c.bf16 %v805_v37, %v804_v36 }
 0x3b7   :  { %7861 = vmatpush3.bf16.msra.mxu0 %v806_v38  ;;  %v819_v40 = vsel %vm10606_vm2, %v807_v39, 0 }
 0x3b8   :  { %7862 = vmatprep.subr.bf16.mxu0 %v9008_v46 }
 0x3bb   :  { %7863 = vmatpush3.bf16.msra.mxu0 %v819_v40 }
 0x3bc   :  { %7868 = vmatprep.subr.bf16.mxu0 %v9008_v46 }
 0x3be   :  { %7865 = vmatmul.mubr.msk.bf16.vlgmr.msra.gmra.mrb[12].mxu0 %vm193_vm3, %v8703_v41 }
 0x3bf   :  { %7869 = vmatpush3.bf16.msra.mxu0 %v806_v38  ;;  %7872 = vmatprep.mubr.msk.bf16.mxu0 %vm9007_vm4, %v9008_v46 }
 0x3c0   :  { %7870 = vmatprep.subr.bf16.mxu0 %v9008_v46 }
 0x3c3   :  { %7871 = vmatpush3.bf16.msra.mxu0 %v819_v40 }
 0x3c4   :  { %7886 = vmatprep.subr.bf16.mxu0 %v9008_v46 }
 0x3c6   :  { %7873 = vmatmul.mubr.msk.bf16.vlgmr.msra.gmra.mrb[16].mxu0 %vm193_vm3, %v8704_v42 }
 0x3c7   :  { %7887 = vmatpush3.bf16.msra.mxu0 %v806_v38  ;;  %7890 = vmatprep.mubr.msk.bf16.mxu0 %vm9007_vm4, %v9008_v46 }
 0x3c8   :  { %7888 = vmatprep.subr.bf16.mxu0 %v9008_v46 }
 0x3cb   :  { %7889 = vmatpush3.bf16.msra.mxu0 %v819_v40 }
 0x3cc   :  { %8442 = vmatprep.subr.bf16.mxu0 %v9006_v45 }
 0x3ce   :  { %7891 = vmatmul.mubr.msk.bf16.vlgmr.msra.gmra.mrb[20].mxu0 %vm193_vm3, %v8705_v43 }
 0x3cf   :  { %7918 = vmatprep.mubr.msk.f32.mxu0 %vm9007_vm4, %v9008_v46 }
 0x491   :  { %v855_v50 = vpop.f32.mrb[12].mxu0 }
 0x492   :  { %v7866_v51 = vpop.f32.mrb[13].mxu0 }
 0x493   :  { %v858_v52 = vpop.f32.mrb[14].mxu0 }
 0x494   :  { %v862_v53 = vpack.c.bf16 %v858_v52, %v855_v50  ;;  %v7867_v54 = vpop.f32.mrb[15].mxu0  ;;  %v1500_v50 = vld [vmem:[%s10603_s2 + $0xf0] ss:$0 sm:$0xff] }
 0x499   :  { %v913_v55 = vpop.f32.mrb[16].mxu0 }
 0x49a   :  { %v7874_v57 = vpop.f32.mrb[17].mxu0 }
 0x49b   :  { %v916_v58 = vpop.f32.mrb[18].mxu0 }
 0x49c   :  { %v920_v60 = vpack.c.bf16 %v916_v58, %v913_v55  ;;  %v7875_v61 = vpop.f32.mrb[19].mxu0 }
 0x49e   :  { %7883 = vmatmul.mubr.msk.bf16.vlgmr.msra.gmra.mrb[16].mxu1 %vm552_vm9, %v920_v60 }
 0x49f   :  { %7895 = vmatpush3.bf16.msra.mxu1 %v8709_v59  ;;  %7900 = vmatprep.mubr.msk.bf16.mxu1 %vm9007_vm4, %v9008_v46 }
 0x4a0   :  { %7896 = vmatprep.subr.bf16.mxu1 %v9008_v46 }
 0x4a1   :  { %v1036_v0 = vpop.f32.mrb[20].mxu0 }
 0x4a2   :  { %v7892_v1 = vpop.f32.mrb[21].mxu0 }
 0x4a3   :  { %7897 = vmatpush3.bf16.msra.mxu1 %v8710_v62  ;;  %v1039_v2 = vpop.f32.mrb[22].mxu0  ;;  %v1510_v62 = vld [vmem:[%s10602_s1 + $0x5c0] sm:$0xf] }
 0x4a4   :  { %v1043_v3 = vpack.c.bf16 %v1039_v2, %v1036_v0  ;;  %v7893_v4 = vpop.f32.mrb[23].mxu0  ;;  %7898 = vmatprep.subr.bf16.mxu1 %v9008_v46  ;;  %v1679_v0 = vld [vmem:[%s10602_s1 + $0x5e0] sm:$0xf]  ;;  %v8716_v2 = vld [vmem:[%s10602_s1 + $0x630] ss:$8 sps:$4 sm:$0xff]  }
 0x4a5   :  { %v8715_v1 = vld [vmem:[%s10602_s1 + $0x620] ss:$8 sps:$4 sm:$0xff]  }
 0x4a7   :  { %7899 = vmatpush3.bf16.msra.mxu1 %v1071_v7 }
 0x4a8   :  { %7904 = vmatprep.subr.bf16.mxu1 %v9008_v46 }
 0x4aa   :  { %7901 = vmatmul.mubr.msk.bf16.vlgmr.msra.gmra.mrb[16].mxu1 %vm552_vm9, %v1043_v3  ;;  %v8717_v3 = vld [vmem:[%s10602_s1 + $0x640] ss:$8 sps:$4 sm:$0x1f]  }
 0x4ab   :  { %7905 = vmatpush3.bf16.msra.mxu1 %v8712_v8  ;;  %7910 = vmatprep.mubr.msk.bf16.mxu1 %vm9007_vm4, %v9008_v46  ;;  %v1637_v4 = vsel %vm947_vm10, %v8717_v3, 0  ;;  %v2167_v3 = vld [vmem:[%s10603_s2 + $0x170] ss:$0 sm:$0xff] }
 0x4ac   :  { %7906 = vmatprep.subr.bf16.mxu1 %v9008_v46 }
 0x4af   :  { %7907 = vmatpush3.bf16.msra.mxu1 %v8713_v9 }
 0x4b0   :  { %7908 = vmatprep.subr.bf16.mxu1 %v9008_v46 }
 0x4b3   :  { %7909 = vmatpush3.bf16.msra.mxu1 %v1135_v11 }
 0x4b4   :  { %8460 = vmatprep.subr.bf16.mxu1 %v9006_v45 }
 0x4b6   :  { %7911 = vmatmul.mubr.msk.bf16.vlgmr.msra.gmra.mrb[16].mxu1 %vm552_vm9, %v862_v53 }
 0x4b7   :  { %7955 = vmatprep.mubr.msk.f32.mxu1 %vm9007_vm4, %v9008_v46  ;;  %8462 = vmatpush3.bf16.msra.mxu1 %v8447_v14 }
 0x4b8   :  { %8463 = vmatprep.subr.bf16.mxu1 %v9006_v45 }
 0x4bb   :  { %8465 = vmatpush3.bf16.msra.mxu1 %v8450_v17 }
 0x4bc   :  { %8466 = vmatprep.subr.bf16.mxu1 %v9006_v45 }
 0x4bf   :  { %8469 = vmatpush3.bf16.msk.msra.mxu1 %vm9146_vm7, %v8453_v21 }
 0x4c0   :  { %7970 = vmatprep.subr.bf16.mxu1 %v9008_v46 }
 0x589   :  { %v1171_v23 = vpop.f32.mrb[16].mxu1 }
 0x58a   :  { %v7912_v24 = vpop.f32.mrb[17].mxu1  ;;  %v1339_v27 = vmul.f32 %v1171_v23, %v1171_v23 }
 0x58b   :  { %v1174_v25 = vpop.f32.mrb[18].mxu1 }
 0x58c   :  { %v8443_v28 = vpack.c.bf16 %v1174_v25, %v1171_v23  ;;  %v1340_v29 = vmul.f32 %v1174_v25, %v1174_v25  ;;  %v7913_v30 = vpop.f32.mrb[19].mxu1 }
 0x58d   :  { %v8723_v30 = vld [vmem:[%s10602_s1 + $0x610] ss:$8 sps:$4 sm:$0x1f]  }
 0x58e   :  { %v8457_v31 = vpack.c.bf16 %v1340_v29, %v1339_v27  ;;  %8445 = vmatpush3.bf16.msk.msra.mxu0 %vm9298_vm11, %v8443_v28  ;;  %v8721_v28 = vld [vmem:[%s10602_s1 + $0x5f0] ss:$8 sps:$4 sm:$0xff]   ;;  %v8722_v29 = vld [vmem:[%s10602_s1 + $0x600] ss:$8 sps:$4 sm:$0xff]  }
 0x58f   :  { %8446 = vmatprep.subr.bf16.mxu0 %v9006_v45 }
 0x591   :  { %7919 = vmatmul.mubr.msk.f32.vlgmr.msra.gmra.mrb[10].mxu0 %vm1186_vm12, %v9011_v32 }
 0x592   :  { %8448 = vmatpush3.bf16.msra.mxu0 %v8447_v14  ;;  %7933 = vmatprep.mubr.msk.f32.mxu0 %vm9007_vm4, %v9008_v46 }
 0x593   :  { %8449 = vmatprep.subr.bf16.mxu0 %v9006_v45 }
 0x596   :  { %8451 = vmatpush3.bf16.msra.mxu0 %v8450_v17  ;;  %v8719_v17 = vld [vmem:[%s10602_s1 + $0x660] ss:$8 sps:$4 sm:$0xff]  }
 0x597   :  { %8452 = vmatprep.subr.bf16.mxu0 %v9006_v45 }
 0x59a   :  { %8455 = vmatpush3.bf16.msk.msra.mxu0 %vm9146_vm7, %v8453_v21 }
 0x59b   :  { %8456 = vmatprep.subr.bf16.mxu0 %v9006_v45 }
 0x664   :  { %v1259_v33 = vpop.f32.mrb[10].mxu0 }
 0x665   :  { %v7920_v34 = vpop.f32.mrb[11].mxu0  ;;  %7934 = vmatmul.mubr.msk.f32.vlgmr.msra.gmra.mrb[24].mxu0 %vm552_vm9, %v1259_v33 }
 0x666   :  { %8459 = vmatpush3.bf16.msk.msra.mxu0 %vm9298_vm11, %v8457_v31  ;;  %7940 = vmatprep.mubr.msk.f32.mxu0 %vm9007_vm4, %v9008_v46  ;;  %v1814_v31 = vsel %vm947_vm10, %v8723_v30, 0  ;;  %v1857_v34 = vld [vmem:[%s10603_s2 + $0x100] sm:$0xff] }
 0x667   :  { %7958 = vmatprep.subr.bf16.mxu0 %v9008_v46 }
 0x669   :  { %7941 = vmatmul.mubr.msk.f32.vlgmr.msra.gmra.mrb[26].mxu0 %vm1186_vm12, %v9011_v32 }
 0x66a   :  { %7960 = vmatprep.mubr.msk.bf16.mxu0 %vm9007_vm4, %v9008_v46 }
 0x738   :  { %v1335_v35 = vpop.f32.mrb[24].mxu0 }
 0x739   :  { %v7935_v36 = vpop.f32.mrb[25].mxu0  ;;  %v1487_v39 = vmul.f32 %v1335_v35, %v1335_v35 }
 0x73c   :  { %v1410_v37 = vpop.f32.mrb[26].mxu0 }
 0x73d   :  { %v7942_v38 = vpop.f32.mrb[27].mxu0  ;;  %7956 = vmatmul.mubr.msk.f32.vlgmr.msra.gmra.mrb[14].mxu1 %vm552_vm9, %v1410_v37 }
 0x73e   :  { %7976 = vmatprep.mubr.msk.bf16.mxu1 %vm9007_vm4, %v9008_v46  ;;  %7971 = vmatpush3.bf16.msra.mxu1 %v8715_v1  ;;  %v1859_v38 = vld [vmem:[%s10603_s2 + $0x120] sm:$0xff] }
 0x73f   :  { %7972 = vmatprep.subr.bf16.mxu1 %v9008_v46 }
 0x742   :  { %7973 = vmatpush3.bf16.msra.mxu1 %v8716_v2 }
 0x743   :  { %7974 = vmatprep.subr.bf16.mxu1 %v9008_v46 }
 0x746   :  { %7975 = vmatpush3.bf16.msra.mxu1 %v1637_v4 }
 0x747   :  { %7986 = vmatprep.subr.bf16.mxu1 %v9008_v46 }
 0x810   :  { %v1483_v40 = vpop.f32.mrb[14].mxu1 }
 0x811   :  { %v1488_v41 = vsub.f32 %v1483_v40, %v1487_v39  ;;  %v7957_v42 = vpop.f32.mrb[15].mxu1  ;;  %v1860_v39 = vld [vmem:[%s10603_s2 + $0x130] sm:$0xff] }
 0x812   :  { %v9012_v42 = vmov 0.125  }
 0x813   :  { %v1489_v43 = vmax.f32 %v1488_v41, 0.0 }
 0x815   :  { %v1491_v44 = vadd.f32 1e-05, %v1489_v43 }
 0x817   :  { %8946 = vrsqrt.f32 %v1491_v44  ;;  %v8474_v44 = vpack.c.bf16 %v1860_v39, %v1859_v38  ;;  %v2406_v38 = vld [vmem:[%s10602_s1 + $0xc0] sm:$0x1]  ;;  %v8733_v39 = vld [vmem:[%s10602_s1 + $0xd0] ss:$8 sps:$4 sm:$0xff]  }
 0x821   :  { %v8947_v48 = vpop.eup %8946 }
 0x822   :  { %v1493_v49 = vmul.f32 %v8947_v48, %v1490_v47  ;;  %v1861_v47 = vld [vmem:[%s10603_s2 + $0x140] sm:$0xff]  ;;  %v1862_v48 = vld [vmem:[%s10603_s2 + $0x150] sm:$0xff] }
 0x824   :  { %v1497_v51 = vrot.slane %v1493_v49, %v9193_v22  ;;  %v1501_v52 = vmul.f32 %v1493_v49, %v1335_v35  ;;  %v1858_v35 = vld [vmem:[%s10603_s2 + $0x110] sm:$0xff]  ;;  %v8477_v49 = vpack.c.bf16 %v1862_v48, %v1861_v47 }
 0x825   :  { %v8471_v36 = vpack.c.bf16 %v1858_v35, %v1857_v34 }
 0x826   :  { %v1498_v53 = vmul.f32 %v1497_v51, %v1171_v23  ;;  %v1499_v54 = vmul.f32 %v1497_v51, %v1174_v25  ;;  %v1502_v55 = vsub.f32 %v1500_v50, %v1501_v52  ;;  %v1751_v23 = vsel %vm947_vm10, %v8720_v18, 0  ;;  %v8729_v18 = vld [vmem:[%s10602_s1 + $0x64] ss:$8 sps:$4 sm:$0xff]  }
 0x828   :  { %v1506_v57 = vrot.slane %v1502_v55, %v9193_v22 }
 0x82a   :  { %v1507_v58 = vadd.f32 %v1506_v57, %v1498_v53  ;;  %v1508_v59 = vadd.f32 %v1506_v57, %v1499_v54 }
 0x82c   :  { %v1509_v60 = vpack.c.bf16 %v1508_v59, %v1507_v58 }
 0x82e   :  { %v1516_v61 = vsel %vm1514_vm13, %v1509_v60, 0 }
 0x82f   :  { %7959 = vmatpush3.bf16.msra.mxu0 %v1516_v61 }
 0x830   :  { %7964 = vmatprep.subr.bf16.mxu0 %v9008_v46 }
 0x832   :  { %7961 = vmatmul.mubr.msk.bf16.vlgmr.msra.gmra.mrb[28].mxu0 %vm1186_vm12, %v1510_v62 }
 0x833   :  { %7965 = vmatpush3.bf16.msra.mxu0 %v1516_v61  ;;  %7966 = vmatprep.mubr.msk.bf16.mxu0 %vm9007_vm4, %v9008_v46 }
 0x834   :  { %7980 = vmatprep.subr.bf16.mxu0 %v9008_v46 }
 0x83a   :  { %7967 = vmatmul.mubr.msk.bf16.vlgmr.msra.gmra.mrb[32].mxu0 %vm1186_vm12, %v1565_v63 }
 0x83b   :  { %7981 = vmatpush3.bf16.msra.mxu0 %v1516_v61  ;;  %7982 = vmatprep.mubr.msk.bf16.mxu0 %vm9007_vm4, %v9008_v46 }
 0x83c   :  { %8006 = vmatprep.subr.mxu0 %v9008_v46 }
 0x842   :  { %7983 = vmatmul.mubr.msk.bf16.vlgmr.msra.gmra.mrb[36].mxu0 %vm1186_vm12, %v1679_v0  ;;  %v2158_v0 = vld [vmem:[%s10603_s2 + $0x160] ss:$0 sm:$0xff] }
 0x843   :  { %8008 = vmatprep.mubr.msk.f32.mxu0 %vm9007_vm4, %v9008_v46 }
 0x905   :  { %v1552_v7 = vpop.f32.mrb[28].mxu0 }
 0x906   :  { %v7962_v8 = vpop.f32.mrb[29].mxu0  ;;  %v1558_v33 = vpack.c.bf16 %v1552_v7, %v1552_v7 }
 0x907   :  { %v1555_v9 = vpop.f32.mrb[30].mxu0 }
 0x908   :  { %v7963_v10 = vpop.f32.mrb[31].mxu0 }
 0x90d   :  { %v1603_v11 = vpop.f32.mrb[32].mxu0 }
 0x90e   :  { %v1609_v13 = vpack.c.bf16 %v1603_v11, %v1603_v11  ;;  %v7968_v14 = vpop.f32.mrb[33].mxu0 }
 0x90f   :  { %v1606_v15 = vpop.f32.mrb[34].mxu0 }
 0x910   :  { %v7969_v16 = vpop.f32.mrb[35].mxu0  ;;  %7977 = vmatmul.mubr.msk.bf16.vlgmr.msra.gmra.mrb[20].mxu1 %vm552_vm9, %v1609_v13  ;;  %v8726_v13 = vld [vmem:[%s10602_s1 + $0x54] ss:$8 sps:$4 sm:$0xff]   ;;  %v2230_v15 = vld [vmem:[%s10602_s1 + $0x40] sm:$0x1] }
 0x911   :  { %7987 = vmatpush3.bf16.msra.mxu1 %v8718_v12  ;;  %7992 = vmatprep.mubr.msk.bf16.mxu1 %vm9007_vm4, %v9008_v46  ;;  %v2176_v16 = vld [vmem:[%s10602_s1] sm:$0x1] }
 0x912   :  { %7988 = vmatprep.subr.bf16.mxu1 %v9008_v46 }
 0x915   :  { %7989 = vmatpush3.bf16.msra.mxu1 %v8719_v17  ;;  %v1717_v19 = vpop.f32.mrb[36].mxu0  ;;  %v8724_v17 = vld [vmem:[%s10602_s1 + $0x50] ss:$8 sps:$4 sm:$0xff]  }
 0x916   :  { %v7984_v21 = vpop.f32.mrb[37].mxu0  ;;  %7990 = vmatprep.subr.bf16.mxu1 %v9008_v46  ;;  %v1723_v25 = vpack.c.bf16 %v1717_v19, %v1717_v19  ;;  %v8727_v19 = vld [vmem:[%s10602_s1 + $0x60] ss:$8 sps:$4 sm:$0xff]  }
 0x917   :  { %v1720_v24 = vpop.f32.mrb[38].mxu0  ;;  %v8732_v21 = vld [vmem:[%s10602_s1 + $0x74] ss:$8 sps:$4 sm:$0xff]  }
 0x918   :  { %v7985_v27 = vpop.f32.mrb[39].mxu0  ;;  %v9013_v24 = vmov 0  }
 0x919   :  { %7991 = vmatpush3.bf16.msra.mxu1 %v1751_v23  ;;  %v8730_v23 = vld [vmem:[%s10602_s1 + $0x70] ss:$8 sps:$4 sm:$0xff]  }
 0x91a   :  { %7996 = vmatprep.subr.bf16.mxu1 %v9008_v46 }
 0x91c   :  { %7993 = vmatmul.mubr.msk.bf16.vlgmr.msra.gmra.mrb[20].mxu1 %vm552_vm9, %v1723_v25  ;;  %v2355_v25 = vld [vmem:[%s10602_s1 + $0x80] sm:$0x1] }
 0x91d   :  { %7997 = vmatpush3.bf16.msra.mxu1 %v8721_v28  ;;  %8002 = vmatprep.mubr.msk.bf16.mxu1 %vm9007_vm4, %v9008_v46 }
 0x91e   :  { %7998 = vmatprep.subr.bf16.mxu1 %v9008_v46 }
 0x921   :  { %7999 = vmatpush3.bf16.msra.mxu1 %v8722_v29 }
 0x922   :  { %8000 = vmatprep.subr.bf16.mxu1 %v9008_v46 }
 0x925   :  { %8001 = vmatpush3.bf16.msra.mxu1 %v1814_v31 }
 0x926   :  { %8046 = vmatprep.subr.bf16.mxu1 %v9008_v46 }
 0x928   :  { %8003 = vmatmul.mubr.msk.bf16.vlgmr.msra.gmra.mrb[20].mxu1 %vm552_vm9, %v1558_v33  ;;  %v8735_v33 = vld [vmem:[%s10602_s1 + $0xd4] ss:$8 sps:$4 sm:$0xff]  }
 0x929   :  { %8048 = vmatprep.mubr.msk.bf16.mxu1 %vm9007_vm4, %v9008_v46 }
 0x9fb   :  { %v1850_v37 = vpop.f32.mrb[20].mxu1 }
 0x9fc   :  { %v8004_v40 = vpop.f32.mrb[21].mxu1  ;;  %8007 = vmatpush3.msra.mxu0 %v1850_v37  ;;  %v2011_v50 = vmul.f32 %v1850_v37, %v1850_v37 }
 0x9fd   :  { %v1853_v41 = vpop.f32.mrb[22].mxu1  ;;  %8009 = vmatmul.mubr.msk.f32.vlgmr.msra.gmra.mrb[40].mxu0 %vm1863_vm14, %v9012_v42  ;;  %8470 = vmatprep.subr.bf16.mxu0 %v9006_v45  ;;  %v8738_v40 = vld [vmem:[%s10602_s1 + $0xe4] ss:$8 sps:$4 sm:$0xff]  }
 0x9fe   :  { %v8005_v43 = vpop.f32.mrb[23].mxu1  ;;  %8472 = vmatpush3.bf16.msra.mxu0 %v8471_v36  ;;  %8023 = vmatprep.mubr.msk.f32.mxu0 %vm9007_vm4, %v9008_v46  ;;  %v8736_v41 = vld [vmem:[%s10602_s1 + $0xe0] ss:$8 sps:$4 sm:$0xff]  }
 0x9ff   :  { %8473 = vmatprep.subr.bf16.mxu0 %v9006_v45  ;;  %v8739_v43 = vld [vmem:[%s10602_s1 + $0xf0] ss:$8 sps:$4 sm:$0xff]  }
 0xa02   :  { %8475 = vmatpush3.bf16.msra.mxu0 %v8474_v44 }
 0xa03   :  { %8476 = vmatprep.subr.bf16.mxu0 %v9006_v45 }
 0xa06   :  { %8478 = vmatpush3.bf16.msra.mxu0 %v8477_v49 }
 0xa07   :  { %8026 = vmatprep.subr.mxu0 %v9008_v46 }
 0xad0   :  { %v1933_v51 = vpop.f32.mrb[40].mxu0 }
 0xad1   :  { %v8010_v52 = vpop.f32.mrb[41].mxu0  ;;  %8024 = vmatmul.mubr.msk.f32.vlgmr.msra.gmra.mrb[42].mxu0 %vm1937_vm15, %v1933_v51 }
 0xad2   :  { %8027 = vmatpush3.msra.mxu0 %v2011_v50  ;;  %8028 = vmatprep.mubr.msk.f32.mxu0 %vm9007_vm4, %v9008_v46  ;;  %v8742_v52 = vld [vmem:[%s10602_s1 + $0x10] ss:$8 sps:$4 sm:$0xff]  }
 0xad3   :  { %8479 = vmatprep.subr.bf16.mxu0 %v9006_v45 }
 0xad5   :  { %8029 = vmatmul.mubr.msk.f32.vlgmr.msra.gmra.mrb[44].mxu0 %vm1863_vm14, %v9012_v42  ;;  %v8741_v42 = vld [vmem:[%s10602_s1 + $0xf4] ss:$8 sps:$4 sm:$0xff]  }
 0xad6   :  { %8481 = vmatpush3.bf16.msra.mxu0 %v8471_v36  ;;  %8043 = vmatprep.mubr.msk.f32.mxu0 %vm9007_vm4, %v9008_v46 }
 0xad7   :  { %8482 = vmatprep.subr.bf16.mxu0 %v9006_v45 }
 0xada   :  { %8484 = vmatpush3.bf16.msra.mxu0 %v8474_v44  ;;  %v8744_v44 = vld [vmem:[%s10602_s1 + $0x14] ss:$8 sps:$4 sm:$0xff]  }
 0xadb   :  { %8485 = vmatprep.subr.bf16.mxu0 %v9006_v45 }
 0xade   :  { %8487 = vmatpush3.bf16.msra.mxu0 %v8477_v49 }
 0xadf   :  { %8052 = vmatprep.subr.bf16.mxu0 %v9008_v46 }
 0xba4   :  { %v2007_v53 = vpop.f32.mrb[42].mxu0 }
 0xba5   :  { %v8025_v54 = vpop.f32.mrb[43].mxu0  ;;  %v2155_v58 = vmul.f32 %v2007_v53, %v2007_v53 }
 0xba8   :  { %v2078_v55 = vpop.f32.mrb[44].mxu0 }
 0xba9   :  { %v8030_v57 = vpop.f32.mrb[45].mxu0  ;;  %8044 = vmatmul.mubr.msk.f32.vlgmr.msra.gmra.mrb[46].mxu0 %vm1937_vm15, %v2078_v55  ;;  %v8747_v55 = vld [vmem:[%s10602_s1 + $0x24] ss:$8 sps:$4 sm:$0xff]  }
 0xbaa   :  { %8054 = vmatprep.mubr.msk.bf16.mxu0 %vm9007_vm4, %v9008_v46 }
 0xc7c   :  { %v2151_v59 = vpop.f32.mrb[46].mxu0 }
 0xc7d   :  { %v2156_v60 = vsub.f32 %v2151_v59, %v2155_v58  ;;  %v8045_v61 = vpop.f32.mrb[47].mxu0  ;;  %v8745_v59 = vld [vmem:[%s10602_s1 + $0x20] ss:$8 sps:$4 sm:$0xff]  }
 0xc7e   :  { %v8748_v61 = vld [vmem:[%s10602_s1 + $0x30] ss:$8 sps:$4 sm:$0xff]  }
 0xc7f   :  { %v2157_v62 = vmax.f32 %v2156_v60, 0.0  ;;  %v8750_v60 = vld [vmem:[%s10602_s1 + $0x34] ss:$8 sps:$4 sm:$0xff]  }
 0xc81   :  { %v2159_v63 = vadd.f32 1e-05, %v2157_v62  ;;  %v8753_v62 = vld [vmem:[%s10602_s1 + $0x94] ss:$8 sps:$4 sm:$0xff]  }
 0xc83   :  { %8948 = vrsqrt.f32 %v2159_v63  ;;  %v8751_v63 = vld [vmem:[%s10602_s1 + $0x90] ss:$8 sps:$4 sm:$0xff]  }
 0xc8d   :  { %v8949_v1 = vpop.eup %8948 }
 0xc8e   :  { %v2161_v2 = vmul.f32 %v8949_v1, %v2158_v0  ;;  %v8756_v1 = vld [vmem:[%s10602_s1 + $0xa4] ss:$8 sps:$4 sm:$0xff]  }
 0xc90   :  { %v2165_v4 = vrot.slane %v2161_v2, %v9193_v22  ;;  %v2168_v7 = vmul.f32 %v2161_v2, %v2007_v53  ;;  %v8754_v2 = vld [vmem:[%s10602_s1 + $0xa0] ss:$8 sps:$4 sm:$0xff]  }
 0xc92   :  { %v2166_v8 = vmul.f32 %v2165_v4, %v1850_v37  ;;  %v2169_v9 = vsub.f32 %v2167_v3, %v2168_v7  ;;  %v8759_v3 = vld [vmem:[%s10602_s1 + $0xb4] ss:$8 sps:$4 sm:$0xff]   ;;  %v8757_v4 = vld [vmem:[%s10602_s1 + $0xb0] ss:$8 sps:$4 sm:$0xff]  }
 0xc94   :  { %v2173_v10 = vrot.slane %v2169_v9, %v9193_v22 }
 0xc96   :  { %v2174_v11 = vadd.f32 %v2173_v10, %v2166_v8 }
 0xc98   :  { %v2175_v12 = vpack.c.bf16 %v2174_v11, %v2174_v11 }
 0xc9a   :  { %v2181_v14 = vsel %vm48_vm1, %v2175_v12, 0 }
 0xc9b   :  { %8047 = vmatpush3.bf16.msra.mxu1 %v2181_v14  ;;  %8053 = vmatpush3.bf16.msra.mxu0 %v2181_v14 }
 0xc9c   :  { %8058 = vmatprep.subr.bf16.mxu0 %v9008_v46  ;;  %2314 = vmatprep.subr.bf16.mxu1 %v8726_v13 }
 0xc9e   :  { %8055 = vmatmul.mubr.msk.bf16.vlgmr.msra.gmra.mrb[48].mxu0 %vm1863_vm14, %v2230_v15  ;;  %8049 = vmatmul.mubr.msk.bf16.vlgmr.msra.gmra.mrb[24].mxu1 %vm1863_vm14, %v2176_v16  ;;  %v8760_v15 = vld [vmem:[%s10602_s1 + $0x700] ss:$8 sps:$4 sm:$0xff]  }
 0xc9f   :  { %8059 = vmatpush3.bf16.msra.mxu0 %v2181_v14  ;;  %2315 = vmatpush1.bf16.msra.mxu1 %v8724_v17  ;;  %v8761_v16 = vld [vmem:[%s10602_s1 + $0x680] ss:$8 sps:$4 sm:$0xff]   ;;  %v8762_v17 = vld [vmem:[%s10602_s1 + $0x710] ss:$8 sps:$4 sm:$0xff]  }
 0xca0   :  { %2316 = vmatprep.subr.bf16.mxu1 %v8729_v18  ;;  %8060 = vmatprep.mubr.msk.bf16.mxu0 %vm9007_vm4, %v9008_v46  ;;  %v8763_v18 = vld [vmem:[%s10602_s1 + $0x690] ss:$8 sps:$4 sm:$0xff]  }
 0xca1   :  { %2346 = vmatprep.mubr.bf16.mxu1 %v9013_v24 }
 0xca3   :  { %2317 = vmatpush1.bf16.msra.mxu1 %v8727_v19  ;;  %v8764_v19 = vld [vmem:[%s10602_s1 + $0x720] ss:$8 sps:$4 sm:$0xff]  }
 0xca4   :  { %2318 = vmatprep.subr.bf16.mxu1 %v8732_v21  ;;  %v8765_v21 = vld [vmem:[%s10602_s1 + $0x6a0] ss:$8 sps:$4 sm:$0xff]  }
 0xca6   :  { %8061 = vmatmul.mubr.msk.bf16.vlgmr.msra.gmra.mrb[52].mxu0 %vm1863_vm14, %v2355_v25  ;;  %v8767_v25 = vld [vmem:[%s10602_s1 + $0x6b0] ss:$8 sps:$4 sm:$0xff]  }
 0xca7   :  { %2319 = vmatpush1.bf16.msra.mxu1 %v8730_v23  ;;  %2755 = vmatprep.mubr.f32.mxu0 %v9008_v46  ;;  %v8766_v23 = vld [vmem:[%s10602_s1 + $0x730] ss:$8 sps:$4 sm:$0xff]  }
 0xca8   :  { %8064 = vmatprep.subr.bf16.mxu1 %v9008_v46 }
 0xd71   :  { %v2268_v27 = vpop.f32.mrb[48].mxu0  ;;  %v2217_v28 = vpop.f32.mrb[24].mxu1 }
 0xd72   :  { %v2274_v29 = vpack.c.bf16 %v2268_v27, %v2268_v27  ;;  %v8056_v30 = vpop.f32.mrb[49].mxu0  ;;  %v8050_v31 = vpop.f32.mrb[25].mxu1  ;;  %v2223_v0 = vpack.c.bf16 %v2217_v28, %v2217_v28  ;;  %v8768_v27 = vld [vmem:[%s10602_s1 + $0x740] ss:$8 sps:$4 sm:$0xff]  }
 0xd73   :  { %v2271_v34 = vpop.f32.mrb[50].mxu0  ;;  %v2220_v35 = vpop.f32.mrb[26].mxu1  ;;  %v8769_v28 = vld [vmem:[%s10602_s1 + $0x6c0] ss:$8 sps:$4 sm:$0xff]   ;;  %v8771_v30 = vld [vmem:[%s10602_s1 + $0x6d0] ss:$8 sps:$4 sm:$0xff]  }
 0xd74   :  { %v8057_v36 = vpop.f32.mrb[51].mxu0  ;;  %7166 = vmatmul.mubr.msk.bf16.vlgmr.msra.gmra.mrb[28].mxu1 %vm1937_vm15, %v2274_v29  ;;  %v8051_v37 = vpop.f32.mrb[27].mxu1  ;;  %v8770_v29 = vld [vmem:[%s10602_s1 + $0x750] ss:$8 sps:$4 sm:$0xff]   ;;  %v8772_v31 = vld [vmem:[%s10602_s1 + $0x760] ss:$8 sps:$4 sm:$0xff]  }
 0xd75   :  { %8065 = vmatpush3.bf16.msra.mxu1 %v2181_v14  ;;  %8066 = vmatprep.mubr.msk.bf16.mxu1 %vm9007_vm4, %v9008_v46  ;;  %v9014_v14 = vmov 0.5   ;;  %v8774_v34 = vld [vmem:[%s10602_s1 + $0x770] ss:$8 sps:$4 sm:$0xff]   ;;  %v8776_v36 = vld [vmem:[%s10602_s1 + $0x780] ss:$8 sps:$4 sm:$0xff]  }
 0xd76   :  { %2490 = vmatprep.subr.bf16.mxu1 %v8735_v33  ;;  %v8773_v33 = vld [vmem:[%s10602_s1 + $0x6e0] ss:$8 sps:$4 sm:$0xff]   ;;  %v8775_v35 = vld [vmem:[%s10602_s1 + $0x6f0] ss:$8 sps:$4 sm:$0xff]   ;;  %v8778_v37 = vld [vmem:[%s10602_s1 + $0x784] ss:$8 sps:$4 sm:$0xff]  }
 0xd79   :  { %v2393_v47 = vpop.f32.mrb[52].mxu0 }
 0xd7a   :  { %v8062_v48 = vpop.f32.mrb[53].mxu0  ;;  %v2399_v7 = vpack.c.bf16 %v2393_v47, %v2393_v47  ;;  %v8788_v47 = vld [vmem:[%s10602_s1 + $0x7c0] ss:$8 sps:$4 sm:$0xff]  }
 0xd7b   :  { %v2396_v49 = vpop.f32.mrb[54].mxu0  ;;  %v8793_v48 = vld [vmem:[%s10602_s1 + $0x7d4] ss:$8 sps:$4 sm:$0xff]  }
 0xd7c   :  { %8067 = vmatmul.mubr.msk.bf16.vlgmr.msra.gmra.mrb[32].mxu1 %vm1863_vm14, %v2406_v38  ;;  %v8063_v50 = vpop.f32.mrb[55].mxu0  ;;  %v8781_v38 = vld [vmem:[%s10602_s1 + $0x794] ss:$8 sps:$4 sm:$0xff]   ;;  %v8791_v49 = vld [vmem:[%s10602_s1 + $0x7d0] ss:$8 sps:$4 sm:$0xff]  }
 0xd7d   :  { %2491 = vmatpush1.bf16.msra.mxu1 %v8733_v39  ;;  %2522 = vmatprep.mubr.bf16.mxu1 %v9013_v24  ;;  %v8779_v39 = vld [vmem:[%s10602_s1 + $0x790] ss:$8 sps:$4 sm:$0xff]  }
 0xd7e   :  { %2492 = vmatprep.subr.bf16.mxu1 %v8738_v40  ;;  %v8784_v40 = vld [vmem:[%s10602_s1 + $0x7a4] ss:$8 sps:$4 sm:$0xff]  }
 0xd81   :  { %2493 = vmatpush1.bf16.msra.mxu1 %v8736_v41  ;;  %v8782_v41 = vld [vmem:[%s10602_s1 + $0x7a0] ss:$8 sps:$4 sm:$0xff]  }
 0xd82   :  { %2494 = vmatprep.subr.bf16.mxu1 %v8741_v42  ;;  %v8787_v42 = vld [vmem:[%s10602_s1 + $0x7b4] ss:$8 sps:$4 sm:$0xff]  }
 0xd85   :  { %2495 = vmatpush1.bf16.msra.mxu1 %v8739_v43  ;;  %v8785_v43 = vld [vmem:[%s10602_s1 + $0x7b0] ss:$8 sps:$4 sm:$0xff]  }
 0xd86   :  { %2564 = vmatprep.subr.bf16.mxu1 %v8744_v44  ;;  %v8790_v44 = vld [vmem:[%s10602_s1 + $0x7c4] ss:$8 sps:$4 sm:$0xff]  }
 0xe4f   :  { %v2444_v51 = vpop.f32.mrb[32].mxu1 }
 0xe50   :  { %v2450_v53 = vpack.c.bf16 %v2444_v51, %v2444_v51  ;;  %v8068_v54 = vpop.f32.mrb[33].mxu1 }
 0xe51   :  { %v2447_v57 = vpop.f32.mrb[34].mxu1 }
 0xe52   :  { %v8069_v58 = vpop.f32.mrb[35].mxu1  ;;  %7175 = vmatmul.mubr.msk.bf16.vlgmr.msra.gmra.mrb[28].mxu1 %vm1937_vm15, %v2450_v53 }
 0xe53   :  { %2565 = vmatpush1.bf16.msra.mxu1 %v8742_v52  ;;  %2596 = vmatprep.mubr.bf16.mxu1 %v9013_v24 }
 0xe54   :  { %2566 = vmatprep.subr.bf16.mxu1 %v8747_v55 }
 0xe57   :  { %2567 = vmatpush1.bf16.msra.mxu1 %v8745_v59 }
 0xe58   :  { %2568 = vmatprep.subr.bf16.mxu1 %v8750_v60 }
 0xe5b   :  { %2569 = vmatpush1.bf16.msra.mxu1 %v8748_v61 }
 0xe5c   :  { %2638 = vmatprep.subr.bf16.mxu1 %v8753_v62 }
 0xe5e   :  { %7182 = vmatmul.mubr.msk.bf16.vlgmr.msra.gmra.mrb[28].mxu1 %vm1937_vm15, %v2223_v0 }
 0xe5f   :  { %2639 = vmatpush1.bf16.msra.mxu1 %v8751_v63  ;;  %2670 = vmatprep.mubr.bf16.mxu1 %v9013_v24  ;;  %v9015_v63 = vmov 1966171168  }
 0xe60   :  { %2640 = vmatprep.subr.bf16.mxu1 %v8756_v1  ;;  %v2857_v0 = vunpack.c.l.s4 %v9015_v63  ;;  %v8803_v63 = vld [vmem:[%s10602_s1 + $0x810] ss:$8 sps:$4 sm:$0xff]  }
 0xe62   :  { %v2858_v1 = vunpack.c.0.s8 %v2857_v0  ;;  %v8808_v0 = vld [vmem:[%s10602_s1 + $0x824] ss:$8 sps:$4 sm:$0xff]  }
 0xe63   :  { %2641 = vmatpush1.bf16.msra.mxu1 %v8754_v2 }
 0xe64   :  { %2642 = vmatprep.subr.bf16.mxu1 %v8759_v3  ;;  %v9660_v3 = vsub.s32 %v2858_v1, %v9187_v20  ;;  %v8806_v1 = vld [vmem:[%s10602_s1 + $0x820] ss:$8 sps:$4 sm:$0xff]  }
 0xe67   :  { %2643 = vmatpush1.bf16.msra.mxu1 %v8757_v4 }
 0xe68   :  { %3195 = vmatprep.subr.bf16.mxu1 %v8778_v37 }
 0xe6a   :  { %7189 = vmatmul.mubr.msk.bf16.vlgmr.msra.gmra.mrb[28].mxu1 %vm1937_vm15, %v2399_v7 }
 0xe6b   :  { %3227 = vmatprep.mubr.bf16.mxu1 %v9013_v24  ;;  %3196 = vmatpush1.bf16.msra.mxu1 %v8776_v36 }
 0xe6c   :  { %3197 = vmatprep.subr.bf16.mxu1 %v8781_v38 }
 0xe6f   :  { %3198 = vmatpush1.bf16.msra.mxu1 %v8779_v39  ;;  %v8796_v39 = vld [vmem:[%s10602_s1 + $0x7e4] ss:$8 sps:$4 sm:$0xff]  }
 0xe70   :  { %3199 = vmatprep.subr.bf16.mxu1 %v8784_v40  ;;  %v8794_v40 = vld [vmem:[%s10602_s1 + $0x7e0] ss:$8 sps:$4 sm:$0xff]  }
 0xe73   :  { %3200 = vmatpush1.bf16.msra.mxu1 %v8782_v41  ;;  %v8799_v41 = vld [vmem:[%s10602_s1 + $0x7f4] ss:$8 sps:$4 sm:$0xff]  }
 0xe74   :  { %3201 = vmatprep.subr.bf16.mxu1 %v8787_v42  ;;  %v8797_v42 = vld [vmem:[%s10602_s1 + $0x7f0] ss:$8 sps:$4 sm:$0xff]  }
 0xe77   :  { %3202 = vmatpush1.bf16.msra.mxu1 %v8785_v43 }
 0xe78   :  { %3203 = vmatprep.subr.bf16.mxu1 %v8790_v44  ;;  %v2961_v44 = vld [vmem:[%s10603_s2 + $0x1a0] ss:$0 sm:$0xff] }
 0xe7b   :  { %3204 = vmatpush1.bf16.msra.mxu1 %v8788_v47 }
 0xe7c   :  { %3205 = vmatprep.subr.bf16.mxu1 %v8793_v48 }
 0xe7f   :  { %3206 = vmatpush1.bf16.msra.mxu1 %v8791_v49 }
 0xe80   :  { %3207 = vmatprep.subr.bf16.mxu1 %v8796_v39 }
 0xe83   :  { %3208 = vmatpush1.bf16.msra.mxu1 %v8794_v40 }
 0xe84   :  { %3209 = vmatprep.subr.bf16.mxu1 %v8799_v41 }
 0xe87   :  { %3210 = vmatpush1.bf16.msra.mxu1 %v8797_v42 }
 0xf3d   :  { %v9556_v8 = vpop.f32.mrb[28].mxu1 }
 0xf3e   :  { %v9558_v9 = vpop.f32.mrb[29].mxu1  ;;  %v2762_v12 = vmul.f32 %v9556_v8, %v9556_v8 }
 0xf3f   :  { %v2763_v10 = vmul.f32 %v9558_v9, %v9558_v9  ;;  %v2676_v11 = vpop.f32.mrb[30].mxu1  ;;  %7190 = vmatprep.subr.msk.mxu0 %vm556_vm5, %v9558_v9 }
 0xf40   :  { %v2677_v13 = vpop.f32.mrb[31].mxu1  ;;  %7191 = vmatpush1.msk.msra.mxu0 %vm556_vm5, %v9556_v8  ;;  %v7196_v11 = vld [vmem:[%s10603_s2 + $0x180] ss:$8 sm:$0x3] }
 0xf41   :  { %7192 = vmatmul.mubr.msk.f32.vlgmr.msra.gmra.mrb[56].mxu0 %vm2681_vm6, %v9014_v14  ;;  %7193 = vmatprep.subr.msk.mxu0 %vm556_vm5, %v2763_v10  ;;  %v9668_v13 = vsub.s32 1, %v9187_v20 }
 0xf42   :  { %7194 = vmatpush1.msk.msra.mxu0 %vm556_vm5, %v2762_v12  ;;  %2834 = vmatprep.mubr.f32.mxu0 %v9008_v46 }
 0xf43   :  { %7576 = vmatprep.subr.bf16.mxu0 %v8760_v15 }
 0xf45   :  { %7195 = vmatmul.mubr.msk.f32.vlgmr.msra.gmra.mrb[58].mxu0 %vm2681_vm6, %v9014_v14 }
 0xf46   :  { %7577 = vmatpush3.bf16.msra.mxu0 %v8761_v16 }
 0xf47   :  { %7578 = vmatprep.subr.bf16.mxu0 %v8762_v17 }
 0xf4a   :  { %7579 = vmatpush3.bf16.msra.mxu0 %v8763_v18 }
 0xf4b   :  { %7580 = vmatprep.subr.bf16.mxu0 %v8764_v19 }
 0xf4e   :  { %7581 = vmatpush3.bf16.msra.mxu0 %v8765_v21 }
 0xf4f   :  { %7582 = vmatprep.subr.bf16.mxu0 %v8766_v23 }
 0xf52   :  { %7583 = vmatpush3.bf16.msra.mxu0 %v8767_v25 }
 0xf53   :  { %7584 = vmatprep.subr.bf16.mxu0 %v8768_v27 }
 0xf56   :  { %7585 = vmatpush3.bf16.msra.mxu0 %v8769_v28  ;;  %v7197_v28 = vld [vmem:[%s10603_s2 + $0x190] ss:$8 sm:$0x3] }
 0xf57   :  { %7586 = vmatprep.subr.bf16.mxu0 %v8770_v29 }
 0xf5a   :  { %7587 = vmatpush3.bf16.msra.mxu0 %v8771_v30 }
 0xf5b   :  { %7588 = vmatprep.subr.bf16.mxu0 %v8772_v31 }
 0xf5e   :  { %7589 = vmatpush3.bf16.msra.mxu0 %v8773_v33 }
 0xf5f   :  { %7590 = vmatprep.subr.bf16.mxu0 %v8774_v34 }
 0xf62   :  { %7591 = vmatpush3.bf16.msra.mxu0 %v8775_v35 }
0x1014   :  { %v2757_v50 = vpop.f32.mrb[56].mxu0 }
0x1015   :  { %v2759_v51 = vpop.f32.mrb[57].mxu0  ;;  %v2841_v52 = vmul.f32 %v2757_v50, %v2757_v50 }
0x1016   :  { %v2842_v53 = vmul.f32 %v2759_v51, %v2759_v51 }
0x1018   :  { %v2836_v54 = vpop.f32.mrb[58].mxu0 }
0x1019   :  { %v2843_v55 = vsub.f32 %v2836_v54, %v2841_v52  ;;  %v2838_v57 = vpop.f32.mrb[59].mxu0 }
0x101a   :  { %v2844_v58 = vsub.f32 %v2838_v57, %v2842_v53 }
0x101b   :  { %v2845_v59 = vmax.f32 %v2843_v55, 0.0 }
0x101c   :  { %v2846_v60 = vmax.f32 %v2844_v58, 0.0  ;;  %v8802_v58 = vld [vmem:[%s10602_s1 + $0x804] ss:$8 sps:$4 sm:$0xff]  }
0x101d   :  { %v2849_v61 = vadd.f32 1e-05, %v2845_v59 }
0x101e   :  { %v2850_v62 = vadd.f32 1e-05, %v2846_v60 }
0x101f   :  { %8950 = vrsqrt.f32 %v2849_v61  ;;  %v8800_v61 = vld [vmem:[%s10602_s1 + $0x800] ss:$8 sps:$4 sm:$0xff]  }
0x1020   :  { %8952 = vrsqrt.f32 %v2850_v62  ;;  %v8805_v62 = vld [vmem:[%s10602_s1 + $0x814] ss:$8 sps:$4 sm:$0xff]  }
0x1029   :  { %v8951_v2 = vpop.eup %8950 }
0x102a   :  { %v8953_v4 = vpop.eup %8952 }
0x102b   :  { %v2855_v7 = vcombine.low %v8951_v2, %v8953_v4  ;;  %v8811_v2 = vld [vmem:[%s10602_s1 + $0x834] ss:$8 sps:$4 sm:$0xff]   ;;  %v8809_v4 = vld [vmem:[%s10602_s1 + $0x830] ss:$8 sps:$4 sm:$0xff]  }
0x102d   :  { %v2862_v10 = vrot.slane %v2855_v7, %v9660_v3  ;;  %v8814_v7 = vld [vmem:[%s10602_s1 + $0x844] ss:$8 sps:$4 sm:$0xff]  }
0x102f   :  { %v2869_v12 = vrot.slane %v2862_v10, %v9660_v3  ;;  %v8812_v10 = vld [vmem:[%s10602_s1 + $0x840] ss:$8 sps:$4 sm:$0xff]  }
0x1031   :  { %v2871_v15 = vmul.f32 %v7196_v11, %v2869_v12  ;;  %v8817_v11 = vld [vmem:[%s10602_s1 + $0x854] ss:$8 sps:$4 sm:$0xff]   ;;  %v8815_v12 = vld [vmem:[%s10602_s1 + $0x850] ss:$8 sps:$4 sm:$0xff]  }
0x1033   :  { %v2876_v16 = vrot.slane %v2871_v15, %v9193_v22  ;;  %v2880_v17 = vrot.slane %v2871_v15, %v9668_v13  ;;  %v8820_v15 = vld [vmem:[%s10602_s1 + $0x864] ss:$8 sps:$4 sm:$0xff]  }
0x1035   :  { %v2884_v18 = vmul.f32 %v2880_v17, %v9558_v9  ;;  %v2887_v19 = vmul.f32 %v2876_v16, %v2757_v50  ;;  %v2888_v21 = vmul.f32 %v2880_v17, %v2759_v51  ;;  %v2883_v23 = vmul.f32 %v2876_v16, %v9556_v8  ;;  %v8818_v16 = vld [vmem:[%s10602_s1 + $0x860] ss:$8 sps:$4 sm:$0xff]   ;;  %v8823_v17 = vld [vmem:[%s10602_s1 + $0x874] ss:$8 sps:$4 sm:$0xff]  }
0x1037   :  { %v2891_v25 = vcombine.low %v2887_v19, %v2888_v21  ;;  %v8826_v19 = vld [vmem:[%s10602_s1 + $0x884] ss:$8 sps:$4 sm:$0xff]   ;;  %v8824_v21 = vld [vmem:[%s10602_s1 + $0x880] ss:$8 sps:$4 sm:$0xff]  }
0x1039   :  { %v2898_v27 = vrot.slane %v2891_v25, %v9660_v3  ;;  %v8827_v25 = vld [vmem:[%s10602_s1 + $0x890] ss:$8 sps:$4 sm:$0xff]  }
0x103b   :  { %v2905_v20 = vrot.slane %v2898_v27, %v9660_v3  ;;  %v8832_v27 = vld [vmem:[%s10602_s1 + $0x8a4] ss:$8 sps:$4 sm:$0xff]  }
0x103d   :  { %v2907_v29 = vsub.f32 %v7197_v28, %v2905_v20  ;;  %v8830_v28 = vld [vmem:[%s10602_s1 + $0x8a0] ss:$8 sps:$4 sm:$0xff]   ;;  %v8835_v20 = vld [vmem:[%s10602_s1 + $0x8b4] ss:$8 sps:$4 sm:$0xff]  }
0x103f   :  { %v2916_v30 = vrot.slane %v2907_v29, %v9668_v13  ;;  %v2912_v31 = vrot.slane %v2907_v29, %v9193_v22  ;;  %v8833_v29 = vld [vmem:[%s10602_s1 + $0x8b0] ss:$8 sps:$4 sm:$0xff]  }
0x1041   :  { %v2920_v33 = vadd.f32 %v2916_v30, %v2884_v18  ;;  %v2919_v9 = vadd.f32 %v2912_v31, %v2883_v23  ;;  %v8821_v18 = vld [vmem:[%s10602_s1 + $0x870] ss:$8 sps:$4 sm:$0xff]   ;;  %v8829_v23 = vld [vmem:[%s10602_s1 + $0x894] ss:$8 sps:$4 sm:$0xff]   ;;  %v8838_v30 = vld [vmem:[%s10602_s1 + $0x8c4] ss:$8 sps:$4 sm:$0xff]  }
0x1042   :  { %v8836_v31 = vld [vmem:[%s10602_s1 + $0x8c0] ss:$8 sps:$4 sm:$0xff]  }
0x1043   :  { %vm2922_vm0 = vcmp.ge.f32.partialorder %v2920_v33, 0.0  ;;  %v2924_v34 = vmul.f32 0.01, %v2920_v33  ;;  %vm2921_vm2 = vcmp.ge.f32.partialorder %v2919_v9, 0.0  ;;  %v2923_v8 = vmul.f32 0.01, %v2919_v9 }
0x1045   :  { %v2926_v35 = vsel %vm2922_vm0, %v2920_v33, %v2924_v34  ;;  %v2925_v36 = vsel %vm2921_vm2, %v2919_v9, %v2923_v8  ;;  %v8841_v33 = vld [vmem:[%s10602_s1 + $0x8d4] ss:$8 sps:$4 sm:$0xff]   ;;  %v8839_v9 = vld [vmem:[%s10602_s1 + $0x8d0] ss:$8 sps:$4 sm:$0xff]   ;;  %v8844_v34 = vld [vmem:[%s10602_s1 + $0x8e4] ss:$8 sps:$4 sm:$0xff]  }
0x1046   :  { %v2928_v37 = vpack.c.bf16 %v2926_v35, %v2926_v35  ;;  %v2927_v38 = vpack.c.bf16 %v2925_v36, %v2925_v36  ;;  %v8842_v8 = vld [vmem:[%s10602_s1 + $0x8e0] ss:$8 sps:$4 sm:$0xff]   ;;  %v8847_v35 = vld [vmem:[%s10602_s1 + $0x8f4] ss:$8 sps:$4 sm:$0xff]   ;;  %v8845_v36 = vld [vmem:[%s10602_s1 + $0x8f0] ss:$8 sps:$4 sm:$0xff]  }
0x1048   :  { %3090 = vmatprep.mubr.bf16.mxu0 %v2928_v37 }
0x1049   :  { %3091 = vmatmul.mubr.bf16.vlgmr.msra.gmra.mrb[60].mxu0 %v2927_v38 }
0x104a   :  { %3306 = vmatprep.mubr.f32.mxu0 %v9008_v46 }
0x111c   :  { %v7592_v43 = vpop.f32.mrb[60].mxu0 }
0x111d   :  { %v7593_v47 = vpop.f32.mrb[61].mxu0 }
0x111e   :  { %v7594_v48 = vadd.f32 %v7593_v47, %v7592_v43  ;;  %v7595_v49 = vpop.f32.mrb[62].mxu0 }
0x111f   :  { %v7596_v50 = vpop.f32.mrb[63].mxu0 }
0x1120   :  { %v3093_v51 = vadd.f32 %v7594_v48, %v2961_v44 }
0x1122   :  { %v3098_v52 = vpack.c.bf16 %v3093_v51, %v3093_v51 }
0x1124   :  { %3228 = vmatmul.mubr.bf16.vlgmr.msra.gmra.mrb[36].mxu1 %v3098_v52 }
0x1125   :  { %3783 = vmatprep.mubr.f32.mxu1 %v9008_v46 }
0x11f7   :  { %v9698_v53 = vpop.f32.mrb[36].mxu1 }
0x11f8   :  { %v9700_v54 = vpop.f32.mrb[37].mxu1  ;;  %v3313_v59 = vmul.f32 %v9698_v53, %v9698_v53 }
0x11f9   :  { %v3314_v55 = vmul.f32 %v9700_v54, %v9700_v54  ;;  %v3233_v57 = vpop.f32.mrb[38].mxu1  ;;  %7230 = vmatprep.subr.msk.mxu0 %vm556_vm5, %v9700_v54 }
0x11fa   :  { %v3234_v60 = vpop.f32.mrb[39].mxu1  ;;  %7231 = vmatpush1.msk.msra.mxu0 %vm556_vm5, %v9698_v53 }
0x11fb   :  { %7232 = vmatmul.mubr.msk.f32.vlgmr.msra.gmra.mrb[64].mxu0 %vm2681_vm6, %v9014_v14  ;;  %7233 = vmatprep.subr.msk.mxu0 %vm556_vm5, %v3314_v55 }
0x11fc   :  { %7234 = vmatpush1.msk.msra.mxu0 %vm556_vm5, %v3313_v59  ;;  %3385 = vmatprep.mubr.f32.mxu0 %v9008_v46 }
0x11fd   :  { %3672 = vmatprep.subr.bf16.mxu0 %v8802_v58  ;;  %v7236_v58 = vld [vmem:[%s10603_s2 + $0x1b0] ss:$8 sm:$0x3] }
0x11ff   :  { %7235 = vmatmul.mubr.msk.f32.vlgmr.msra.gmra.mrb[66].mxu0 %vm2681_vm6, %v9014_v14 }
0x1200   :  { %3673 = vmatpush1.bf16.msra.mxu0 %v8800_v61 }
0x1201   :  { %3674 = vmatprep.subr.bf16.mxu0 %v8805_v62 }
0x1204   :  { %3675 = vmatpush1.bf16.msra.mxu0 %v8803_v63 }
0x1205   :  { %3676 = vmatprep.subr.bf16.mxu0 %v8808_v0 }
0x1208   :  { %3677 = vmatpush1.bf16.msra.mxu0 %v8806_v1 }
0x1209   :  { %3678 = vmatprep.subr.bf16.mxu0 %v8811_v2 }
0x120c   :  { %3679 = vmatpush1.bf16.msra.mxu0 %v8809_v4 }
0x120d   :  { %3680 = vmatprep.subr.bf16.mxu0 %v8814_v7 }
0x1210   :  { %3681 = vmatpush1.bf16.msra.mxu0 %v8812_v10  ;;  %v7237_v10 = vld [vmem:[%s10603_s2 + $0x1c0] ss:$8 sm:$0x3] }
0x1211   :  { %3682 = vmatprep.subr.bf16.mxu0 %v8817_v11 }
0x1214   :  { %3683 = vmatpush1.bf16.msra.mxu0 %v8815_v12 }
0x1215   :  { %3684 = vmatprep.subr.bf16.mxu0 %v8820_v15 }
0x1218   :  { %3685 = vmatpush1.bf16.msra.mxu0 %v8818_v16 }
0x1219   :  { %3686 = vmatprep.subr.bf16.mxu0 %v8823_v17 }
0x121c   :  { %3687 = vmatpush1.bf16.msra.mxu0 %v8821_v18 }
0x121d   :  { %3688 = vmatprep.subr.bf16.mxu0 %v8826_v19 }
0x1220   :  { %3689 = vmatpush1.bf16.msra.mxu0 %v8824_v21 }
0x1221   :  { %3690 = vmatprep.subr.bf16.mxu0 %v8829_v23 }
0x1224   :  { %3691 = vmatpush1.bf16.msra.mxu0 %v8827_v25 }
0x1225   :  { %3692 = vmatprep.subr.bf16.mxu0 %v8832_v27 }
0x1228   :  { %3693 = vmatpush1.bf16.msra.mxu0 %v8830_v28 }
0x1229   :  { %3694 = vmatprep.subr.bf16.mxu0 %v8835_v20 }
0x122c   :  { %3695 = vmatpush1.bf16.msra.mxu0 %v8833_v29 }
0x122d   :  { %3696 = vmatprep.subr.bf16.mxu0 %v8838_v30 }
0x1230   :  { %3697 = vmatpush1.bf16.msra.mxu0 %v8836_v31 }
0x1231   :  { %3698 = vmatprep.subr.bf16.mxu0 %v8841_v33  ;;  %v8848_v33 = vld [vmem:[%s10602_s1 + $0x1e0] ss:$8 sps:$4 sm:$0xff]  }
0x1234   :  { %3699 = vmatpush1.bf16.msra.mxu0 %v8839_v9  ;;  %v8849_v9 = vld [vmem:[%s10602_s1 + $0x110] ss:$8 sps:$4 sm:$0xff]  }
0x1235   :  { %3700 = vmatprep.subr.bf16.mxu0 %v8844_v34  ;;  %v8850_v34 = vld [vmem:[%s10602_s1 + $0x1f0] ss:$8 sps:$4 sm:$0xff]  }
0x1238   :  { %3701 = vmatpush1.bf16.msra.mxu0 %v8842_v8  ;;  %v8852_v8 = vld [vmem:[%s10602_s1 + $0x200] ss:$8 sps:$4 sm:$0xff]  }
0x1239   :  { %3702 = vmatprep.subr.bf16.mxu0 %v8847_v35  ;;  %v8853_v35 = vld [vmem:[%s10602_s1 + $0x130] ss:$8 sps:$4 sm:$0xff]  }
0x123c   :  { %3703 = vmatpush1.bf16.msra.mxu0 %v8845_v36  ;;  %v8854_v36 = vld [vmem:[%s10602_s1 + $0x210] ss:$8 sps:$4 sm:$0xff]  }
0x123d   :  { %4190 = vmatprep.subr.bf16.mxu0 %v9013_v24 }
0x12ce   :  { %v3308_v37 = vpop.f32.mrb[64].mxu0 }
0x12cf   :  { %v3310_v38 = vpop.f32.mrb[65].mxu0  ;;  %v3392_v39 = vmul.f32 %v3308_v37, %v3308_v37 }
0x12d0   :  { %v3393_v40 = vmul.f32 %v3310_v38, %v3310_v38 }
0x12d2   :  { %v3387_v41 = vpop.f32.mrb[66].mxu0 }
0x12d3   :  { %v3394_v42 = vsub.f32 %v3387_v41, %v3392_v39  ;;  %v3389_v43 = vpop.f32.mrb[67].mxu0  ;;  %v8857_v39 = vld [vmem:[%s10602_s1 + $0x150] ss:$8 sps:$4 sm:$0xff]   ;;  %v8859_v41 = vld [vmem:[%s10602_s1 + $0x160] ss:$8 sps:$4 sm:$0xff]  }
0x12d4   :  { %v3395_v44 = vsub.f32 %v3389_v43, %v3393_v40  ;;  %v8858_v40 = vld [vmem:[%s10602_s1 + $0x230] ss:$8 sps:$4 sm:$0xff]  }
0x12d5   :  { %v3396_v47 = vmax.f32 %v3394_v42, 0.0  ;;  %v8860_v42 = vld [vmem:[%s10602_s1 + $0x240] ss:$8 sps:$4 sm:$0xff]   ;;  %v8861_v43 = vld [vmem:[%s10602_s1 + $0x170] ss:$8 sps:$4 sm:$0xff]  }
0x12d6   :  { %v3397_v48 = vmax.f32 %v3395_v44, 0.0  ;;  %v8862_v44 = vld [vmem:[%s10602_s1 + $0x250] ss:$8 sps:$4 sm:$0xff]  }
0x12d7   :  { %v3400_v49 = vadd.f32 1e-05, %v3396_v47  ;;  %v8863_v47 = vld [vmem:[%s10602_s1 + $0x180] ss:$8 sps:$4 sm:$0xff]  }
0x12d8   :  { %v3401_v50 = vadd.f32 1e-05, %v3397_v48  ;;  %v8864_v48 = vld [vmem:[%s10602_s1 + $0x260] ss:$8 sps:$4 sm:$0xff]  }
0x12d9   :  { %8954 = vrsqrt.f32 %v3400_v49  ;;  %v8865_v49 = vld [vmem:[%s10602_s1 + $0x190] ss:$8 sps:$4 sm:$0xff]  }
0x12da   :  { %8956 = vrsqrt.f32 %v3401_v50  ;;  %v8866_v50 = vld [vmem:[%s10602_s1 + $0x270] ss:$8 sps:$4 sm:$0xff]  }
0x12e3   :  { %v8955_v51 = vpop.eup %8954 }
0x12e4   :  { %v8957_v52 = vpop.eup %8956 }
0x12e5   :  { %v3406_v55 = vcombine.low %v8955_v51, %v8957_v52  ;;  %v8867_v51 = vld [vmem:[%s10602_s1 + $0x1a0] ss:$8 sps:$4 sm:$0xff]  }
0x12e6   :  { %v8868_v52 = vld [vmem:[%s10602_s1 + $0x280] ss:$8 sps:$4 sm:$0xff]  }
0x12e7   :  { %v3413_v57 = vrot.slane %v3406_v55, %v9660_v3  ;;  %v8869_v55 = vld [vmem:[%s10602_s1 + $0x1b0] ss:$8 sps:$4 sm:$0xff]  }
0x12e9   :  { %v3420_v59 = vrot.slane %v3413_v57, %v9660_v3  ;;  %v8870_v57 = vld [vmem:[%s10602_s1 + $0x290] ss:$8 sps:$4 sm:$0xff]  }
0x12eb   :  { %v3422_v60 = vmul.f32 %v7236_v58, %v3420_v59  ;;  %v8871_v58 = vld [vmem:[%s10602_s1 + $0x1c0] ss:$8 sps:$4 sm:$0xff]  }
0x12ed   :  { %v3427_v61 = vrot.slane %v3422_v60, %v9193_v22  ;;  %v3431_v62 = vrot.slane %v3422_v60, %v9668_v13 }
0x12ef   :  { %v3435_v63 = vmul.f32 %v3431_v62, %v9700_v54  ;;  %v3438_v0 = vmul.f32 %v3427_v61, %v3308_v37  ;;  %v3439_v1 = vmul.f32 %v3431_v62, %v3310_v38  ;;  %v3434_v2 = vmul.f32 %v3427_v61, %v9698_v53  ;;  %v8855_v37 = vld [vmem:[%s10602_s1 + $0x140] ss:$8 sps:$4 sm:$0xff]  }
0x12f0   :  { %v8856_v38 = vld [vmem:[%s10602_s1 + $0x220] ss:$8 sps:$4 sm:$0xff]  }
0x12f1   :  { %v3442_v4 = vcombine.low %v3438_v0, %v3439_v1 }
0x12f3   :  { %v3449_v7 = vrot.slane %v3442_v4, %v9660_v3 }
0x12f5   :  { %v3456_v11 = vrot.slane %v3449_v7, %v9660_v3 }
0x12f7   :  { %v3458_v12 = vsub.f32 %v7237_v10, %v3456_v11 }
0x12f9   :  { %v3467_v15 = vrot.slane %v3458_v12, %v9668_v13  ;;  %v3463_v16 = vrot.slane %v3458_v12, %v9193_v22 }
0x12fb   :  { %v3471_v17 = vadd.f32 %v3467_v15, %v3435_v63  ;;  %v3470_v54 = vadd.f32 %v3463_v16, %v3434_v2 }
0x12fd   :  { %vm3473_vm0 = vcmp.ge.f32.partialorder %v3471_v17, 0.0  ;;  %v3475_v18 = vmul.f32 0.01, %v3471_v17  ;;  %vm3472_vm2 = vcmp.ge.f32.partialorder %v3470_v54, 0.0  ;;  %v3474_v53 = vmul.f32 0.01, %v3470_v54 }
0x12ff   :  { %v3477_v19 = vsel %vm3473_vm0, %v3471_v17, %v3475_v18  ;;  %v3476_v21 = vsel %vm3472_vm2, %v3470_v54, %v3474_v53  ;;  %v7276_v54 = vld [vmem:[%s10603_s2 + $0x1d0] ss:$8 sm:$0x3]  ;;  %vm4234_vm0 = vcmask 1040384  }
0x1300   :  { %v3479_v23 = vpack.c.bf16 %v3477_v19, %v3477_v19  ;;  %v3478_v25 = vpack.c.bf16 %v3476_v21, %v3476_v21 }
0x1302   :  { %3704 = vmatprep.mubr.bf16.mxu0 %v3479_v23 }
0x1303   :  { %3705 = vmatmul.mubr.bf16.vlgmr.msra.gmra.mrb[68].mxu0 %v3478_v25 }
0x1304   :  { %4191 = vmatpush1.bf16.msra.mxu0 %v8848_v33  ;;  %v7277_v33 = vld [vmem:[%s10603_s2 + $0x1e0] ss:$8 sm:$0x3] }
0x1305   :  { %4192 = vmatprep.subr.bf16.mxu0 %v9013_v24 }
0x1308   :  { %4193 = vmatpush1.bf16.msra.mxu0 %v8850_v34 }
0x1309   :  { %4194 = vmatprep.subr.bf16.mxu0 %v9013_v24 }
0x130c   :  { %4195 = vmatpush1.bf16.msra.mxu0 %v8852_v8 }
0x130d   :  { %4196 = vmatprep.subr.bf16.mxu0 %v9013_v24 }
0x1310   :  { %4197 = vmatpush1.bf16.msra.mxu0 %v8854_v36 }
0x1311   :  { %4198 = vmatprep.subr.bf16.mxu0 %v9013_v24 }
0x1314   :  { %4199 = vmatpush1.bf16.msra.mxu0 %v8856_v38  ;;  %v8875_v38 = vld [vmem:[%s10602_s1 + $0x3b0] ss:$8 sps:$4 sm:$0xff]  }
0x1315   :  { %4200 = vmatprep.subr.bf16.mxu0 %v9013_v24 }
0x1318   :  { %4201 = vmatpush1.bf16.msra.mxu0 %v8858_v40  ;;  %v8877_v40 = vld [vmem:[%s10602_s1 + $0x3d0] ss:$8 sps:$4 sm:$0xff]  }
0x1319   :  { %4202 = vmatprep.subr.bf16.mxu0 %v9013_v24 }
0x131c   :  { %4203 = vmatpush1.bf16.msra.mxu0 %v8860_v42  ;;  %v8879_v42 = vld [vmem:[%s10602_s1 + $0x3f0] ss:$8 sps:$4 sm:$0xff]  }
0x131d   :  { %4204 = vmatprep.subr.bf16.mxu0 %v9013_v24 }
0x1320   :  { %4205 = vmatpush1.bf16.msra.mxu0 %v8862_v44  ;;  %v8881_v44 = vld [vmem:[%s10602_s1 + $0x410] ss:$8 sps:$4 sm:$0xff]  }
0x1321   :  { %4206 = vmatprep.subr.bf16.mxu0 %v9013_v24 }
0x1324   :  { %4207 = vmatpush1.bf16.msra.mxu0 %v8864_v48  ;;  %v8883_v48 = vld [vmem:[%s10602_s1 + $0x430] ss:$8 sps:$4 sm:$0xff]  }
0x1325   :  { %4208 = vmatprep.subr.bf16.mxu0 %v9013_v24 }
0x1328   :  { %4209 = vmatpush1.bf16.msra.mxu0 %v8866_v50 }
0x1329   :  { %4210 = vmatprep.subr.bf16.mxu0 %v9013_v24 }
0x132c   :  { %4211 = vmatpush1.bf16.msra.mxu0 %v8868_v52 }
0x132d   :  { %4212 = vmatprep.subr.bf16.mxu0 %v9013_v24 }
0x1330   :  { %4213 = vmatpush1.bf16.msra.mxu0 %v8870_v57 }
0x1331   :  { %4513 = vmatprep.subr.bf16.mxu0 %v9013_v24 }
0x13d6   :  { %v9830_v27 = vpop.f32.mrb[68].mxu0 }
0x13d7   :  { %v9832_v28 = vpop.f32.mrb[69].mxu0  ;;  %v3790_v30 = vmul.f32 %v9830_v27, %v9830_v27 }
0x13d8   :  { %v3791_v20 = vmul.f32 %v9832_v28, %v9832_v28  ;;  %v3710_v29 = vpop.f32.mrb[70].mxu0  ;;  %7270 = vmatprep.subr.msk.mxu1 %vm556_vm5, %v9832_v28 }
0x13d9   :  { %v3711_v31 = vpop.f32.mrb[71].mxu0  ;;  %7271 = vmatpush1.msk.msra.mxu1 %vm556_vm5, %v9830_v27 }
0x13da   :  { %7272 = vmatmul.mubr.msk.f32.vlgmr.msra.gmra.mrb[40].mxu1 %vm2681_vm6, %v9014_v14  ;;  %7273 = vmatprep.subr.msk.mxu1 %vm556_vm5, %v3791_v20 }
0x13db   :  { %7274 = vmatpush1.msk.msra.mxu1 %vm556_vm5, %v3790_v30  ;;  %3862 = vmatprep.mubr.f32.mxu1 %v9008_v46  ;;  %vm4048_vm5 = vcmask 523264  }
0x13dc   :  { %4052 = vmatprep.subr.bf16.mxu1 %v9013_v24 }
0x13de   :  { %7275 = vmatmul.mubr.msk.f32.vlgmr.msra.gmra.mrb[42].mxu1 %vm2681_vm6, %v9014_v14  ;;  %v8851_v14 = vld [vmem:[%s10602_s1 + $0x120] ss:$8 sps:$4 sm:$0xff]  }
0x13df   :  { %4053 = vmatpush1.bf16.msra.mxu1 %v8849_v9 }
0x13e0   :  { %4054 = vmatprep.subr.bf16.mxu1 %v9013_v24 }
0x13e3   :  { %4055 = vmatpush1.bf16.msra.mxu1 %v8851_v14 }
0x13e4   :  { %4056 = vmatprep.subr.bf16.mxu1 %v9013_v24 }
0x13e7   :  { %4057 = vmatpush1.bf16.msra.mxu1 %v8853_v35 }
0x13e8   :  { %4058 = vmatprep.subr.bf16.mxu1 %v9013_v24 }
0x13eb   :  { %4059 = vmatpush1.bf16.msra.mxu1 %v8855_v37  ;;  %v8872_v37 = vld [vmem:[%s10602_s1 + $0x380] ss:$8 sps:$4 sm:$0xff]  }
0x13ec   :  { %4060 = vmatprep.subr.bf16.mxu1 %v9013_v24 }
0x13ef   :  { %4061 = vmatpush1.bf16.msra.mxu1 %v8857_v39  ;;  %v8876_v39 = vld [vmem:[%s10602_s1 + $0x3c0] ss:$8 sps:$4 sm:$0xff]  }
0x13f0   :  { %4062 = vmatprep.subr.bf16.mxu1 %v9013_v24 }
0x13f3   :  { %4063 = vmatpush1.bf16.msra.mxu1 %v8859_v41  ;;  %v8878_v41 = vld [vmem:[%s10602_s1 + $0x3e0] ss:$8 sps:$4 sm:$0xff]  }
0x13f4   :  { %4064 = vmatprep.subr.bf16.mxu1 %v9013_v24 }
0x13f7   :  { %4065 = vmatpush1.bf16.msra.mxu1 %v8861_v43  ;;  %v8880_v43 = vld [vmem:[%s10602_s1 + $0x400] ss:$8 sps:$4 sm:$0xff]  }
0x13f8   :  { %4066 = vmatprep.subr.bf16.mxu1 %v9013_v24 }
0x13fb   :  { %4067 = vmatpush1.bf16.msra.mxu1 %v8863_v47  ;;  %v8882_v47 = vld [vmem:[%s10602_s1 + $0x420] ss:$8 sps:$4 sm:$0xff]  }
0x13fc   :  { %4068 = vmatprep.subr.bf16.mxu1 %v9013_v24 }
0x13ff   :  { %4069 = vmatpush1.bf16.msra.mxu1 %v8865_v49 }
0x1400   :  { %4070 = vmatprep.subr.bf16.mxu1 %v9013_v24 }
0x1403   :  { %4071 = vmatpush1.bf16.msra.mxu1 %v8867_v51 }
0x1404   :  { %4072 = vmatprep.subr.bf16.mxu1 %v9013_v24 }
0x1407   :  { %4073 = vmatpush1.bf16.msra.mxu1 %v8869_v55 }
0x1408   :  { %4074 = vmatprep.subr.bf16.mxu1 %v9013_v24 }
0x140b   :  { %4075 = vmatpush1.bf16.msra.mxu1 %v8871_v58 }
0x140c   :  { %8070 = vmatprep.subr.bf16.mxu1 %v9008_v46 }
0x14ad   :  { %v3785_v59 = vpop.f32.mrb[40].mxu1 }
0x14ae   :  { %v3787_v60 = vpop.f32.mrb[41].mxu1  ;;  %v3869_v61 = vmul.f32 %v3785_v59, %v3785_v59 }
0x14af   :  { %v3870_v62 = vmul.f32 %v3787_v60, %v3787_v60 }
0x14b1   :  { %v3864_v63 = vpop.f32.mrb[42].mxu1 }
0x14b2   :  { %v3871_v0 = vsub.f32 %v3864_v63, %v3869_v61  ;;  %v3866_v1 = vpop.f32.mrb[43].mxu1  ;;  %v8884_v63 = vld [vmem:[%s10602_s1 + $0x2b0] ss:$8 sps:$4 sm:$0xff]  }
0x14b3   :  { %v3872_v2 = vsub.f32 %v3866_v1, %v3870_v62  ;;  %v4093_v62 = vld [vmem:[%s10602_s1 + $0x1d0] sm:$0xf] }
0x14b4   :  { %v3873_v4 = vmax.f32 %v3871_v0, 0.0  ;;  %v8885_v0 = vld [vmem:[%s10602_s1 + $0x2c0] ss:$8 sps:$4 sm:$0xff]   ;;  %v8886_v1 = vld [vmem:[%s10602_s1 + $0x2d0] ss:$8 sps:$4 sm:$0xff]  }
0x14b5   :  { %v3874_v7 = vmax.f32 %v3872_v2, 0.0  ;;  %v8887_v2 = vld [vmem:[%s10602_s1 + $0x2e0] ss:$8 sps:$4 sm:$0xff]  }
0x14b6   :  { %v3877_v10 = vadd.f32 1e-05, %v3873_v4  ;;  %v8888_v4 = vld [vmem:[%s10602_s1 + $0x2f0] ss:$8 sps:$4 sm:$0xff]  }
0x14b7   :  { %v3878_v11 = vadd.f32 1e-05, %v3874_v7  ;;  %v8889_v7 = vld [vmem:[%s10602_s1 + $0x300] ss:$8 sps:$4 sm:$0xff]  }
0x14b8   :  { %8958 = vrsqrt.f32 %v3877_v10  ;;  %v8890_v10 = vld [vmem:[%s10602_s1 + $0x310] ss:$8 sps:$4 sm:$0xff]  }
0x14b9   :  { %8960 = vrsqrt.f32 %v3878_v11  ;;  %v8891_v11 = vld [vmem:[%s10602_s1 + $0x320] ss:$8 sps:$4 sm:$0xff]  }
0x14c2   :  { %v8959_v12 = vpop.eup %8958 }
0x14c3   :  { %v8961_v15 = vpop.eup %8960 }
0x14c4   :  { %v3883_v16 = vcombine.low %v8959_v12, %v8961_v15  ;;  %v8892_v12 = vld [vmem:[%s10602_s1 + $0x330] ss:$8 sps:$4 sm:$0xff]   ;;  %v8893_v15 = vld [vmem:[%s10602_s1 + $0x340] ss:$8 sps:$4 sm:$0xff]  }
0x14c6   :  { %v3890_v17 = vrot.slane %v3883_v16, %v9660_v3  ;;  %v8894_v16 = vld [vmem:[%s10602_s1 + $0x350] ss:$8 sps:$4 sm:$0xff]  }
0x14c8   :  { %v3897_v18 = vrot.slane %v3890_v17, %v9660_v3 }
0x14ca   :  { %v3899_v53 = vmul.f32 %v7276_v54, %v3897_v18  ;;  %v8895_v54 = vld [vmem:[%s10602_s1 + $0x360] ss:$8 sps:$4 sm:$0xff]  }
0x14cc   :  { %v3904_v19 = vrot.slane %v3899_v53, %v9193_v22  ;;  %v3908_v21 = vrot.slane %v3899_v53, %v9668_v13 }
0x14ce   :  { %v3912_v23 = vmul.f32 %v3908_v21, %v9832_v28  ;;  %v3915_v25 = vmul.f32 %v3904_v19, %v3785_v59  ;;  %v3916_v20 = vmul.f32 %v3908_v21, %v3787_v60  ;;  %v3911_v29 = vmul.f32 %v3904_v19, %v9830_v27 }
0x14d0   :  { %v3919_v30 = vcombine.low %v3915_v25, %v3916_v20 }
0x14d2   :  { %v3926_v31 = vrot.slane %v3919_v30, %v9660_v3  ;;  %v8896_v30 = vld [vmem:[%s10602_s1 + $0x960] ss:$8 sps:$4 sm:$0xff]  }
0x14d4   :  { %v3933_v9 = vrot.slane %v3926_v31, %v9660_v3  ;;  %v8873_v3 = vld [vmem:[%s10602_s1 + $0x390] ss:$8 sps:$4 sm:$0xff]  }
0x14d5   :  { %v8898_v31 = vld [vmem:[%s10602_s1 + $0x970] ss:$8 sps:$4 sm:$0xff]  }
0x14d6   :  { %v3935_v34 = vsub.f32 %v7277_v33, %v3933_v9  ;;  %v8900_v33 = vld [vmem:[%s10602_s1 + $0x980] ss:$8 sps:$4 sm:$0xff]  }
0x14d8   :  { %v3944_v14 = vrot.slane %v3935_v34, %v9668_v13  ;;  %v3940_v8 = vrot.slane %v3935_v34, %v9193_v22  ;;  %v8874_v13 = vld [vmem:[%s10602_s1 + $0x3a0] ss:$8 sps:$4 sm:$0xff]  }
0x14da   :  { %v3948_v35 = vadd.f32 %v3944_v14, %v3912_v23  ;;  %v3947_v28 = vadd.f32 %v3940_v8, %v3911_v29  ;;  %v3951_v29 = vld [vmem:[%s10602_s1 + $0x100] sm:$0xf] }
0x14dc   :  { %v9962_v36 = vpack.c.bf16 %v3948_v35, %v3948_v35  ;;  %v9964_v27 = vpack.c.bf16 %v3947_v28, %v3947_v28 }
0x14de   :  { %7290 = vmatprep.mubr.msk.bf16.mxu1 %vm4048_vm5, %v9962_v36  ;;  %7303 = vmatprep.mubr.msk.bf16.mxu0 %vm4048_vm5, %v9962_v36 }
0x14df   :  { %4085 = vmatmul.mubr.bf16.vlgmr.msra.gmra.mrb[44].mxu1 %v9964_v27  ;;  %4223 = vmatmul.mubr.bf16.vlgmr.msra.gmra.mrb[72].mxu0 %v9964_v27 }
0x14e0   :  { %4514 = vmatpush1.bf16.msra.mxu0 %v8872_v37  ;;  %7330 = vmatprep.mubr.msk.bf16.mxu0 %vm4048_vm5, %v9962_v36  ;;  %v8899_v37 = vld [vmem:[%s10602_s1 + $0x940] ss:$8 sps:$4 sm:$0xff]  }
0x14e1   :  { %4515 = vmatprep.subr.bf16.mxu0 %v9013_v24  ;;  %8072 = vmatprep.mubr.msk.bf16.mxu1 %vm9007_vm4, %v9008_v46 }
0x14e4   :  { %4516 = vmatpush1.bf16.msra.mxu0 %v8873_v3  ;;  %v8901_v3 = vld [vmem:[%s10602_s1 + $0x950] ss:$8 sps:$4 sm:$0xff]  }
0x14e5   :  { %4517 = vmatprep.subr.bf16.mxu0 %v9013_v24 }
0x14e8   :  { %4518 = vmatpush1.bf16.msra.mxu0 %v8874_v13 }
0x14e9   :  { %4519 = vmatprep.subr.bf16.mxu0 %v9013_v24 }
0x14ec   :  { %4520 = vmatpush1.bf16.msra.mxu0 %v8875_v38  ;;  %v8902_v38 = vld [vmem:[%s10602_s1 + $0x990] ss:$8 sps:$4 sm:$0xff]  }
0x14ed   :  { %4521 = vmatprep.subr.bf16.mxu0 %v9013_v24 }
0x14f0   :  { %4522 = vmatpush1.bf16.msra.mxu0 %v8876_v39 }
0x14f1   :  { %4523 = vmatprep.subr.bf16.mxu0 %v9013_v24 }
0x14f4   :  { %4524 = vmatpush1.bf16.msra.mxu0 %v8877_v40 }
0x14f5   :  { %4525 = vmatprep.subr.bf16.mxu0 %v9013_v24 }
0x14f8   :  { %4526 = vmatpush1.bf16.msra.mxu0 %v8878_v41 }
0x14f9   :  { %4527 = vmatprep.subr.bf16.mxu0 %v9013_v24 }
0x14fc   :  { %4528 = vmatpush1.bf16.msra.mxu0 %v8879_v42 }
0x14fd   :  { %4529 = vmatprep.subr.bf16.mxu0 %v9013_v24 }
0x1500   :  { %4530 = vmatpush1.bf16.msra.mxu0 %v8880_v43  ;;  %v8903_v43 = vld [vmem:[%s10602_s1 + $0x9a0] ss:$8 sps:$4 sm:$0xff]  }
0x1501   :  { %4531 = vmatprep.subr.bf16.mxu0 %v9013_v24 }
0x1504   :  { %4532 = vmatpush1.bf16.msra.mxu0 %v8881_v44  ;;  %v8904_v44 = vld [vmem:[%s10602_s1 + $0x9b0] ss:$8 sps:$4 sm:$0xff]  }
0x1505   :  { %4533 = vmatprep.subr.bf16.mxu0 %v9013_v24 }
0x1508   :  { %4534 = vmatpush1.bf16.msra.mxu0 %v8882_v47 }
0x1509   :  { %4535 = vmatprep.subr.bf16.mxu0 %v9013_v24 }
0x150c   :  { %4536 = vmatpush1.bf16.msra.mxu0 %v8883_v48 }
0x150d   :  { %8104 = vmatprep.subr.bf16.mxu0 %v9008_v46 }
0x150f   :  { %4546 = vmatmul.mubr.bf16.vlgmr.msra.gmra.mrb[76].mxu0 %v9964_v27 }
0x1510   :  { %8110 = vmatprep.mubr.msk.bf16.mxu0 %vm9007_vm4, %v9008_v46  ;;  %8105 = vmatpush3.bf16.msra.mxu0 %v8896_v30  ;;  %v5061_v30 = vld [vmem:[%s10603_s2 + $0x240] sm:$0x3] }
0x1511   :  { %8106 = vmatprep.subr.bf16.mxu0 %v9008_v46 }
0x1514   :  { %8107 = vmatpush3.bf16.msra.mxu0 %v8898_v31  ;;  %v8499_v31 = vpack.c.bf16 %v5061_v30, %v5060_v26 }
0x1515   :  { %8108 = vmatprep.subr.bf16.mxu0 %v9008_v46 }
0x1518   :  { %8109 = vmatpush3.bf16.msra.mxu0 %v8900_v33 }
0x1519   :  { %8120 = vmatprep.subr.bf16.mxu0 %v9008_v46 }
0x15b2   :  { %v10027_v49 = vpop.f32.mrb[44].mxu1  ;;  %v4224_v50 = vpop.f32.mrb[72].mxu0 }
0x15b3   :  { %v4230_v51 = vpack.c.bf16 %v4224_v50, %v4224_v50  ;;  %v4088_v52 = vpop.f32.mrb[45].mxu1  ;;  %v4226_v55 = vpop.f32.mrb[73].mxu0  ;;  %v4092_v25 = vpack.c.bf16 %v10027_v49, %v10027_v49 }
0x15b4   :  { %v4089_v57 = vpop.f32.mrb[46].mxu1  ;;  %v4227_v58 = vpop.f32.mrb[74].mxu0 }
0x15b5   :  { %v4236_v59 = vsel %vm4234_vm0, %v4230_v51, 0  ;;  %v4090_v60 = vpop.f32.mrb[47].mxu1  ;;  %v4228_v61 = vpop.f32.mrb[75].mxu0  ;;  %v4604_v20 = vsel %vm4234_vm0, %v4092_v25, 0 }
0x15b6   :  { %8071 = vmatpush3.bf16.msra.mxu1 %v4236_v59  ;;  %v8905_v60 = vld [vmem:[%s10602_s1 + $0x910] ss:$8 sps:$4 sm:$0x7f]  }
0x15b7   :  { %4375 = vmatprep.subr.bf16.mxu1 %v9013_v24 }
0x15b9   :  { %8073 = vmatmul.mubr.msk.bf16.vlgmr.msra.gmra.mrb[48].mxu1 %vm2681_vm6, %v4093_v62 }
0x15ba   :  { %4376 = vmatpush1.bf16.msra.mxu1 %v8884_v63  ;;  %7317 = vmatprep.mubr.msk.bf16.mxu1 %vm4048_vm5, %v9962_v36  ;;  %v4278_v36 = vld [vmem:[%s10602_s1 + $0x2a0] sm:$0xf] }
0x15bb   :  { %4377 = vmatprep.subr.bf16.mxu1 %v9013_v24 }
0x15be   :  { %4378 = vmatpush1.bf16.msra.mxu1 %v8885_v0 }
0x15bf   :  { %4379 = vmatprep.subr.bf16.mxu1 %v9013_v24 }
0x15c2   :  { %4380 = vmatpush1.bf16.msra.mxu1 %v8886_v1 }
0x15c3   :  { %4381 = vmatprep.subr.bf16.mxu1 %v9013_v24 }
0x15c6   :  { %4382 = vmatpush1.bf16.msra.mxu1 %v8887_v2 }
0x15c7   :  { %4383 = vmatprep.subr.bf16.mxu1 %v9013_v24 }
0x15ca   :  { %4384 = vmatpush1.bf16.msra.mxu1 %v8888_v4 }
0x15cb   :  { %4385 = vmatprep.subr.bf16.mxu1 %v9013_v24 }
0x15ce   :  { %4386 = vmatpush1.bf16.msra.mxu1 %v8889_v7  ;;  %v8906_v7 = vld [vmem:[%s10602_s1 + $0x920] ss:$8 sps:$4 sm:$0x7f]  }
0x15cf   :  { %4387 = vmatprep.subr.bf16.mxu1 %v9013_v24 }
0x15d2   :  { %4388 = vmatpush1.bf16.msra.mxu1 %v8890_v10 }
0x15d3   :  { %4389 = vmatprep.subr.bf16.mxu1 %v9013_v24 }
0x15d6   :  { %4390 = vmatpush1.bf16.msra.mxu1 %v8891_v11  ;;  %v8907_v11 = vld [vmem:[%s10602_s1 + $0x900] ss:$8 sps:$4 sm:$0x7f]  }
0x15d7   :  { %4391 = vmatprep.subr.bf16.mxu1 %v9013_v24 }
0x15da   :  { %4392 = vmatpush1.bf16.msra.mxu1 %v8892_v12 }
0x15db   :  { %4393 = vmatprep.subr.bf16.mxu1 %v9013_v24 }
0x15de   :  { %4394 = vmatpush1.bf16.msra.mxu1 %v8893_v15 }
0x15df   :  { %4395 = vmatprep.subr.bf16.mxu1 %v9013_v24 }
0x15e2   :  { %v4547_v17 = vpop.f32.mrb[76].mxu0  ;;  %4396 = vmatpush1.bf16.msra.mxu1 %v8894_v16 }
0x15e3   :  { %v4549_v18 = vpop.f32.mrb[77].mxu0  ;;  %4397 = vmatprep.subr.bf16.mxu1 %v9013_v24  ;;  %v4553_v19 = vpack.c.bf16 %v4547_v17, %v4547_v17  ;;  %v4416_v24 = vld [vmem:[%s10602_s1 + $0x370] sm:$0xf] }
0x15e4   :  { %v4550_v53 = vpop.f32.mrb[78].mxu0  ;;  %v5056_v17 = vld [vmem:[%s10603_s2 + $0x1f0] sm:$0xff] }
0x15e5   :  { %v4551_v21 = vpop.f32.mrb[79].mxu0  ;;  %v4558_v23 = vsel %vm4234_vm0, %v4553_v19, 0 }
0x15e6   :  { %4398 = vmatpush1.bf16.msra.mxu1 %v8895_v54  ;;  %v5057_v54 = vld [vmem:[%s10603_s2 + $0x200] sm:$0xff] }
0x15e7   :  { %8076 = vmatprep.subr.bf16.mxu1 %v9008_v46  ;;  %v8493_v25 = vpack.c.bf16 %v5057_v54, %v5056_v17 }
0x15e9   :  { %4408 = vmatmul.mubr.bf16.vlgmr.msra.gmra.mrb[52].mxu1 %v9964_v27  ;;  %v8897_v27 = vld [vmem:[%s10602_s1 + $0x930] ss:$8 sps:$4 sm:$0xff]  }
0x15ea   :  { %8077 = vmatpush3.bf16.msra.mxu1 %v4558_v23  ;;  %8078 = vmatprep.mubr.msk.bf16.mxu1 %vm9007_vm4, %v9008_v46 }
0x15eb   :  { %8082 = vmatprep.subr.bf16.mxu1 %v9008_v46 }
0x15f1   :  { %8079 = vmatmul.mubr.msk.bf16.vlgmr.msra.gmra.mrb[48].mxu1 %vm2681_vm6, %v4416_v24  ;;  %v5058_v24 = vld [vmem:[%s10603_s2 + $0x210] sm:$0xff] }
0x15f2   :  { %8083 = vmatpush3.bf16.msra.mxu1 %v4604_v20  ;;  %8084 = vmatprep.mubr.msk.bf16.mxu1 %vm9007_vm4, %v9008_v46  ;;  %v5059_v20 = vld [vmem:[%s10603_s2 + $0x220] sm:$0xff] }
0x15f3   :  { %8088 = vmatprep.subr.bf16.mxu1 %v9008_v46 }
0x15fd   :  { %8085 = vmatmul.mubr.msk.bf16.vlgmr.msra.gmra.mrb[48].mxu1 %vm2681_vm6, %v3951_v29  ;;  %v8496_v29 = vpack.c.bf16 %v5059_v20, %v5058_v24  ;;  %v8918_v24 = vld [vmem:[%s10602_s1 + $0xaa0] ss:$8 sps:$4 sm:$0x1f]  }
0x15fe   :  { %8090 = vmatprep.mubr.msk.bf16.mxu1 %vm9007_vm4, %v9008_v46  ;;  %v5631_v20 = vsel %vm947_vm10, %v8918_v24, 0 }
0x16bc   :  { %v4409_v9 = vpop.f32.mrb[52].mxu1 }
0x16bd   :  { %v4415_v34 = vpack.c.bf16 %v4409_v9, %v4409_v9  ;;  %v4411_v14 = vpop.f32.mrb[53].mxu1 }
0x16be   :  { %v4412_v8 = vpop.f32.mrb[54].mxu1  ;;  %v8908_v14 = vld [vmem:[%s10602_s1 + $0xa20] ss:$8 sps:$4 sm:$0xff]  }
0x16bf   :  { %v4650_v35 = vsel %vm4234_vm0, %v4415_v34, 0  ;;  %v4413_v28 = vpop.f32.mrb[55].mxu1  ;;  %v8909_v8 = vld [vmem:[%s10602_s1 + $0xa50] ss:$8 sps:$4 sm:$0xff]   ;;  %vm10619_vm0 = vcmask 457728  }
0x16c0   :  { %8089 = vmatpush3.bf16.msra.mxu1 %v4650_v35  ;;  %v8910_v35 = vld [vmem:[%s10602_s1 + $0xa30] ss:$8 sps:$4 sm:$0xff]   ;;  %v8911_v28 = vld [vmem:[%s10602_s1 + $0xa60] ss:$8 sps:$4 sm:$0xff]  }
0x16c1   :  { %8094 = vmatprep.subr.bf16.mxu1 %v9008_v46 }
0x16c3   :  { %8091 = vmatmul.mubr.msk.bf16.vlgmr.msra.gmra.mrb[48].mxu1 %vm2681_vm6, %v4278_v36  ;;  %v8912_v36 = vld [vmem:[%s10602_s1 + $0xa40] ss:$8 sps:$4 sm:$0x1f]  }
0x16c4   :  { %8095 = vmatpush3.bf16.msra.mxu1 %v8897_v27  ;;  %8100 = vmatprep.mubr.msk.bf16.mxu1 %vm9007_vm4, %v9008_v46  ;;  %v8913_v27 = vld [vmem:[%s10602_s1 + $0xa70] ss:$8 sps:$4 sm:$0x1f]  }
0x16c5   :  { %8096 = vmatprep.subr.bf16.mxu1 %v9008_v46 }
0x16c8   :  { %8097 = vmatpush3.bf16.msra.mxu1 %v8899_v37  ;;  %v5419_v37 = vsel %vm947_vm10, %v8912_v36, 0  ;;  %v5816_v36 = vld [vmem:[%s10603_s2 + $0x280] sm:$0xff] }
0x16c9   :  { %8098 = vmatprep.subr.bf16.mxu1 %v9008_v46 }
0x16cc   :  { %8099 = vmatpush3.bf16.msra.mxu1 %v8901_v3  ;;  %v5491_v3 = vsel %vm947_vm10, %v8913_v27, 0 }
0x16cd   :  { %8114 = vmatprep.subr.bf16.mxu1 %v9008_v46 }
0x1796   :  { %v4686_v13 = vpop.f32.mrb[48].mxu1 }
0x1797   :  { %v4693_v39 = vpack.c.bf16 %v4686_v13, %v4686_v13  ;;  %v8092_v40 = vpop.f32.mrb[49].mxu1 }
0x1798   :  { %v4689_v41 = vpop.f32.mrb[50].mxu1 }
0x1799   :  { %v8093_v42 = vpop.f32.mrb[51].mxu1  ;;  %8101 = vmatmul.mubr.msk.bf16.vlgmr.msra.gmra.mrb[56].mxu1 %vm1937_vm15, %v4693_v39  ;;  %8111 = vmatmul.mubr.msk.bf16.vlgmr.msra.gmra.mrb[80].mxu0 %vm1937_vm15, %v4693_v39 }
0x179a   :  { %8121 = vmatpush3.bf16.msra.mxu0 %v8902_v38  ;;  %8126 = vmatprep.mubr.msk.bf16.mxu0 %vm9007_vm4, %v9008_v46 }
0x179b   :  { %8122 = vmatprep.subr.bf16.mxu0 %v9008_v46  ;;  %8116 = vmatprep.mubr.msk.bf16.mxu1 %vm9007_vm4, %v9008_v46 }
0x179e   :  { %8123 = vmatpush3.bf16.msra.mxu0 %v8903_v43 }
0x179f   :  { %8124 = vmatprep.subr.bf16.mxu0 %v9008_v46 }
0x17a2   :  { %8125 = vmatpush3.bf16.msra.mxu0 %v8904_v44 }
0x17a3   :  { %8488 = vmatprep.subr.bf16.mxu0 %v9006_v45 }
0x17a5   :  { %8127 = vmatmul.mubr.msk.bf16.vlgmr.msra.gmra.mrb[84].mxu0 %vm1937_vm15, %v4693_v39 }
0x17a6   :  { %8146 = vmatprep.mubr.msk.f32.mxu0 %vm9007_vm4, %v9008_v46 }
0x186c   :  { %v4757_v47 = vpop.f32.mrb[56].mxu1  ;;  %v4824_v48 = vpop.f32.mrb[80].mxu0 }
0x186d   :  { %v4830_v49 = vpack.c.bf16 %v4824_v48, %v4824_v48  ;;  %v8102_v50 = vpop.f32.mrb[57].mxu1  ;;  %v8112_v51 = vpop.f32.mrb[81].mxu0  ;;  %v4763_v1 = vpack.c.bf16 %v4757_v47, %v4757_v47  ;;  %v5362_v47 = vld [vmem:[%s10603_s2 + $0x250] ss:$0 sm:$0xff] }
0x186e   :  { %v4760_v52 = vpop.f32.mrb[58].mxu1  ;;  %v4827_v55 = vpop.f32.mrb[82].mxu0  ;;  %v5372_v50 = vld [vmem:[%s10603_s2 + $0x260] ss:$0 sm:$0xff] }
0x186f   :  { %v4840_v57 = vsel %vm48_vm1, %v4830_v49, 0  ;;  %v8103_v58 = vpop.f32.mrb[59].mxu1  ;;  %v8113_v59 = vpop.f32.mrb[83].mxu0  ;;  %v5011_v10 = vsel %vm48_vm1, %v4763_v1, 0 }
0x1870   :  { %8115 = vmatpush3.bf16.msra.mxu1 %v4840_v57 }
0x1871   :  { %8130 = vmatprep.subr.bf16.mxu1 %v9008_v46 }
0x1873   :  { %8117 = vmatmul.mubr.msk.bf16.vlgmr.msra.gmra.mrb[60].mxu1 %vm1863_vm14, %v8905_v60 }
0x1874   :  { %8132 = vmatprep.mubr.msk.bf16.mxu1 %vm9007_vm4, %v9008_v46 }
0x1878   :  { %v4943_v61 = vpop.f32.mrb[84].mxu0 }
0x1879   :  { %v4949_v62 = vpack.c.bf16 %v4943_v61, %v4943_v61  ;;  %v8128_v63 = vpop.f32.mrb[85].mxu0 }
0x187a   :  { %v4946_v0 = vpop.f32.mrb[86].mxu0 }
0x187b   :  { %v4959_v2 = vsel %vm48_vm1, %v4949_v62, 0  ;;  %v8129_v4 = vpop.f32.mrb[87].mxu0 }
0x187c   :  { %8131 = vmatpush3.bf16.msra.mxu1 %v4959_v2  ;;  %v8914_v4 = vld [vmem:[%s10602_s1 + $0x9e0] ss:$8 sps:$4 sm:$0xff]  }
0x187d   :  { %8136 = vmatprep.subr.bf16.mxu1 %v9008_v46 }
0x187f   :  { %8133 = vmatmul.mubr.msk.bf16.vlgmr.msra.gmra.mrb[60].mxu1 %vm1863_vm14, %v8906_v7 }
0x1880   :  { %8137 = vmatpush3.bf16.msra.mxu1 %v5011_v10  ;;  %8138 = vmatprep.mubr.msk.bf16.mxu1 %vm9007_vm4, %v9008_v46 }
0x1881   :  { %8502 = vmatprep.subr.bf16.mxu1 %v9006_v45 }
0x188b   :  { %8139 = vmatmul.mubr.msk.bf16.vlgmr.msra.gmra.mrb[60].mxu1 %vm1863_vm14, %v8907_v11 }
0x188c   :  { %8168 = vmatprep.mubr.msk.f32.mxu1 %vm9007_vm4, %v9008_v46 }
0x195e   :  { %v10183_v12 = vpop.f32.mrb[60].mxu1 }
0x195f   :  { %v8140_v15 = vpop.f32.mrb[61].mxu1  ;;  %v5211_v18 = vmul.f32 %v10183_v12, %v10183_v12 }
0x1960   :  { %v10185_v16 = vpop.f32.mrb[62].mxu1 }
0x1961   :  { %v8489_v53 = vpack.c.bf16 %v10185_v16, %v10183_v12  ;;  %v5212_v19 = vmul.f32 %v10185_v16, %v10185_v16  ;;  %v8141_v21 = vpop.f32.mrb[63].mxu1 }
0x1962   :  { %v8915_v21 = vld [vmem:[%s10602_s1 + $0x9f0] ss:$8 sps:$4 sm:$0x3f]  }
0x1963   :  { %v8503_v23 = vpack.c.bf16 %v5212_v19, %v5211_v18  ;;  %8491 = vmatpush3.bf16.msk.msra.mxu0 %vm9298_vm11, %v8489_v53 }
0x1964   :  { %8492 = vmatprep.subr.bf16.mxu0 %v9006_v45 }
0x1965   :  { %8505 = vmatpush3.bf16.msk.msra.mxu1 %vm9298_vm11, %v8503_v23  ;;  %v8916_v23 = vld [vmem:[%s10602_s1 + $0xa80] ss:$8 sps:$4 sm:$0xff]  }
0x1966   :  { %8147 = vmatmul.mubr.msk.f32.vlgmr.msra.gmra.mrb[88].mxu0 %vm1186_vm12, %v9011_v32  ;;  %8506 = vmatprep.subr.bf16.mxu1 %v9006_v45 }
0x1967   :  { %8494 = vmatpush3.bf16.msra.mxu0 %v8493_v25  ;;  %8161 = vmatprep.mubr.msk.f32.mxu0 %vm9007_vm4, %v9008_v46 }
0x1968   :  { %8169 = vmatmul.mubr.msk.f32.vlgmr.msra.gmra.mrb[64].mxu1 %vm1186_vm12, %v9011_v32  ;;  %8495 = vmatprep.subr.bf16.mxu0 %v9006_v45 }
0x1969   :  { %8508 = vmatpush3.bf16.msra.mxu1 %v8493_v25  ;;  %8183 = vmatprep.mubr.msk.f32.mxu1 %vm9007_vm4, %v9008_v46  ;;  %v8917_v25 = vld [vmem:[%s10602_s1 + $0xa90] ss:$8 sps:$4 sm:$0xff]  }
0x196a   :  { %8509 = vmatprep.subr.bf16.mxu1 %v9006_v45 }
0x196b   :  { %8497 = vmatpush3.bf16.msra.mxu0 %v8496_v29 }
0x196c   :  { %8498 = vmatprep.subr.bf16.mxu0 %v9006_v45 }
0x196d   :  { %8511 = vmatpush3.bf16.msra.mxu1 %v8496_v29  ;;  %v8919_v29 = vld [vmem:[%s10602_s1 + $0xa00] ss:$8 sps:$4 sm:$0xff]  }
0x196e   :  { %8512 = vmatprep.subr.bf16.mxu1 %v9006_v45 }
0x196f   :  { %8501 = vmatpush3.bf16.msk.msra.mxu0 %vm9146_vm7, %v8499_v31 }
0x1970   :  { %8186 = vmatprep.subr.bf16.mxu0 %v9008_v46 }
0x1971   :  { %8515 = vmatpush3.bf16.msk.msra.mxu1 %vm9146_vm7, %v8499_v31 }
0x1972   :  { %8196 = vmatprep.subr.bf16.mxu1 %v9008_v46 }
0x1a39   :  { %v5131_v32 = vpop.f32.mrb[88].mxu0 }
0x1a3a   :  { %8162 = vmatmul.mubr.msk.f32.vlgmr.msra.gmra.mrb[90].mxu0 %vm552_vm9, %v5131_v32  ;;  %v8148_v33 = vpop.f32.mrb[89].mxu0 }
0x1a3b   :  { %v5282_v9 = vpop.f32.mrb[64].mxu1  ;;  %8192 = vmatprep.mubr.msk.bf16.mxu0 %vm9007_vm4, %v9008_v46  ;;  %8187 = vmatpush3.bf16.msra.mxu0 %v8908_v14  ;;  %v8921_v14 = vld [vmem:[%s10602_s1 + $0x9c0] ss:$8 sps:$4 sm:$0xff]  }
0x1a3c   :  { %8184 = vmatmul.mubr.msk.f32.vlgmr.msra.gmra.mrb[66].mxu1 %vm552_vm9, %v5282_v9  ;;  %v8170_v34 = vpop.f32.mrb[65].mxu1  ;;  %8188 = vmatprep.subr.bf16.mxu0 %v9008_v46 }
0x1a3d   :  { %8202 = vmatprep.mubr.msk.bf16.mxu1 %vm9007_vm4, %v9008_v46  ;;  %8197 = vmatpush3.bf16.msra.mxu1 %v8909_v8  ;;  %v8920_v34 = vld [vmem:[%s10602_s1 + $0xa10] ss:$8 sps:$4 sm:$0x3f]  }
0x1a3e   :  { %8198 = vmatprep.subr.bf16.mxu1 %v9008_v46 }
0x1a3f   :  { %8189 = vmatpush3.bf16.msra.mxu0 %v8910_v35  ;;  %v8922_v35 = vld [vmem:[%s10602_s1 + $0x9d0] ss:$8 sps:$4 sm:$0x3f]  }
0x1a40   :  { %8190 = vmatprep.subr.bf16.mxu0 %v9008_v46 }
0x1a41   :  { %8199 = vmatpush3.bf16.msra.mxu1 %v8911_v28  ;;  %v5815_v28 = vld [vmem:[%s10603_s2 + $0x270] sm:$0xff] }
0x1a42   :  { %8200 = vmatprep.subr.bf16.mxu1 %v9008_v46  ;;  %v8524_v27 = vpack.c.bf16 %v5816_v36, %v5815_v28 }
0x1a43   :  { %8191 = vmatpush3.bf16.msra.mxu0 %v5419_v37  ;;  %v5817_v37 = vld [vmem:[%s10603_s2 + $0x290] sm:$0xff] }
0x1a45   :  { %8201 = vmatpush3.bf16.msra.mxu1 %v5491_v3  ;;  %v5818_v3 = vld [vmem:[%s10603_s2 + $0x2a0] sm:$0xff] }
0x1a46   :  { %8516 = vmatprep.subr.bf16.mxu1 %v9006_v45 }
0x1b0d   :  { %v5207_v13 = vpop.f32.mrb[90].mxu0 }
0x1b0e   :  { %v5359_v38 = vmul.f32 %v5207_v13, %v5207_v13  ;;  %v8163_v39 = vpop.f32.mrb[91].mxu0 }
0x1b0f   :  { %v5355_v40 = vpop.f32.mrb[66].mxu1  ;;  %v5820_v39 = vld [vmem:[%s10603_s2 + $0x2c0] sm:$0x3] }
0x1b10   :  { %v5360_v41 = vsub.f32 %v5355_v40, %v5359_v38  ;;  %v8185_v42 = vpop.f32.mrb[67].mxu1  ;;  %v5819_v38 = vld [vmem:[%s10603_s2 + $0x2b0] sm:$0xff] }
0x1b11   :  { %v8530_v40 = vpack.c.bf16 %v5820_v39, %v5819_v38 }
0x1b12   :  { %v5361_v43 = vmax.f32 %v5360_v41, 0.0 }
0x1b14   :  { %v5363_v44 = vadd.f32 1e-05, %v5361_v43 }
0x1b16   :  { %8962 = vrsqrt.f32 %v5363_v44 }
0x1b20   :  { %v8963_v48 = vpop.eup %8962 }
0x1b21   :  { %v5365_v49 = vmul.f32 %v8963_v48, %v5362_v47 }
0x1b23   :  { %v5369_v51 = vrot.slane %v5365_v49, %v9193_v22  ;;  %v5373_v52 = vmul.f32 %v5365_v49, %v5207_v13  ;;  %v8527_v13 = vpack.c.bf16 %v5818_v3, %v5817_v37 }
0x1b25   :  { %v5370_v55 = vmul.f32 %v5369_v51, %v10183_v12  ;;  %v5371_v57 = vmul.f32 %v5369_v51, %v10185_v16  ;;  %v5374_v58 = vsub.f32 %v5372_v50, %v5373_v52 }
0x1b27   :  { %v5378_v59 = vrot.slane %v5374_v58, %v9193_v22 }
0x1b29   :  { %v5379_v60 = vadd.f32 %v5378_v59, %v5370_v55  ;;  %v5380_v61 = vadd.f32 %v5378_v59, %v5371_v57 }
0x1b2b   :  { %vm5381_vm1 = vcmp.ge.f32.partialorder %v5379_v60, 0.0  ;;  %vm5382_vm11 = vcmp.ge.f32.partialorder %v5380_v61, 0.0  ;;  %v5383_v62 = vmul.f32 0.01, %v5379_v60  ;;  %v5384_v63 = vmul.f32 0.01, %v5380_v61 }
0x1b2d   :  { %v5385_v0 = vsel %vm5381_vm1, %v5379_v60, %v5383_v62  ;;  %v5386_v1 = vsel %vm5382_vm11, %v5380_v61, %v5384_v63  ;;  %v8923_v63 = vld [vmem:[%s10602_s1 + $0xba0] ss:$8 sps:$4 sm:$0xff]   ;;  %vm10620_vm1 = vmmov %vm10619_vm0 }
0x1b2e   :  { %v5387_v2 = vpack.c.bf16 %v5386_v1, %v5385_v0  ;;  %v8924_v0 = vld [vmem:[%s10602_s1 + $0xb70] ss:$8 sps:$4 sm:$0xff]   ;;  %v8926_v1 = vld [vmem:[%s10602_s1 + $0xb80] ss:$8 sps:$4 sm:$0xff]  }
0x1b30   :  { %8193 = vmatmul.mubr.msk.bf16.vlgmr.msra.gmra.mrb[92].mxu0 %vm552_vm9, %v5387_v2  ;;  %8203 = vmatmul.mubr.msk.bf16.vlgmr.msra.gmra.mrb[68].mxu1 %vm552_vm9, %v5387_v2 }
0x1b31   :  { %8242 = vmatprep.mubr.msk.f32.mxu1 %vm9007_vm4, %v9008_v46  ;;  %8208 = vmatprep.mubr.msk.bf16.mxu0 %vm1186_vm12, %v8914_v4  ;;  %v8928_v4 = vld [vmem:[%s10602_s1 + $0xb90] ss:$8 sps:$4 sm:$0x1f]  }
0x1c03   :  { %v5455_v7 = vpop.f32.mrb[92].mxu0  ;;  %v5527_v10 = vpop.f32.mrb[68].mxu1 }
0x1c04   :  { %v8194_v11 = vpop.f32.mrb[93].mxu0  ;;  %v8204_v12 = vpop.f32.mrb[69].mxu1 }
0x1c05   :  { %v5458_v15 = vpop.f32.mrb[94].mxu0  ;;  %v5530_v16 = vpop.f32.mrb[70].mxu1  ;;  %v8929_v11 = vld [vmem:[%s10602_s1 + $0xbd0] ss:$8 sps:$4 sm:$0xff]  }
0x1c06   :  { %v5462_v17 = vpack.c.bf16 %v5458_v15, %v5455_v7  ;;  %v5534_v54 = vpack.c.bf16 %v5530_v16, %v5527_v10  ;;  %v8195_v18 = vpop.f32.mrb[95].mxu0  ;;  %v8205_v53 = vpop.f32.mrb[71].mxu1  ;;  %v6197_v10 = vsel %vm947_vm10, %v8928_v4, 0 }
0x1c07   :  { %v6123_v53 = vld [vmem:[%s10603_s2 + $0x2d0] ss:$0 sm:$0xff] }
0x1c08   :  { %v5552_v19 = vsel %vm1514_vm13, %v5534_v54, 0  ;;  %8668 = vmatprep.subr.msk.bf16.mxu0 %vm1514_vm13, %v5534_v54  ;;  %v5760_v8 = vsel %vm1514_vm13, %v5462_v17, 0 }
0x1c09   :  { %8207 = vmatpush3.bf16.msra.mxu0 %v5552_v19 }
0x1c0a   :  { %8212 = vmatprep.subr.bf16.mxu0 %v9008_v46 }
0x1c0c   :  { %8209 = vmatmul.mubr.msk.bf16.vlgmr.msra.gmra.mrb[96].mxu0 %vm1186_vm12, %v8915_v21 }
0x1c0d   :  { %8213 = vmatpush3.bf16.msra.mxu0 %v8916_v23  ;;  %8218 = vmatprep.mubr.msk.bf16.mxu0 %vm9007_vm4, %v9008_v46  ;;  %v6135_v23 = vld [vmem:[%s10603_s2 + $0x2e0] ss:$0 sm:$0xff] }
0x1c0e   :  { %8214 = vmatprep.subr.bf16.mxu0 %v9008_v46 }
0x1c11   :  { %8215 = vmatpush3.bf16.msra.mxu0 %v8917_v25 }
0x1c12   :  { %8216 = vmatprep.subr.bf16.mxu0 %v9008_v46 }
0x1c15   :  { %8217 = vmatpush3.bf16.msra.mxu0 %v5631_v20 }
0x1c18   :  { %8219 = vmatmul.mubr.msk.bf16.vlgmr.msra.gmra.mrb[100].mxu0 %vm552_vm9, %v5387_v2  ;;  %v8927_v2 = vld [vmem:[%s10602_s1 + $0xbc0] ss:$8 sps:$4 sm:$0x1f]  }
0x1c19   :  { %8224 = vmatprep.mubr.msk.bf16.mxu0 %vm1186_vm12, %v8919_v29  ;;  %v6281_v7 = vsel %vm947_vm10, %v8927_v2, 0 }
0x1ceb   :  { %v5667_v26 = vpop.f32.mrb[100].mxu0 }
0x1cec   :  { %v8220_v30 = vpop.f32.mrb[101].mxu0 }
0x1ced   :  { %v5670_v31 = vpop.f32.mrb[102].mxu0 }
0x1cee   :  { %v5674_v32 = vpack.c.bf16 %v5670_v31, %v5667_v26  ;;  %v8221_v33 = vpop.f32.mrb[103].mxu0 }
0x1cf0   :  { %v5692_v9 = vsel %vm1514_vm13, %v5674_v32, 0  ;;  %8669 = vmatprep.subr.msk.bf16.mxu0 %vm1514_vm13, %v5674_v32 }
0x1cf1   :  { %8223 = vmatpush3.bf16.msra.mxu0 %v5692_v9 }
0x1cf2   :  { %8670 = vmatprep.subr.msk.bf16.mxu0 %vm1514_vm13, %v5462_v17 }
0x1cf4   :  { %8225 = vmatmul.mubr.msk.bf16.vlgmr.msra.gmra.mrb[96].mxu0 %vm1186_vm12, %v8920_v34 }
0x1cf5   :  { %8229 = vmatpush3.bf16.msra.mxu0 %v5760_v8  ;;  %8230 = vmatprep.mubr.msk.bf16.mxu0 %vm1186_vm12, %v8921_v14 }
0x1cf6   :  { %8540 = vmatprep.subr.bf16.mxu0 %v9006_v45 }
0x1d00   :  { %8231 = vmatmul.mubr.msk.bf16.vlgmr.msra.gmra.mrb[96].mxu0 %vm1186_vm12, %v8922_v35 }
0x1d01   :  { %8283 = vmatprep.mubr.msk.f32.mxu0 %vm9007_vm4, %v9008_v46  ;;  %8542 = vmatpush3.bf16.msra.mxu0 %v8524_v27 }
0x1d02   :  { %8543 = vmatprep.subr.bf16.mxu0 %v9006_v45 }
0x1d05   :  { %8545 = vmatpush3.bf16.msra.mxu0 %v8527_v13 }
0x1d06   :  { %8546 = vmatprep.subr.bf16.mxu0 %v9006_v45 }
0x1d09   :  { %8549 = vmatpush3.bf16.msk.msra.mxu0 %vm9146_vm7, %v8530_v40 }
0x1d0a   :  { %8296 = vmatprep.subr.bf16.mxu0 %v8923_v63 }
0x1dd3   :  { %v10351_v41 = vpop.f32.mrb[96].mxu0 }
0x1dd4   :  { %v10353_v42 = vpop.f32.mrb[97].mxu0  ;;  %v5972_v44 = vmul.f32 %v10351_v41, %v10351_v41 }
0x1dd5   :  { %v10355_v43 = vpop.f32.mrb[98].mxu0  ;;  %v5970_v50 = vmul.f32 %v10353_v42, %v10353_v42 }
0x1dd6   :  { %v8520_v47 = vpack.c.bf16 %v10355_v43, %v10351_v41  ;;  %v5973_v48 = vmul.f32 %v10355_v43, %v10355_v43  ;;  %v10363_v49 = vpop.f32.mrb[99].mxu0 }
0x1dd7   :  { %v8517_v51 = vpack.c.bf16 %v10363_v49, %v10353_v42  ;;  %v5971_v52 = vmul.f32 %v10363_v49, %v10363_v49 }
0x1dd8   :  { %v8537_v55 = vpack.c.bf16 %v5973_v48, %v5972_v44 }
0x1dd9   :  { %v8534_v57 = vpack.c.bf16 %v5971_v52, %v5970_v50  ;;  %8518 = vmatpush3.bf16.msra.mxu1 %v8517_v51 }
0x1dda   :  { %8519 = vmatprep.subr.bf16.mxu1 %v9006_v45 }
0x1ddd   :  { %8522 = vmatpush3.bf16.msk.msra.mxu1 %vm9157_vm8, %v8520_v47 }
0x1dde   :  { %8523 = vmatprep.subr.bf16.mxu1 %v9006_v45 }
0x1de0   :  { %8243 = vmatmul.mubr.msk.f32.vlgmr.msra.gmra.mrb[72].mxu1 %vm193_vm3, %v9010_v6 }
0x1de1   :  { %8525 = vmatpush3.bf16.msra.mxu1 %v8524_v27  ;;  %8257 = vmatprep.mubr.msk.f32.mxu1 %vm9007_vm4, %v9008_v46 }
0x1de2   :  { %8526 = vmatprep.subr.bf16.mxu1 %v9006_v45 }
0x1de5   :  { %8528 = vmatpush3.bf16.msra.mxu1 %v8527_v13 }
0x1de6   :  { %8529 = vmatprep.subr.bf16.mxu1 %v9006_v45 }
0x1de9   :  { %8532 = vmatpush3.bf16.msk.msra.mxu1 %vm9146_vm7, %v8530_v40  ;;  %v8930_v40 = vld [vmem:[%s10602_s1 + $0xbe0] ss:$8 sps:$4 sm:$0xff]  }
0x1dea   :  { %8533 = vmatprep.subr.bf16.mxu1 %v9006_v45 }
0x1eb3   :  { %v5890_v58 = vpop.f32.mrb[72].mxu1 }
0x1eb4   :  { %8258 = vmatmul.mubr.msk.f32.vlgmr.msra.gmra.mrb[74].mxu1 %vm552_vm9, %v5890_v58  ;;  %v8244_v59 = vpop.f32.mrb[73].mxu1 }
0x1eb5   :  { %8535 = vmatpush3.bf16.msra.mxu1 %v8534_v57  ;;  %8268 = vmatprep.mubr.msk.f32.mxu1 %vm9007_vm4, %v9008_v46 }
0x1eb6   :  { %8536 = vmatprep.subr.bf16.mxu1 %v9006_v45 }
0x1eb9   :  { %8539 = vmatpush3.bf16.msk.msra.mxu1 %vm9157_vm8, %v8537_v55 }
0x1eba   :  { %8286 = vmatprep.subr.bf16.mxu1 %v8924_v0 }
0x1ebc   :  { %8269 = vmatmul.mubr.msk.f32.vlgmr.msra.gmra.mrb[76].mxu1 %vm193_vm3, %v9010_v6  ;;  %v8925_v6 = vld [vmem:[%s10602_s1 + $0xbb0] ss:$8 sps:$4 sm:$0xff]  }
0x1ebd   :  { %8287 = vmatpush3.bf16.msra.mxu1 %v8924_v0 }
0x1ebe   :  { %8288 = vmatprep.subr.bf16.mxu1 %v8926_v1 }
0x1ec1   :  { %8289 = vmatpush3.bf16.msra.mxu1 %v8926_v1 }
0x1ec2   :  { %8671 = vmatprep.subr.msk.bf16.mxu1 %vm947_vm10, %v8928_v4 }
0x1ec5   :  { %8291 = vmatpush3.bf16.msra.mxu1 %v6197_v10  ;;  %v8936_v10 = vld [vmem:[%s10602_s1 + $0xb30] ss:$8 sps:$4 sm:$0xff]  }
0x1f87   :  { %v5966_v56 = vpop.f32.mrb[74].mxu1 }
0x1f88   :  { %v8259_v60 = vpop.f32.mrb[75].mxu1  ;;  %v6120_v12 = vmul.f32 %v5966_v56, %v5966_v56 }
0x1f8f   :  { %v6043_v61 = vpop.f32.mrb[76].mxu1 }
0x1f90   :  { %8284 = vmatmul.mubr.msk.f32.vlgmr.msra.gmra.mrb[104].mxu0 %vm552_vm9, %v6043_v61  ;;  %v8270_v62 = vpop.f32.mrb[77].mxu1  ;;  %v8933_v61 = vld [vmem:[%s10602_s1 + $0xb00] ss:$8 sps:$4 sm:$0xff]  }
0x1f91   :  { %8297 = vmatpush3.bf16.msra.mxu0 %v8923_v63  ;;  %v8934_v62 = vld [vmem:[%s10602_s1 + $0xb10] ss:$8 sps:$4 sm:$0xff]  }
0x1f92   :  { %8298 = vmatprep.subr.bf16.mxu0 %v8925_v6 }
0x1f95   :  { %8299 = vmatpush3.bf16.msra.mxu0 %v8925_v6 }
0x1f96   :  { %8672 = vmatprep.subr.msk.bf16.mxu0 %vm947_vm10, %v8927_v2 }
0x1f99   :  { %8301 = vmatpush3.bf16.msra.mxu0 %v6281_v7  ;;  %v8935_v7 = vld [vmem:[%s10602_s1 + $0xb20] ss:$0 sps:$4 sm:$0xff]  }
0x1f9a   :  { %8318 = vmatprep.subr.bf16.mxu0 %v8929_v11 }
0x2063   :  { %v6116_v15 = vpop.f32.mrb[104].mxu0 }
0x2064   :  { %v6121_v16 = vsub.f32 %v6116_v15, %v6120_v12  ;;  %v8285_v17 = vpop.f32.mrb[105].mxu0  ;;  %v8937_v12 = vld [vmem:[%s10602_s1 + $0xb40] ss:$8 sps:$4 sm:$0xff]   ;;  %v8938_v15 = vld [vmem:[%s10602_s1 + $0xb50] ss:$8 sps:$4 sm:$0xff]  }
0x2065   :  { %v8939_v17 = vld [vmem:[%s10602_s1 + $0xb60] ss:$0 sps:$4 sm:$0xff]  }
0x2066   :  { %v6122_v54 = vmax.f32 %v6121_v16, 0.0 }
0x2068   :  { %v6124_v18 = vadd.f32 1e-05, %v6122_v54  ;;  %v8940_v54 = vld [vmem:[%s10602_s1 + $0xab0] ss:$8 sps:$4 sm:$0xff]  }
0x206a   :  { %8964 = vrsqrt.f32 %v6124_v18  ;;  %v8941_v18 = vld [vmem:[%s10602_s1 + $0xac0] ss:$8 sps:$4 sm:$0xff]  }
0x2074   :  { %v8965_v19 = vpop.eup %8964 }
0x2075   :  { %v6126_v21 = vmul.f32 %v8965_v19, %v6123_v53  ;;  %v8942_v53 = vld [vmem:[%s10602_s1 + $0xad0] ss:$8 sps:$4 sm:$0xff]   ;;  %v8943_v19 = vld [vmem:[%s10602_s1 + $0xae0] ss:$0 sps:$4 sm:$0xff]  }
0x2077   :  { %v6130_v25 = vrot.slane %v6126_v21, %v9193_v22  ;;  %v6136_v24 = vmul.f32 %v6126_v21, %v5966_v56 }
0x2079   :  { %v6137_v20 = vsub.f32 %v6135_v23, %v6136_v24  ;;  %v6131_v29 = vmul.f32 %v6130_v25, %v10353_v42  ;;  %v6132_v26 = vmul.f32 %v6130_v25, %v10363_v49  ;;  %v6133_v30 = vmul.f32 %v10351_v41, %v6130_v25  ;;  %v8931_v41 = vld [vmem:[%s10602_s1 + $0xbf0] ss:$8 sps:$4 sm:$0x1f]  }
0x207a   :  { %v6134_v31 = vmul.f32 %v10355_v43, %v6130_v25  ;;  %v6462_v42 = vsel %vm947_vm10, %v8931_v41, 0  ;;  %v8932_v43 = vld [vmem:[%s10602_s1 + $0xaf0] ss:$8 sps:$4 sm:$0xff]  }
0x207b   :  { %v6141_v32 = vrot.slane %v6137_v20, %v9193_v22 }
0x207d   :  { %v6142_v33 = vadd.f32 %v6141_v32, %v6131_v29  ;;  %v6143_v9 = vadd.f32 %v6141_v32, %v6132_v26  ;;  %v6144_v34 = vadd.f32 %v6141_v32, %v6133_v30  ;;  %v6145_v14 = vadd.f32 %v6141_v32, %v6134_v31 }
0x207f   :  { %vm6146_vm7 = vcmp.ge.f32.partialorder %v6142_v33, 0.0  ;;  %vm6147_vm12 = vcmp.ge.f32.partialorder %v6143_v9, 0.0  ;;  %v6150_v8 = vmul.f32 0.01, %v6142_v33  ;;  %v6151_v35 = vmul.f32 0.01, %v6143_v9 }
0x2080   :  { %vm6148_vm13 = vcmp.ge.f32.partialorder %v6144_v34, 0.0  ;;  %vm6149_vm14 = vcmp.ge.f32.partialorder %v6145_v14, 0.0  ;;  %v6152_v28 = vmul.f32 0.01, %v6144_v34  ;;  %v6153_v36 = vmul.f32 0.01, %v6145_v14 }
0x2081   :  { %v6154_v27 = vsel %vm6146_vm7, %v6142_v33, %v6150_v8  ;;  %v6155_v37 = vsel %vm6147_vm12, %v6143_v9, %v6151_v35 }
0x2082   :  { %v6158_v3 = vpack.c.bf16 %v6155_v37, %v6154_v27  ;;  %v6156_v13 = vsel %vm6148_vm13, %v6144_v34, %v6152_v28  ;;  %v6157_v38 = vsel %vm6149_vm14, %v6145_v14, %v6153_v36  ;;  %v6716_v37 = vld [vmem:[%s10603_s2 + $0x2f0] sm:$0xff] }
0x2083   :  { %v6159_v39 = vpack.c.bf16 %v6157_v38, %v6156_v13 }
0x2084   :  { %8292 = vmatprep.mubr.msk.bf16.mxu1 %vm552_vm9, %v6158_v3  ;;  %8302 = vmatprep.mubr.msk.bf16.mxu0 %vm552_vm9, %v6158_v3 }
0x2085   :  { %8293 = vmatmul.mubr.msk.bf16.vlgmr.msra.gmra.mrb[80].mxu1 %vm552_vm9, %v6159_v39  ;;  %8303 = vmatmul.mubr.msk.bf16.vlgmr.msra.gmra.mrb[108].mxu0 %vm552_vm9, %v6159_v39 }
0x2086   :  { %8319 = vmatpush3.bf16.msra.mxu0 %v8929_v11  ;;  %8324 = vmatprep.mubr.msk.bf16.mxu0 %vm552_vm9, %v6158_v3  ;;  %v6717_v3 = vld [vmem:[%s10603_s2 + $0x300] sm:$0xff] }
0x2087   :  { %8320 = vmatprep.subr.bf16.mxu0 %v8930_v40  ;;  %8310 = vmatprep.mubr.msk.bf16.mxu1 %vm193_vm3, %v8932_v43  ;;  %v8560_v38 = vpack.c.bf16 %v6717_v3, %v6716_v37 }
0x208a   :  { %8321 = vmatpush3.bf16.msra.mxu0 %v8930_v40  ;;  %v6719_v40 = vld [vmem:[%s10603_s2 + $0x320] sm:$0xf] }
0x208b   :  { %8674 = vmatprep.subr.msk.bf16.mxu0 %vm947_vm10, %v8931_v41 }
0x208e   :  { %8323 = vmatpush3.bf16.msra.mxu0 %v6462_v42  ;;  %v9016_v42 = vmov 0.017857144  }
0x208f   :  { %8550 = vmatprep.subr.bf16.mxu0 %v9006_v45 }
0x2091   :  { %8325 = vmatmul.mubr.msk.bf16.vlgmr.msra.gmra.mrb[112].mxu0 %vm552_vm9, %v6159_v39  ;;  %vm10613_vm9 = vcmask 1045504   ;;  %v6718_v39 = vld [vmem:[%s10603_s2 + $0x310] sm:$0xff] }
0x2092   :  { %8366 = vmatprep.mubr.msk.f32.mxu0 %vm9007_vm4, %v9008_v46  ;;  %vm10614_vm10 = vmmov %vm10613_vm9  ;;  %v8563_v43 = vpack.c.bf16 %v6719_v40, %v6718_v39 }
0x2093   :  { %vm10615_vm15 = vmmov %vm10613_vm9 }
0x2094   :  { %vm10616_vm6 = vmmov %vm10613_vm9 }
0x2095   :  { %vm10617_vm2 = vmmov %vm10616_vm6 }
0x2096   :  { %vm10618_vm5 = vmmov %vm10617_vm2 }
0x2158   :  { %v8294_v44 = vpop.f32.mrb[80].mxu1  ;;  %v8304_v47 = vpop.f32.mrb[108].mxu0 }
0x2159   :  { %v6233_v48 = vpop.f32.mrb[81].mxu1  ;;  %v6317_v49 = vpop.f32.mrb[109].mxu0 }
0x215a   :  { %v8295_v50 = vpop.f32.mrb[82].mxu1  ;;  %v8305_v51 = vpop.f32.mrb[110].mxu0 }
0x215b   :  { %v6249_v52 = vpack.c.bf16 %v8295_v50, %v8294_v44  ;;  %v6333_v55 = vpack.c.bf16 %v8305_v51, %v8304_v47  ;;  %v6236_v57 = vpop.f32.mrb[83].mxu1  ;;  %v6320_v58 = vpop.f32.mrb[111].mxu0 }
0x215c   :  { %v6248_v59 = vpack.c.bf16 %v6236_v57, %v6233_v48  ;;  %v6332_v56 = vpack.c.bf16 %v6320_v58, %v6317_v49 }
0x215d   :  { %v6365_v60 = vsel %vm10614_vm10, %v6333_v55, 0  ;;  %v6643_v16 = vsel %vm10618_vm5, %v6249_v52, 0 }
0x215e   :  { %8306 = vmatprep.subr.bf16.mxu1 %v6332_v56 }
0x215f   :  { %8307 = vmatpush3.bf16.msra.mxu1 %v6332_v56 }
0x2160   :  { %8673 = vmatprep.subr.msk.bf16.mxu1 %vm10613_vm9, %v6333_v55 }
0x2163   :  { %8309 = vmatpush3.bf16.msra.mxu1 %v6365_v60 }
0x2164   :  { %v8326_v63 = vpop.f32.mrb[112].mxu0 }
0x2165   :  { %v6498_v0 = vpop.f32.mrb[113].mxu0 }
0x2166   :  { %v8327_v6 = vpop.f32.mrb[114].mxu0  ;;  %8311 = vmatmul.mubr.msk.bf16.vlgmr.msra.gmra.mrb[84].mxu1 %vm193_vm3, %v8933_v61  ;;  %v7037_v61 = vld [vmem:[%s10603_s2 + $0x340] ss:$0 sm:$0xff] }
0x2167   :  { %v6514_v1 = vpack.c.bf16 %v8327_v6, %v8326_v63  ;;  %v6501_v2 = vpop.f32.mrb[115].mxu0  ;;  %8314 = vmatprep.mubr.msk.bf16.mxu1 %vm193_vm3, %v8934_v62 }
0x2168   :  { %v6513_v4 = vpack.c.bf16 %v6501_v2, %v6498_v0 }
0x2169   :  { %v6546_v11 = vsel %vm10616_vm6, %v6514_v1, 0 }
0x216a   :  { %8328 = vmatprep.subr.bf16.mxu1 %v6513_v4 }
0x216b   :  { %8329 = vmatpush3.bf16.msra.mxu1 %v6513_v4 }
0x216c   :  { %8675 = vmatprep.subr.msk.bf16.mxu1 %vm10615_vm15, %v6514_v1 }
0x216e   :  { %8315 = vmatmul.mubr.msk.bf16.gmra.mrb[88].mxu1 %vm193_vm3, %v8935_v7 }
0x216f   :  { %8331 = vmatpush3.bf16.msra.mxu1 %v6546_v11  ;;  %8332 = vmatprep.mubr.msk.bf16.mxu1 %vm193_vm3, %v8936_v10 }
0x2170   :  { %8340 = vmatprep.subr.bf16.mxu1 %v6248_v59 }
0x2176   :  { %8333 = vmatmul.mubr.msk.bf16.vlgmr.msra.gmra.mrb[84].mxu1 %vm193_vm3, %v8937_v12 }
0x2177   :  { %8341 = vmatpush3.bf16.msra.mxu1 %v6248_v59  ;;  %8336 = vmatprep.mubr.msk.bf16.mxu1 %vm193_vm3, %v8938_v15 }
0x2178   :  { %8676 = vmatprep.subr.msk.bf16.mxu1 %vm10617_vm2, %v6249_v52 }
0x217b   :  { %8343 = vmatpush3.bf16.msra.mxu1 %v6643_v16 }
0x217c   :  { %8566 = vmatprep.subr.bf16.mxu1 %v9006_v45 }
0x217e   :  { %8337 = vmatmul.mubr.msk.bf16.gmra.mrb[88].mxu1 %vm193_vm3, %v8939_v17 }
0x217f   :  { %8344 = vmatprep.mubr.msk.bf16.mxu1 %vm193_vm3, %v8940_v54 }
0x2186   :  { %8345 = vmatmul.mubr.msk.bf16.vlgmr.msra.gmra.mrb[84].mxu1 %vm193_vm3, %v8941_v18 }
0x2187   :  { %8348 = vmatprep.mubr.msk.bf16.mxu1 %vm193_vm3, %v8942_v53 }
0x218e   :  { %8349 = vmatmul.mubr.msk.bf16.gmra.mrb[88].mxu1 %vm193_vm3, %v8943_v19 }
0x218f   :  { %8394 = vmatprep.mubr.msk.f32.mxu1 %vm9007_vm4, %v9008_v46 }
0x2259   :  { %v10504_v21 = vpop.f32.mrb[84].mxu1 }
0x225a   :  { %v10506_v23 = vpop.f32.mrb[85].mxu1  ;;  %v6871_v24 = vmul.f32 %v10504_v21, %v10504_v21 }
0x225b   :  { %v10508_v25 = vpop.f32.mrb[86].mxu1  ;;  %v6869_v30 = vmul.f32 %v10506_v23, %v10506_v23 }
0x225c   :  { %v8554_v20 = vpack.c.bf16 %v10508_v25, %v10504_v21  ;;  %v6872_v29 = vmul.f32 %v10508_v25, %v10508_v25  ;;  %v10516_v26 = vpop.f32.mrb[87].mxu1 }
0x225d   :  { %v8551_v31 = vpack.c.bf16 %v10516_v26, %v10506_v23  ;;  %v6870_v32 = vmul.f32 %v10516_v26, %v10516_v26 }
0x225e   :  { %v8570_v33 = vpack.c.bf16 %v6872_v29, %v6871_v24 }
0x225f   :  { %v8567_v9 = vpack.c.bf16 %v6870_v32, %v6869_v30  ;;  %8552 = vmatpush3.bf16.msra.mxu0 %v8551_v31 }
0x2260   :  { %8553 = vmatprep.subr.bf16.mxu0 %v9006_v45 }
0x2261   :  { %v10525_v34 = vpop.f32.mrb[88].mxu1  ;;  %8568 = vmatpush3.bf16.msra.mxu1 %v8567_v9 }
0x2262   :  { %v10527_v14 = vpop.f32.mrb[89].mxu1  ;;  %8569 = vmatprep.subr.bf16.mxu1 %v9006_v45  ;;  %v6875_v41 = vmul.f32 %v10525_v34, %v10525_v34 }
0x2263   :  { %v8351_v8 = vpop.f32.mrb[90].mxu1  ;;  %8555 = vmatpush3.bf16.msra.mxu0 %v8554_v20  ;;  %v6873_v28 = vmul.f32 %v10527_v14, %v10527_v14 }
0x2264   :  { %v6698_v35 = vpop.f32.mrb[91].mxu1  ;;  %8556 = vmatprep.subr.bf16.mxu0 %v9006_v45 }
0x2265   :  { %v8557_v36 = vpack.c.bf16 %v6698_v35, %v10527_v14  ;;  %v6874_v27 = vmul.f32 %v6698_v35, %v6698_v35  ;;  %8571 = vmatpush3.bf16.msra.mxu1 %v8570_v33 }
0x2266   :  { %8572 = vmatprep.subr.bf16.mxu1 %v9006_v45 }
0x2267   :  { %v8573_v13 = vpack.c.bf16 %v6874_v27, %v6873_v28  ;;  %8558 = vmatpush3.bf16.msra.mxu0 %v8557_v36 }
0x2268   :  { %8364 = vmatprep.subr.mxu0 %v9008_v46 }
0x2269   :  { %8574 = vmatpush3.bf16.msra.mxu1 %v8573_v13 }
0x226a   :  { %8392 = vmatprep.subr.mxu1 %v9008_v46 }
0x226b   :  { %8365 = vmatpush3.msra.mxu0 %v10525_v34 }
0x226c   :  { %8367 = vmatmul.mubr.msk.f32.vlgmr.msra.gmra.mrb[106].mxu0 %vm10619_vm0, %v9016_v42  ;;  %8559 = vmatprep.subr.bf16.mxu0 %v9006_v45 }
0x226d   :  { %8393 = vmatpush3.msra.mxu1 %v6875_v41  ;;  %8561 = vmatpush3.bf16.msra.mxu0 %v8560_v38 }
0x226e   :  { %8395 = vmatmul.mubr.msk.f32.vlgmr.msra.gmra.mrb[78].mxu1 %vm10620_vm1, %v9016_v42  ;;  %8562 = vmatprep.subr.bf16.mxu0 %v9006_v45 }
0x226f   :  { %8377 = vmatprep.mubr.msk.f32.mxu0 %vm9007_vm4, %v9008_v46 }
0x2271   :  { %8565 = vmatpush3.bf16.msk.msra.mxu0 %vm9157_vm8, %v8563_v43 }
0x2272   :  { %8575 = vmatprep.subr.bf16.mxu0 %v9006_v45 }
0x233f   :  { %v6789_v44 = vpop.f32.mrb[106].mxu0 }
0x2340   :  { %8378 = vmatmul.mubr.msk.f32.vlgmr.msra.gmra.mrb[116].mxu0 %vm193_vm3, %v6789_v44  ;;  %v8368_v47 = vpop.f32.mrb[107].mxu0 }
0x2341   :  { %8577 = vmatpush3.bf16.msra.mxu0 %v8560_v38  ;;  %v6942_v48 = vpop.f32.mrb[78].mxu1  ;;  %8405 = vmatprep.mubr.msk.f32.mxu0 %vm9007_vm4, %v9008_v46  ;;  %v7022_v46 = vld [vmem:[%s10603_s2 + $0x330] ss:$0 sm:$0xff]  ;;  %s9017_s2 = smov [#allocation2]  }
0x2342   :  { %8578 = vmatprep.subr.bf16.mxu0 %v9006_v45  ;;  %v8396_v49 = vpop.f32.mrb[79].mxu1  ;;  %s7070_s27 = sshll.u32 %s9017_s2, 4  ;;  %s7071_s27 = int_to_ptr.vmem [resolvable:$true] %s7070_s27 }
0x2343   :  { %s8982_s28 = scalar_lea.vmem %s7071_s27, 896  ;;  %p8987_p1 = scmp.lt.s32.totalorder %s7071_s27, %s7071_s27 }
0x2344   :  { %p8983_p0 = scmp.ne.s32.totalorder %s7071_s27, %s8982_s28  ;;  %p8988_p2 = scmp.lt.s32.totalorder %s8982_s28, %s8982_s28 }
0x2345   :  { %8581 = vmatpush3.bf16.msk.msra.mxu0 %vm9157_vm8, %v8563_v43 }
0x2346   :  { %p8989_p3 = por %p8988_p2, %p8987_p1 }
0x2348   :  { %8406 = vmatmul.mubr.msk.f32.vlgmr.msra.gmra.mrb[118].mxu0 %vm193_vm3, %v6942_v48  ;;  %p8990_p4 = pnand %p8989_p3, %p8983_p0 }
0x2413   :  { %v6865_v50 = vpop.f32.mrb[116].mxu0 }
0x2414   :  { %v8379_v51 = vpop.f32.mrb[117].mxu0  ;;  %v7019_v52 = vmul.f32 %v6865_v50, %v6865_v50 }
0x241b   :  { %v7015_v55 = vpop.f32.mrb[118].mxu0 }
0x241c   :  { %v7020_v57 = vsub.f32 %v7015_v55, %v7019_v52  ;;  %v8407_v58 = vpop.f32.mrb[119].mxu0 }
0x241e   :  { %v7021_v59 = vmax.f32 %v7020_v57, 0.0 }
0x2420   :  { %v7023_v56 = vadd.f32 1e-05, %v7021_v59 }
0x2422   :  { %8966 = vrsqrt.f32 %v7023_v56 }
0x242c   :  { %v8967_v45 = vpop.eup %8966 }
0x242d   :  { %v7025_v60 = vmul.f32 %v8967_v45, %v7022_v46 }
0x242f   :  { %v7029_v5 = vrot.slane %v7025_v60, %v9193_v22  ;;  %v7038_v62 = vmul.f32 %v7025_v60, %v6865_v50 }
0x2431   :  { %v7030_v63 = vmul.f32 %v7029_v5, %v10506_v23  ;;  %v7031_v0 = vmul.f32 %v7029_v5, %v10516_v26  ;;  %v7032_v6 = vmul.f32 %v10504_v21, %v7029_v5  ;;  %v7033_v1 = vmul.f32 %v10508_v25, %v7029_v5 }
0x2432   :  { %v7034_v2 = vmul.f32 %v7029_v5, %v10527_v14  ;;  %v7035_v4 = vmul.f32 %v7029_v5, %v6698_v35  ;;  %v7036_v7 = vmul.f32 %v10525_v34, %v7029_v5  ;;  %v7039_v10 = vsub.f32 %v7037_v61, %v7038_v62 }
0x2434   :  { %v7043_v11 = vrot.slane %v7039_v10, %v9193_v22 }
0x2436   :  { %v7044_v12 = vadd.f32 %v7043_v11, %v7030_v63  ;;  %v7045_v15 = vadd.f32 %v7043_v11, %v7031_v0  ;;  %v7046_v16 = vadd.f32 %v7043_v11, %v7032_v6  ;;  %v7047_v17 = vadd.f32 %v7043_v11, %v7033_v1 }
0x2437   :  { %v7048_v54 = vadd.f32 %v7043_v11, %v7034_v2  ;;  %v7049_v18 = vadd.f32 %v7043_v11, %v7035_v4  ;;  %v7050_v53 = vadd.f32 %v7043_v11, %v7036_v7 }
0x2438   :  { %8968 = vtanh.f32 %v7044_v12 }
0x2439   :  { %8970 = vtanh.f32 %v7045_v15 }
0x243a   :  { %8972 = vtanh.f32 %v7046_v16 }
0x243b   :  { %8974 = vtanh.f32 %v7047_v17 }
0x243c   :  { %8976 = vtanh.f32 %v7048_v54 }
0x243d   :  { %8978 = vtanh.f32 %v7049_v18 }
0x243e   :  { %8980 = vtanh.f32 %v7050_v53 }
0x2442   :  { %v8969_v19 = vpop.eup %8968 }
0x2443   :  { %v8971_v21 = vpop.eup %8970  ;;  %7058 = vst.msk [vmem:[#allocation2] sm:$0xff] %vm193_vm3, %v8969_v19 }
0x2444   :  { %v8973_v22 = vpop.eup %8972  ;;  %7059 = vst.msk [vmem:[#allocation2 + $0x8] sm:$0xff] %vm193_vm3, %v8971_v21 }
0x2445   :  { %v8975_v23 = vpop.eup %8974  ;;  %7060 = vst.msk [vmem:[#allocation2 + $0x10] sm:$0xff] %vm193_vm3, %v8973_v22 }
0x2446   :  { %v8977_v25 = vpop.eup %8976  ;;  %7061 = vst.msk [vmem:[#allocation2 + $0x18] sm:$0xff] %vm193_vm3, %v8975_v23 }
0x2447   :  { %v8979_v24 = vpop.eup %8978  ;;  %7062 = vst.msk [vmem:[#allocation2 + $0x20] sm:$0xff] %vm193_vm3, %v8977_v25 }
0x2448   :  { %v8981_v20 = vpop.eup %8980  ;;  %7063 = vst.msk [vmem:[#allocation2 + $0x28] sm:$0xff] %vm193_vm3, %v8979_v24 }
0x2449   :  { %7064 = vst.msk [vmem:[#allocation2 + $0x30] sm:$0xff] %vm193_vm3, %v8981_v20 }
0x244a   :  { %8993 = shalt.err (!%p8990_p4)
}
0x244b   :  { %s8994_s30 = scalar_lea.hbm %s10604_s3, 896 }
0x244c   :  { %p8995_p5 = scmp.ne.s32.totalorder %s10604_s3, %s8994_s30  ;;  %p8998_p6 = scmp.lt.u32.totalorder %s8994_s30, %s10604_s3 }
0x244e   :  { %p9000_p7 = pnand %p8998_p6, %p8995_p5 }
0x2450   :  { %9003 = shalt.err (!%p9000_p7)
}
0x2451   :  { %s9018_s8 = smov 128   ;;  %s9019_s9 = smov 8  }
0x2452   :  { %7076 = dma.vmem_to_hbm [thread:$0]  %s7071_s27, 896, %s10604_s3, [#allocation3], %s9018_s8, %s9018_s8, %s9019_s9  }
0x2453   :  { %9004 = dma.done.wait [#allocation3], 896  }
0x2454   :  { %9005 = vsyncadd [#allocation3], 4294966400 }
0x2455   :  { %7080 = vsyncpa [#allocation3], 1 }

</bundles_post_ra>
